<compile_context>
chip_gen: v5e
topology: v5e:2x2
jax: 0.10.0
libtpu: 0.0.40
codegen_flags: <defaults>
</compile_context>

<pallas_src>
import jax
import jax.numpy as jnp
from jax.experimental import pallas as pl
from jax.experimental.pallas import tpu as pltpu

STATE_NUM = 2
NEG_SLOPE = 0.01        # F.leaky_relu default negative_slope
OUT_PAD = 128           # lane-dense final-output width (true out_dim = 2)
TM_ALIGN = 16           # bf16 (16,128) sublane packing of the batch tiles
DEFAULT_TM_MAX = 2048   # max rows per grid step


def _leaky_relu(v):
    return jnp.where(v > 0, v, NEG_SLOPE * v)


def net_kernel(x_ref,
               w1_ref, b1_ref,
               w2_ref, b2_ref,
               w3_ref, b3_ref,
               w4_ref, b4_ref,
               w5_ref, b5_ref,
               o_ref):
    def layer(h, w_ref, b_ref):
        # bf16 x bf16 MXU matmul, f32 accumulation; bias + leaky_relu in f32.
        y = jnp.dot(h.astype(jnp.bfloat16), w_ref[...],
                    preferred_element_type=jnp.float32) + b_ref[...]
        return _leaky_relu(y)

    h = x_ref[...]                    # (TM, 2)    bf16
    h = layer(h, w1_ref, b1_ref)      # (TM, 16)   f32
    h = layer(h, w2_ref, b2_ref)      # (TM, 64)   f32
    h = layer(h, w3_ref, b3_ref)      # (TM, 256)  f32
    h = layer(h, w4_ref, b4_ref)      # (TM, 1024) f32
    out = layer(h, w5_ref, b5_ref)    # (TM, 128)  f32, lane-dense slab
    o_ref[...] = out.astype(o_ref.dtype)   # bf16 writeback


def _round_up(v, m):
    return ((v + m - 1) // m) * m


def _choose_tm(batch, tm_max):
    """Near-equal batch tiles, 16-row aligned, >=2 grid steps when batch is big."""
    tm_max = max(TM_ALIGN, _round_up(tm_max, TM_ALIGN))
    n_tiles = pl.cdiv(batch, tm_max)
    # v7x has 2 TensorCores: the "parallel" batch axis only shards across
    # them if the grid has >= 2 steps; split whenever the batch is worth it.
    if n_tiles < 2 and batch > 8 * TM_ALIGN:
        n_tiles = 2
    return min(tm_max, _round_up(pl.cdiv(batch, n_tiles), TM_ALIGN))


def net_forward(x, params, tm_max=DEFAULT_TM_MAX):
    """x: (batch, 2) f32.  params: list of (W (in,out), b (1,out)) f32, 5 layers."""
    batch, n_in = x.shape
    out_dim = params[-1][0].shape[1]
    n_layers = len(params)

    tm = _choose_tm(batch, tm_max)
    padded_b = _round_up(batch, tm)
    grid = (padded_b // tm,)

    # Weights: bf16 matmul operands, f32 biases; last layer padded to a
    # lane-dense 128-wide output so the final store is an unmasked vst.
    flat = []
    layer_dims = []
    for li, (w, b) in enumerate(params):
        layer_dims.append(w.shape)
        if li == n_layers - 1:
            w = jnp.pad(w, ((0, 0), (0, OUT_PAD - w.shape[1])))
            b = jnp.pad(b, ((0, 0), (0, OUT_PAD - b.shape[1])))
        flat.append(w.astype(jnp.bfloat16))
        flat.append(b.astype(jnp.float32))

    xp = x.astype(jnp.bfloat16)
    if padded_b != batch:
        xp = jnp.pad(xp, ((0, padded_b - batch), (0, 0)))

    weight_bytes = sum(int(a.size) * a.dtype.itemsize for a in flat)
    flops = 2 * padded_b * sum(fi * fo for fi, fo in layer_dims)
    bytes_accessed = (weight_bytes
                      + int(xp.size) * xp.dtype.itemsize
                      + padded_b * OUT_PAD * 2)      # bf16 output slab

    # Rough per-step VMEM need: double-buffered x/out tiles, weights (worst
    # case double-buffered), plus the biggest in-flight f32 intermediates.
    vmem_est = (2 * tm * 128 * 2          # x slab (lane-padded bf16), 2 buffers
                + 2 * tm * OUT_PAD * 2    # bf16 out slab, 2 buffers
                + 2 * weight_bytes        # weights/biases
                + tm * 1024 * 4           # h4 f32
                + tm * 1024 * 2           # h4 bf16 copy feeding the last dot
                + tm * 256 * 4            # h3 f32
                + tm * OUT_PAD * 4)       # final f32 before the bf16 store
    vmem_limit = int(min(48 << 20, max(32 << 20, 2 * vmem_est)))

    def build(single_buffer_weights):
        # Constant index_maps -> weights stay VMEM-resident across grid steps;
        # single-buffering them frees ~0.85 MiB of pointless second buffers.
        wkw = ({"pipeline_mode": pl.Buffered(1)}
               if single_buffer_weights else {})
        weight_specs = [pl.BlockSpec(a.shape, lambda i: (0, 0), **wkw)
                        for a in flat]
        return pl.pallas_call(
            net_kernel,
            out_shape=jax.ShapeDtypeStruct((padded_b, OUT_PAD), jnp.bfloat16),
            grid=grid,
            in_specs=[pl.BlockSpec((tm, n_in), lambda i: (i, 0))] + weight_specs,
            out_specs=pl.BlockSpec((tm, OUT_PAD), lambda i: (i, 0)),
            compiler_params=pltpu.CompilerParams(
                dimension_semantics=("parallel",),
                vmem_limit_bytes=vmem_limit),
            cost_estimate=pl.CostEstimate(
                flops=flops, transcendentals=0, bytes_accessed=bytes_accessed),
        )

    try:
        out = build(True)(xp, *flat)
    except Exception:
        # This jax/Mosaic build rejects buffer_count=1; default buffering is
        # correct and only costs <1 MiB of VMEM headroom.
        out = build(False)(xp, *flat)

    return out[:batch, :out_dim].astype(jnp.float32)


def init_params(key, dims):
    """Deterministic init matching nn.Linear shapes; W stored as (in, out)."""
    params = []
    for i in range(len(dims) - 1):
        fan_in, fan_out = dims[i], dims[i + 1]
        key, kw, kb = jax.random.split(key, 3)
        bound = 1.0 / (fan_in ** 0.5)  # same scale as PyTorch's default init
        w = jax.random.uniform(kw, (fan_in, fan_out), jnp.float32,
                               minval=-bound, maxval=bound)
        b = jax.random.uniform(kb, (1, fan_out), jnp.float32,
                               minval=-bound, maxval=bound)
        params.append((w, b))
    return params


def reference_forward_f32(x, params):
    """Pure-f32 reference (semantics of the PyTorch module)."""
    h = x
    for w, b in params:
        h = _leaky_relu(h @ w + b)
    return h


def reference_forward_bf16(x, params):
    """Pure-JAX reference mirroring the kernel's mixed precision (f32 output)."""
    h = x
    for w, b in params:
        y = jnp.dot(h.astype(jnp.bfloat16), w.astype(jnp.bfloat16),
                    preferred_element_type=jnp.float32) + b
        h = _leaky_relu(y)
    return h


if __name__ == "__main__":
    key = jax.random.PRNGKey(0)
    kx, kp = jax.random.split(key)

    dims = [STATE_NUM, 16, 64, 256, 1024, 2]
    params = init_params(kp, dims)

    # Small shape consistent with the module (single small transition batch).
    x_small = jax.random.normal(kx, (2, STATE_NUM), jnp.float32)
    out_small = jax.block_until_ready(net_forward(x_small, params))
    assert out_small.shape == (2, 2), out_small.shape
    # Kernel adds one final bf16 writeback rounding on top of the bf16-matmul
    # reference, hence the 1e-2 tolerance.
    assert jnp.allclose(out_small, reference_forward_bf16(x_small, params),
                        atol=1e-2, rtol=1e-2)
    assert jnp.allclose(out_small, reference_forward_f32(x_small, params),
                        atol=6e-2, rtol=6e-2)

    # Non-multiple batch with a tiny tile cap: exercises the near-equal tile
    # split, a >=2-step "parallel" grid (dual-TC path) and pad-then-slice.
    x_big = jax.random.normal(kx, (37, STATE_NUM), jnp.float32)
    out_big = jax.block_until_ready(net_forward(x_big, params, tm_max=16))
    assert out_big.shape == (37, 2), out_big.shape
    assert jnp.allclose(out_big, reference_forward_bf16(x_big, params),
                        atol=1e-2, rtol=1e-2)

    print("KERNEL_OK")
</pallas_src>

<mosaic_0001>
module attributes {stable_mosaic.version = 11 : i64} {
  func.func @net_kernel(%arg0: i32, %arg1: memref<16x2xbf16, #tpu.memory_space<vmem>>, %arg2: memref<2x16xbf16, #tpu.memory_space<vmem>>, %arg3: memref<1x16xf32, #tpu.memory_space<vmem>>, %arg4: memref<16x64xbf16, #tpu.memory_space<vmem>>, %arg5: memref<1x64xf32, #tpu.memory_space<vmem>>, %arg6: memref<64x256xbf16, #tpu.memory_space<vmem>>, %arg7: memref<1x256xf32, #tpu.memory_space<vmem>>, %arg8: memref<256x1024xbf16, #tpu.memory_space<vmem>>, %arg9: memref<1x1024xf32, #tpu.memory_space<vmem>>, %arg10: memref<1024x128xbf16, #tpu.memory_space<vmem>>, %arg11: memref<1x128xf32, #tpu.memory_space<vmem>>, %arg12: memref<16x128xbf16, #tpu.memory_space<vmem>>) attributes {dimension_semantics = [#tpu.dimension_semantics<parallel>], iteration_bounds = array<i64: 1>, scalar_prefetch = 0 : i64, scratch_operands = 0 : i64, tpu.core_type = #tpu.core_type<tc>, window_params = [{transform_indices = @transform_0, window_bounds = array<i64: 16, 2>}, {pipeline_mode = #tpu.pipeline_mode<synchronous>, transform_indices = @transform_1, window_bounds = array<i64: 2, 16>}, {pipeline_mode = #tpu.pipeline_mode<synchronous>, transform_indices = @transform_2, window_bounds = array<i64: 1, 16>}, {pipeline_mode = #tpu.pipeline_mode<synchronous>, transform_indices = @transform_3, window_bounds = array<i64: 16, 64>}, {pipeline_mode = #tpu.pipeline_mode<synchronous>, transform_indices = @transform_4, window_bounds = array<i64: 1, 64>}, {pipeline_mode = #tpu.pipeline_mode<synchronous>, transform_indices = @transform_5, window_bounds = array<i64: 64, 256>}, {pipeline_mode = #tpu.pipeline_mode<synchronous>, transform_indices = @transform_6, window_bounds = array<i64: 1, 256>}, {pipeline_mode = #tpu.pipeline_mode<synchronous>, transform_indices = @transform_7, window_bounds = array<i64: 256, 1024>}, {pipeline_mode = #tpu.pipeline_mode<synchronous>, transform_indices = @transform_8, window_bounds = array<i64: 1, 1024>}, {pipeline_mode = #tpu.pipeline_mode<synchronous>, transform_indices = @transform_9, window_bounds = array<i64: 1024, 128>}, {pipeline_mode = #tpu.pipeline_mode<synchronous>, transform_indices = @transform_10, window_bounds = array<i64: 1, 128>}, {transform_indices = @transform_11, window_bounds = array<i64: 16, 128>}]} {
    %c0 = arith.constant 0 : index
    %c0_0 = arith.constant 0 : index
    %0 = vector.load %arg1[%c0, %c0_0] : memref<16x2xbf16, #tpu.memory_space<vmem>>, vector<16x2xbf16>
    %c0_1 = arith.constant 0 : index
    %c0_2 = arith.constant 0 : index
    %1 = vector.load %arg2[%c0_1, %c0_2] : memref<2x16xbf16, #tpu.memory_space<vmem>>, vector<2x16xbf16>
    %cst = arith.constant dense<0.000000e+00> : vector<16x16xf32>
    %2 = tpu.matmul %0, %1, %cst {dimension_numbers = #tpu.dot_dimension_numbers<[1], [0], [0], [1], [0, 0, 1, 1], [], []>} : vector<16x2xbf16>, vector<2x16xbf16>, vector<16x16xf32> -> vector<16x16xf32>
    %c0_3 = arith.constant 0 : index
    %c0_4 = arith.constant 0 : index
    %3 = vector.load %arg3[%c0_3, %c0_4] : memref<1x16xf32, #tpu.memory_space<vmem>>, vector<1x16xf32>
    %4 = vector.broadcast %3 : vector<1x16xf32> to vector<16x16xf32>
    %5 = arith.addf %2, %4 : vector<16x16xf32>
    %cst_5 = arith.constant 0.000000e+00 : f32
    %6 = vector.broadcast %cst_5 : f32 to vector<16x16xf32>
    %7 = arith.cmpf ogt, %5, %6 : vector<16x16xf32>
    %cst_6 = arith.constant 0.00999999977 : f32
    %8 = vector.broadcast %cst_6 : f32 to vector<16x16xf32>
    %9 = arith.mulf %8, %5 : vector<16x16xf32>
    %10 = arith.select %7, %5, %9 : vector<16x16xi1>, vector<16x16xf32>
    %11 = arith.truncf %10 : vector<16x16xf32> to vector<16x16xbf16>
    %c0_7 = arith.constant 0 : index
    %c0_8 = arith.constant 0 : index
    %12 = vector.load %arg4[%c0_7, %c0_8] : memref<16x64xbf16, #tpu.memory_space<vmem>>, vector<16x64xbf16>
    %cst_9 = arith.constant dense<0.000000e+00> : vector<16x64xf32>
    %13 = tpu.matmul %11, %12, %cst_9 {dimension_numbers = #tpu.dot_dimension_numbers<[1], [0], [0], [1], [0, 0, 1, 1], [], []>} : vector<16x16xbf16>, vector<16x64xbf16>, vector<16x64xf32> -> vector<16x64xf32>
    %c0_10 = arith.constant 0 : index
    %c0_11 = arith.constant 0 : index
    %14 = vector.load %arg5[%c0_10, %c0_11] : memref<1x64xf32, #tpu.memory_space<vmem>>, vector<1x64xf32>
    %15 = vector.broadcast %14 : vector<1x64xf32> to vector<16x64xf32>
    %16 = arith.addf %13, %15 : vector<16x64xf32>
    %cst_12 = arith.constant 0.000000e+00 : f32
    %17 = vector.broadcast %cst_12 : f32 to vector<16x64xf32>
    %18 = arith.cmpf ogt, %16, %17 : vector<16x64xf32>
    %cst_13 = arith.constant 0.00999999977 : f32
    %19 = vector.broadcast %cst_13 : f32 to vector<16x64xf32>
    %20 = arith.mulf %19, %16 : vector<16x64xf32>
    %21 = arith.select %18, %16, %20 : vector<16x64xi1>, vector<16x64xf32>
    %22 = arith.truncf %21 : vector<16x64xf32> to vector<16x64xbf16>
    %c0_14 = arith.constant 0 : index
    %c0_15 = arith.constant 0 : index
    %23 = vector.load %arg6[%c0_14, %c0_15] : memref<64x256xbf16, #tpu.memory_space<vmem>>, vector<64x256xbf16>
    %cst_16 = arith.constant dense<0.000000e+00> : vector<16x256xf32>
    %24 = tpu.matmul %22, %23, %cst_16 {dimension_numbers = #tpu.dot_dimension_numbers<[1], [0], [0], [1], [0, 0, 1, 1], [], []>} : vector<16x64xbf16>, vector<64x256xbf16>, vector<16x256xf32> -> vector<16x256xf32>
    %c0_17 = arith.constant 0 : index
    %c0_18 = arith.constant 0 : index
    %25 = vector.load %arg7[%c0_17, %c0_18] : memref<1x256xf32, #tpu.memory_space<vmem>>, vector<1x256xf32>
    %26 = vector.broadcast %25 : vector<1x256xf32> to vector<16x256xf32>
    %27 = arith.addf %24, %26 : vector<16x256xf32>
    %cst_19 = arith.constant 0.000000e+00 : f32
    %28 = vector.broadcast %cst_19 : f32 to vector<16x256xf32>
    %29 = arith.cmpf ogt, %27, %28 : vector<16x256xf32>
    %cst_20 = arith.constant 0.00999999977 : f32
    %30 = vector.broadcast %cst_20 : f32 to vector<16x256xf32>
    %31 = arith.mulf %30, %27 : vector<16x256xf32>
    %32 = arith.select %29, %27, %31 : vector<16x256xi1>, vector<16x256xf32>
    %33 = arith.truncf %32 : vector<16x256xf32> to vector<16x256xbf16>
    %c0_21 = arith.constant 0 : index
    %c0_22 = arith.constant 0 : index
    %34 = vector.load %arg8[%c0_21, %c0_22] : memref<256x1024xbf16, #tpu.memory_space<vmem>>, vector<256x1024xbf16>
    %cst_23 = arith.constant dense<0.000000e+00> : vector<16x1024xf32>
    %35 = tpu.matmul %33, %34, %cst_23 {dimension_numbers = #tpu.dot_dimension_numbers<[1], [0], [0], [1], [0, 0, 1, 1], [], []>} : vector<16x256xbf16>, vector<256x1024xbf16>, vector<16x1024xf32> -> vector<16x1024xf32>
    %c0_24 = arith.constant 0 : index
    %c0_25 = arith.constant 0 : index
    %36 = vector.load %arg9[%c0_24, %c0_25] : memref<1x1024xf32, #tpu.memory_space<vmem>>, vector<1x1024xf32>
    %37 = vector.broadcast %36 : vector<1x1024xf32> to vector<16x1024xf32>
    %38 = arith.addf %35, %37 : vector<16x1024xf32>
    %cst_26 = arith.constant 0.000000e+00 : f32
    %39 = vector.broadcast %cst_26 : f32 to vector<16x1024xf32>
    %40 = arith.cmpf ogt, %38, %39 : vector<16x1024xf32>
    %cst_27 = arith.constant 0.00999999977 : f32
    %41 = vector.broadcast %cst_27 : f32 to vector<16x1024xf32>
    %42 = arith.mulf %41, %38 : vector<16x1024xf32>
    %43 = arith.select %40, %38, %42 : vector<16x1024xi1>, vector<16x1024xf32>
    %44 = arith.truncf %43 : vector<16x1024xf32> to vector<16x1024xbf16>
    %c0_28 = arith.constant 0 : index
    %c0_29 = arith.constant 0 : index
    %45 = vector.load %arg10[%c0_28, %c0_29] : memref<1024x128xbf16, #tpu.memory_space<vmem>>, vector<1024x128xbf16>
    %cst_30 = arith.constant dense<0.000000e+00> : vector<16x128xf32>
    %46 = tpu.matmul %44, %45, %cst_30 {dimension_numbers = #tpu.dot_dimension_numbers<[1], [0], [0], [1], [0, 0, 1, 1], [], []>} : vector<16x1024xbf16>, vector<1024x128xbf16>, vector<16x128xf32> -> vector<16x128xf32>
    %c0_31 = arith.constant 0 : index
    %c0_32 = arith.constant 0 : index
    %47 = vector.load %arg11[%c0_31, %c0_32] : memref<1x128xf32, #tpu.memory_space<vmem>>, vector<1x128xf32>
    %48 = vector.broadcast %47 : vector<1x128xf32> to vector<16x128xf32>
    %49 = arith.addf %46, %48 : vector<16x128xf32>
    %cst_33 = arith.constant 0.000000e+00 : f32
    %50 = vector.broadcast %cst_33 : f32 to vector<16x128xf32>
    %51 = arith.cmpf ogt, %49, %50 : vector<16x128xf32>
    %cst_34 = arith.constant 0.00999999977 : f32
    %52 = vector.broadcast %cst_34 : f32 to vector<16x128xf32>
    %53 = arith.mulf %52, %49 : vector<16x128xf32>
    %54 = arith.select %51, %49, %53 : vector<16x128xi1>, vector<16x128xf32>
    %55 = arith.truncf %54 : vector<16x128xf32> to vector<16x128xbf16>
    %c0_35 = arith.constant 0 : index
    %c0_36 = arith.constant 0 : index
    %56 = vector.load %arg12[%c0_35, %c0_36] : memref<16x128xbf16, #tpu.memory_space<vmem>>, vector<16x128xbf16>
    tpu.vector_store %arg12[%c0_35, %c0_36], %55 {strides = array<i32>} : memref<16x128xbf16, #tpu.memory_space<vmem>>, vector<16x128xbf16>,
    return
  }
  func.func @transform_0(%arg0: i32) -> (i32, i32) {
    %c0_i32 = arith.constant 0 : i32
    %c0_i32_0 = arith.constant 0 : i32
    return %arg0, %c0_i32 : i32, i32
  }
  func.func @transform_1(%arg0: i32) -> (i32, i32) {
    %c0_i32 = arith.constant 0 : i32
    %c0_i32_0 = arith.constant 0 : i32
    %c0_i32_1 = arith.constant 0 : i32
    return %c0_i32, %c0_i32_0 : i32, i32
  }
  func.func @transform_2(%arg0: i32) -> (i32, i32) {
    %c0_i32 = arith.constant 0 : i32
    %c0_i32_0 = arith.constant 0 : i32
    %c0_i32_1 = arith.constant 0 : i32
    return %c0_i32, %c0_i32_0 : i32, i32
  }
  func.func @transform_3(%arg0: i32) -> (i32, i32) {
    %c0_i32 = arith.constant 0 : i32
    %c0_i32_0 = arith.constant 0 : i32
    %c0_i32_1 = arith.constant 0 : i32
    return %c0_i32, %c0_i32_0 : i32, i32
  }
  func.func @transform_4(%arg0: i32) -> (i32, i32) {
    %c0_i32 = arith.constant 0 : i32
    %c0_i32_0 = arith.constant 0 : i32
    %c0_i32_1 = arith.constant 0 : i32
    return %c0_i32, %c0_i32_0 : i32, i32
  }
  func.func @transform_5(%arg0: i32) -> (i32, i32) {
    %c0_i32 = arith.constant 0 : i32
    %c0_i32_0 = arith.constant 0 : i32
    %c0_i32_1 = arith.constant 0 : i32
    return %c0_i32, %c0_i32_0 : i32, i32
  }
  func.func @transform_6(%arg0: i32) -> (i32, i32) {
    %c0_i32 = arith.constant 0 : i32
    %c0_i32_0 = arith.constant 0 : i32
    %c0_i32_1 = arith.constant 0 : i32
    return %c0_i32, %c0_i32_0 : i32, i32
  }
  func.func @transform_7(%arg0: i32) -> (i32, i32) {
    %c0_i32 = arith.constant 0 : i32
    %c0_i32_0 = arith.constant 0 : i32
    %c0_i32_1 = arith.constant 0 : i32
    return %c0_i32, %c0_i32_0 : i32, i32
  }
  func.func @transform_8(%arg0: i32) -> (i32, i32) {
    %c0_i32 = arith.constant 0 : i32
    %c0_i32_0 = arith.constant 0 : i32
    %c0_i32_1 = arith.constant 0 : i32
    return %c0_i32, %c0_i32_0 : i32, i32
  }
  func.func @transform_9(%arg0: i32) -> (i32, i32) {
    %c0_i32 = arith.constant 0 : i32
    %c0_i32_0 = arith.constant 0 : i32
    %c0_i32_1 = arith.constant 0 : i32
    return %c0_i32, %c0_i32_0 : i32, i32
  }
  func.func @transform_10(%arg0: i32) -> (i32, i32) {
    %c0_i32 = arith.constant 0 : i32
    %c0_i32_0 = arith.constant 0 : i32
    %c0_i32_1 = arith.constant 0 : i32
    return %c0_i32, %c0_i32_0 : i32, i32
  }
  func.func @transform_11(%arg0: i32) -> (i32, i32) {
    %c0_i32 = arith.constant 0 : i32
    %c0_i32_0 = arith.constant 0 : i32
    return %arg0, %c0_i32 : i32, i32
  }
}

module attributes {stable_mosaic.version = 11 : i64} {
  func.func @net_kernel(%arg0: i32, %arg1: memref<16x2xbf16, #tpu.memory_space<vmem>>, %arg2: memref<2x16xbf16, #tpu.memory_space<vmem>>, %arg3: memref<1x16xf32, #tpu.memory_space<vmem>>, %arg4: memref<16x64xbf16, #tpu.memory_space<vmem>>, %arg5: memref<1x64xf32, #tpu.memory_space<vmem>>, %arg6: memref<64x256xbf16, #tpu.memory_space<vmem>>, %arg7: memref<1x256xf32, #tpu.memory_space<vmem>>, %arg8: memref<256x1024xbf16, #tpu.memory_space<vmem>>, %arg9: memref<1x1024xf32, #tpu.memory_space<vmem>>, %arg10: memref<1024x128xbf16, #tpu.memory_space<vmem>>, %arg11: memref<1x128xf32, #tpu.memory_space<vmem>>, %arg12: memref<16x128xbf16, #tpu.memory_space<vmem>>) attributes {dimension_semantics = [#tpu.dimension_semantics<parallel>], iteration_bounds = array<i64: 1>, scalar_prefetch = 0 : i64, scratch_operands = 0 : i64, tpu.core_type = #tpu.core_type<tc>, window_params = [{transform_indices = @transform_0, window_bounds = array<i64: 16, 2>}, {pipeline_mode = #tpu.pipeline_mode<synchronous>, transform_indices = @transform_1, window_bounds = array<i64: 2, 16>}, {pipeline_mode = #tpu.pipeline_mode<synchronous>, transform_indices = @transform_2, window_bounds = array<i64: 1, 16>}, {pipeline_mode = #tpu.pipeline_mode<synchronous>, transform_indices = @transform_3, window_bounds = array<i64: 16, 64>}, {pipeline_mode = #tpu.pipeline_mode<synchronous>, transform_indices = @transform_4, window_bounds = array<i64: 1, 64>}, {pipeline_mode = #tpu.pipeline_mode<synchronous>, transform_indices = @transform_5, window_bounds = array<i64: 64, 256>}, {pipeline_mode = #tpu.pipeline_mode<synchronous>, transform_indices = @transform_6, window_bounds = array<i64: 1, 256>}, {pipeline_mode = #tpu.pipeline_mode<synchronous>, transform_indices = @transform_7, window_bounds = array<i64: 256, 1024>}, {pipeline_mode = #tpu.pipeline_mode<synchronous>, transform_indices = @transform_8, window_bounds = array<i64: 1, 1024>}, {pipeline_mode = #tpu.pipeline_mode<synchronous>, transform_indices = @transform_9, window_bounds = array<i64: 1024, 128>}, {pipeline_mode = #tpu.pipeline_mode<synchronous>, transform_indices = @transform_10, window_bounds = array<i64: 1, 128>}, {transform_indices = @transform_11, window_bounds = array<i64: 16, 128>}]} {
    %c0 = arith.constant 0 : index
    %c0_0 = arith.constant 0 : index
    %0 = vector.load %arg1[%c0, %c0_0] : memref<16x2xbf16, #tpu.memory_space<vmem>>, vector<16x2xbf16>
    %c0_1 = arith.constant 0 : index
    %c0_2 = arith.constant 0 : index
    %1 = vector.load %arg2[%c0_1, %c0_2] : memref<2x16xbf16, #tpu.memory_space<vmem>>, vector<2x16xbf16>
    %cst = arith.constant dense<0.000000e+00> : vector<16x16xf32>
    %2 = tpu.matmul %0, %1, %cst {dimension_numbers = #tpu.dot_dimension_numbers<[1], [0], [0], [1], [0, 0, 1, 1], [], []>} : vector<16x2xbf16>, vector<2x16xbf16>, vector<16x16xf32> -> vector<16x16xf32>
    %c0_3 = arith.constant 0 : index
    %c0_4 = arith.constant 0 : index
    %3 = vector.load %arg3[%c0_3, %c0_4] : memref<1x16xf32, #tpu.memory_space<vmem>>, vector<1x16xf32>
    %4 = vector.broadcast %3 : vector<1x16xf32> to vector<16x16xf32>
    %5 = arith.addf %2, %4 : vector<16x16xf32>
    %cst_5 = arith.constant 0.000000e+00 : f32
    %6 = vector.broadcast %cst_5 : f32 to vector<16x16xf32>
    %7 = arith.cmpf ogt, %5, %6 : vector<16x16xf32>
    %cst_6 = arith.constant 0.00999999977 : f32
    %8 = vector.broadcast %cst_6 : f32 to vector<16x16xf32>
    %9 = arith.mulf %8, %5 : vector<16x16xf32>
    %10 = arith.select %7, %5, %9 : vector<16x16xi1>, vector<16x16xf32>
    %11 = arith.truncf %10 : vector<16x16xf32> to vector<16x16xbf16>
    %c0_7 = arith.constant 0 : index
    %c0_8 = arith.constant 0 : index
    %12 = vector.load %arg4[%c0_7, %c0_8] : memref<16x64xbf16, #tpu.memory_space<vmem>>, vector<16x64xbf16>
    %cst_9 = arith.constant dense<0.000000e+00> : vector<16x64xf32>
    %13 = tpu.matmul %11, %12, %cst_9 {dimension_numbers = #tpu.dot_dimension_numbers<[1], [0], [0], [1], [0, 0, 1, 1], [], []>} : vector<16x16xbf16>, vector<16x64xbf16>, vector<16x64xf32> -> vector<16x64xf32>
    %c0_10 = arith.constant 0 : index
    %c0_11 = arith.constant 0 : index
    %14 = vector.load %arg5[%c0_10, %c0_11] : memref<1x64xf32, #tpu.memory_space<vmem>>, vector<1x64xf32>
    %15 = vector.broadcast %14 : vector<1x64xf32> to vector<16x64xf32>
    %16 = arith.addf %13, %15 : vector<16x64xf32>
    %cst_12 = arith.constant 0.000000e+00 : f32
    %17 = vector.broadcast %cst_12 : f32 to vector<16x64xf32>
    %18 = arith.cmpf ogt, %16, %17 : vector<16x64xf32>
    %cst_13 = arith.constant 0.00999999977 : f32
    %19 = vector.broadcast %cst_13 : f32 to vector<16x64xf32>
    %20 = arith.mulf %19, %16 : vector<16x64xf32>
    %21 = arith.select %18, %16, %20 : vector<16x64xi1>, vector<16x64xf32>
    %22 = arith.truncf %21 : vector<16x64xf32> to vector<16x64xbf16>
    %c0_14 = arith.constant 0 : index
    %c0_15 = arith.constant 0 : index
    %23 = vector.load %arg6[%c0_14, %c0_15] : memref<64x256xbf16, #tpu.memory_space<vmem>>, vector<64x256xbf16>
    %cst_16 = arith.constant dense<0.000000e+00> : vector<16x256xf32>
    %24 = tpu.matmul %22, %23, %cst_16 {dimension_numbers = #tpu.dot_dimension_numbers<[1], [0], [0], [1], [0, 0, 1, 1], [], []>} : vector<16x64xbf16>, vector<64x256xbf16>, vector<16x256xf32> -> vector<16x256xf32>
    %c0_17 = arith.constant 0 : index
    %c0_18 = arith.constant 0 : index
    %25 = vector.load %arg7[%c0_17, %c0_18] : memref<1x256xf32, #tpu.memory_space<vmem>>, vector<1x256xf32>
    %26 = vector.broadcast %25 : vector<1x256xf32> to vector<16x256xf32>
    %27 = arith.addf %24, %26 : vector<16x256xf32>
    %cst_19 = arith.constant 0.000000e+00 : f32
    %28 = vector.broadcast %cst_19 : f32 to vector<16x256xf32>
    %29 = arith.cmpf ogt, %27, %28 : vector<16x256xf32>
    %cst_20 = arith.constant 0.00999999977 : f32
    %30 = vector.broadcast %cst_20 : f32 to vector<16x256xf32>
    %31 = arith.mulf %30, %27 : vector<16x256xf32>
    %32 = arith.select %29, %27, %31 : vector<16x256xi1>, vector<16x256xf32>
    %33 = arith.truncf %32 : vector<16x256xf32> to vector<16x256xbf16>
    %c0_21 = arith.constant 0 : index
    %c0_22 = arith.constant 0 : index
    %34 = vector.load %arg8[%c0_21, %c0_22] : memref<256x1024xbf16, #tpu.memory_space<vmem>>, vector<256x1024xbf16>
    %cst_23 = arith.constant dense<0.000000e+00> : vector<16x1024xf32>
    %35 = tpu.matmul %33, %34, %cst_23 {dimension_numbers = #tpu.dot_dimension_numbers<[1], [0], [0], [1], [0, 0, 1, 1], [], []>} : vector<16x256xbf16>, vector<256x1024xbf16>, vector<16x1024xf32> -> vector<16x1024xf32>
    %c0_24 = arith.constant 0 : index
    %c0_25 = arith.constant 0 : index
    %36 = vector.load %arg9[%c0_24, %c0_25] : memref<1x1024xf32, #tpu.memory_space<vmem>>, vector<1x1024xf32>
    %37 = vector.broadcast %36 : vector<1x1024xf32> to vector<16x1024xf32>
    %38 = arith.addf %35, %37 : vector<16x1024xf32>
    %cst_26 = arith.constant 0.000000e+00 : f32
    %39 = vector.broadcast %cst_26 : f32 to vector<16x1024xf32>
    %40 = arith.cmpf ogt, %38, %39 : vector<16x1024xf32>
    %cst_27 = arith.constant 0.00999999977 : f32
    %41 = vector.broadcast %cst_27 : f32 to vector<16x1024xf32>
    %42 = arith.mulf %41, %38 : vector<16x1024xf32>
    %43 = arith.select %40, %38, %42 : vector<16x1024xi1>, vector<16x1024xf32>
    %44 = arith.truncf %43 : vector<16x1024xf32> to vector<16x1024xbf16>
    %c0_28 = arith.constant 0 : index
    %c0_29 = arith.constant 0 : index
    %45 = vector.load %arg10[%c0_28, %c0_29] : memref<1024x128xbf16, #tpu.memory_space<vmem>>, vector<1024x128xbf16>
    %cst_30 = arith.constant dense<0.000000e+00> : vector<16x128xf32>
    %46 = tpu.matmul %44, %45, %cst_30 {dimension_numbers = #tpu.dot_dimension_numbers<[1], [0], [0], [1], [0, 0, 1, 1], [], []>} : vector<16x1024xbf16>, vector<1024x128xbf16>, vector<16x128xf32> -> vector<16x128xf32>
    %c0_31 = arith.constant 0 : index
    %c0_32 = arith.constant 0 : index
    %47 = vector.load %arg11[%c0_31, %c0_32] : memref<1x128xf32, #tpu.memory_space<vmem>>, vector<1x128xf32>
    %48 = vector.broadcast %47 : vector<1x128xf32> to vector<16x128xf32>
    %49 = arith.addf %46, %48 : vector<16x128xf32>
    %cst_33 = arith.constant 0.000000e+00 : f32
    %50 = vector.broadcast %cst_33 : f32 to vector<16x128xf32>
    %51 = arith.cmpf ogt, %49, %50 : vector<16x128xf32>
    %cst_34 = arith.constant 0.00999999977 : f32
    %52 = vector.broadcast %cst_34 : f32 to vector<16x128xf32>
    %53 = arith.mulf %52, %49 : vector<16x128xf32>
    %54 = arith.select %51, %49, %53 : vector<16x128xi1>, vector<16x128xf32>
    %55 = arith.truncf %54 : vector<16x128xf32> to vector<16x128xbf16>
    %c0_35 = arith.constant 0 : index
    %c0_36 = arith.constant 0 : index
    %56 = vector.load %arg12[%c0_35, %c0_36] : memref<16x128xbf16, #tpu.memory_space<vmem>>, vector<16x128xbf16>
    tpu.vector_store %arg12[%c0_35, %c0_36], %55 {strides = array<i32>} : memref<16x128xbf16, #tpu.memory_space<vmem>>, vector<16x128xbf16>,
    return
  }
  func.func @transform_0(%arg0: i32) -> (i32, i32) {
    %c0_i32 = arith.constant 0 : i32
    %c0_i32_0 = arith.constant 0 : i32
    return %arg0, %c0_i32 : i32, i32
  }
  func.func @transform_1(%arg0: i32) -> (i32, i32) {
    %c0_i32 = arith.constant 0 : i32
    %c0_i32_0 = arith.constant 0 : i32
    %c0_i32_1 = arith.constant 0 : i32
    return %c0_i32, %c0_i32_0 : i32, i32
  }
  func.func @transform_2(%arg0: i32) -> (i32, i32) {
    %c0_i32 = arith.constant 0 : i32
    %c0_i32_0 = arith.constant 0 : i32
    %c0_i32_1 = arith.constant 0 : i32
    return %c0_i32, %c0_i32_0 : i32, i32
  }
  func.func @transform_3(%arg0: i32) -> (i32, i32) {
    %c0_i32 = arith.constant 0 : i32
    %c0_i32_0 = arith.constant 0 : i32
    %c0_i32_1 = arith.constant 0 : i32
    return %c0_i32, %c0_i32_0 : i32, i32
  }
  func.func @transform_4(%arg0: i32) -> (i32, i32) {
    %c0_i32 = arith.constant 0 : i32
    %c0_i32_0 = arith.constant 0 : i32
    %c0_i32_1 = arith.constant 0 : i32
    return %c0_i32, %c0_i32_0 : i32, i32
  }
  func.func @transform_5(%arg0: i32) -> (i32, i32) {
    %c0_i32 = arith.constant 0 : i32
    %c0_i32_0 = arith.constant 0 : i32
    %c0_i32_1 = arith.constant 0 : i32
    return %c0_i32, %c0_i32_0 : i32, i32
  }
  func.func @transform_6(%arg0: i32) -> (i32, i32) {
    %c0_i32 = arith.constant 0 : i32
    %c0_i32_0 = arith.constant 0 : i32
    %c0_i32_1 = arith.constant 0 : i32
    return %c0_i32, %c0_i32_0 : i32, i32
  }
  func.func @transform_7(%arg0: i32) -> (i32, i32) {
    %c0_i32 = arith.constant 0 : i32
    %c0_i32_0 = arith.constant 0 : i32
    %c0_i32_1 = arith.constant 0 : i32
    return %c0_i32, %c0_i32_0 : i32, i32
  }
  func.func @transform_8(%arg0: i32) -> (i32, i32) {
    %c0_i32 = arith.constant 0 : i32
    %c0_i32_0 = arith.constant 0 : i32
    %c0_i32_1 = arith.constant 0 : i32
    return %c0_i32, %c0_i32_0 : i32, i32
  }
  func.func @transform_9(%arg0: i32) -> (i32, i32) {
    %c0_i32 = arith.constant 0 : i32
    %c0_i32_0 = arith.constant 0 : i32
    %c0_i32_1 = arith.constant 0 : i32
    return %c0_i32, %c0_i32_0 : i32, i32
  }
  func.func @transform_10(%arg0: i32) -> (i32, i32) {
    %c0_i32 = arith.constant 0 : i32
    %c0_i32_0 = arith.constant 0 : i32
    %c0_i32_1 = arith.constant 0 : i32
    return %c0_i32, %c0_i32_0 : i32, i32
  }
  func.func @transform_11(%arg0: i32) -> (i32, i32) {
    %c0_i32 = arith.constant 0 : i32
    %c0_i32_0 = arith.constant 0 : i32
    return %arg0, %c0_i32 : i32, i32
  }
}

</mosaic_0001>

<bundles_post_ra>
// kernel: tpu_custom_call.1
= control target key start
LH: loop header
LB: loop body
LE: loop exit
PB: predicated region body
PF: predicated region fallthrough
CT: control target
= control target key end

     0   :  { %16 = vsyncpa [#allocation3], 0  ;;  %s3432_s0 = inlined_call_operand.vmem [shape: bf16[16,2], index: 0, kind: input, shape index: {}]   ;;  %s3433_s1 = inlined_call_operand.hbm [shape: bf16[2,16], index: 1, kind: input, shape index: {}]   ;;  %s3434_s2 = inlined_call_operand.hbm [shape: f32[1,16], index: 2, kind: input, shape index: {}]   ;;  %s3435_s3 = inlined_call_operand.vmem [shape: bf16[16,64], index: 3, kind: input, shape index: {}]   ;;  %s3436_s4 = inlined_call_operand.hbm [shape: f32[1,64], index: 4, kind: input, shape index: {}]   ;;  %s3437_s5 = inlined_call_operand.hbm [shape: bf16[64,256], index: 5, kind: input, shape index: {}]   ;;  %s3438_s6 = inlined_call_operand.hbm [shape: f32[1,256], index: 6, kind: input, shape index: {}]   ;;  %s3439_s7 = inlined_call_operand.hbm [shape: bf16[256,1024], index: 7, kind: input, shape index: {}]   ;;  %s3440_s8 = inlined_call_operand.vmem [shape: f32[1,1024], index: 8, kind: input, shape index: {}]   ;;  %s3441_s9 = inlined_call_operand.hbm [shape: bf16[1024,128], index: 9, kind: input, shape index: {}]   ;;  %s3442_s10 = inlined_call_operand.vmem [shape: f32[1,128], index: 10, kind: input, shape index: {}]   ;;  %s3443_s11 = inlined_call_operand.hbm [shape: bf16[16,128], index: 11, kind: output, shape index: {}]  }
   0x1   :  { %17 = vsyncpa [#allocation6], 0 }
   0x2   :  { %18 = vsyncpa [#allocation9], 0 }
   0x3   :  { %19 = vsyncpa [#allocation12], 0  ;;  %s39_s19 = sshll.u32 %s3434_s2, 4  ;;  %s40_s19 = int_to_ptr.hbm [resolvable:$true] %s39_s19 }
   0x4   :  { %20 = vsyncpa [#allocation4], 0  ;;  %s3283_s20 = smov [#allocation5]   ;;  %s62_s24 = sshll.u32 %s3437_s5, 4  ;;  %s63_s24 = int_to_ptr.hbm [resolvable:$true] %s62_s24 }
   0x5   :  { %s41_s21 = sshll.u32 %s3283_s20, 4  ;;  %s3284_s25 = smov [#allocation8]   ;;  %s42_s21 = int_to_ptr.vmem [resolvable:$true] %s41_s21 }
   0x6   :  { %44 = dma.hbm_to_vmem [thread:$0]  %s40_s19, 16, %s42_s21, [#allocation6]  }
   0x7   :  { %s64_s26 = sshll.u32 %s3284_s25, 4  ;;  %s3285_s27 = smov 128   ;;  %s65_s26 = int_to_ptr.vmem [resolvable:$true] %s64_s26 }
   0x8   :  { %s3286_s28 = smov 8   ;;  %s86_s2 = sshll.u32 %s3439_s7, 4  ;;  %s87_s2 = int_to_ptr.hbm [resolvable:$true] %s86_s2 }
   0x9   :  { %70 = dma.hbm_to_vmem [thread:$0]  %s63_s24, 1024, %s65_s26, [#allocation9], %s3285_s27, %s3285_s27, %s3286_s28  }
   0xa   :  { %s3287_s12 = smov [#allocation11]   ;;  %s28_s5 = sshll.u32 %s3433_s1, 4  ;;  %s29_s5 = int_to_ptr.hbm [resolvable:$true] %s28_s5 }
   0xb   :  { %s88_s13 = sshll.u32 %s3287_s12, 4  ;;  %s3288_s16 = smov 512   ;;  %s89_s13 = int_to_ptr.vmem [resolvable:$true] %s88_s13 }
   0xc   :  { %s3289_s17 = smov 32   ;;  %s3290_s18 = smov [#allocation2]  }
   0xd   :  { %94 = dma.hbm_to_vmem [thread:$0]  %s87_s2, 16384, %s89_s13, [#allocation12], %s3288_s16, %s3288_s16, %s3289_s17  }
   0xe   :  { %s30_s19 = sshll.u32 %s3290_s18, 4  ;;  %s52_s22 = sshll.u32 %s3436_s4, 4  ;;  %s31_s19 = int_to_ptr.vmem [resolvable:$true] %s30_s19  ;;  %s53_s22 = int_to_ptr.hbm [resolvable:$true] %s52_s22 }
   0xf   :  { %33 = dma.hbm_to_vmem [thread:$0]  %s29_s5, 16, %s31_s19, [#allocation3]  }
  0x10   :  { %s76_s24 = sshll.u32 %s3438_s6, 4  ;;  %s3291_s25 = smov [#allocation7]   ;;  %s77_s24 = int_to_ptr.hbm [resolvable:$true] %s76_s24 }
  0x11   :  { %s54_s26 = sshll.u32 %s3291_s25, 4  ;;  %s3292_s1 = smov [#allocation10]   ;;  %s55_s26 = int_to_ptr.vmem [resolvable:$true] %s54_s26 }
  0x12   :  { %57 = dma.hbm_to_vmem [thread:$0]  %s53_s22, 16, %s55_s26, [#allocation6]  }
  0x13   :  { %s78_s27 = sshll.u32 %s3292_s1, 4  ;;  %s101_s30 = sshll.u32 %s3441_s9, 4  ;;  %s79_s27 = int_to_ptr.vmem [resolvable:$true] %s78_s27  ;;  %s102_s30 = int_to_ptr.hbm [resolvable:$true] %s101_s30 }
  0x14   :  { %81 = dma.hbm_to_vmem [thread:$0]  %s77_s24, 32, %s79_s27, [#allocation9]  }
  0x15   :  { %s3293_s4 = smov [#allocation13]   ;;  %s3294_s12 = smov 64  }
  0x16   :  { %s103_s2 = sshll.u32 %s3293_s4, 4  ;;  %s3295_s13 = smov 4   ;;  %s104_s2 = int_to_ptr.vmem [resolvable:$true] %s103_s2 }
  0x17   :  { %109 = dma.hbm_to_vmem [thread:$0]  %s102_s30, 8192, %s104_s2, [#allocation12], %s3294_s12, %s3294_s12, %s3295_s13  }
  0x18   :  { %3273 = dma.done.wait [#allocation3], 16  }
  0x19   :  { %3274 = vsyncadd [#allocation3], 4294967280 }
  0x1a   :  { %3275 = dma.done.wait [#allocation6], 32  }
  0x1b   :  { %3276 = vsyncadd [#allocation6], 4294967264 }
  0x1c   :  { %3277 = dma.done.wait [#allocation9], 1056  }
  0x1d   :  { %3278 = vsyncadd [#allocation9], 4294966240 }
  0x1e   :  { %3279 = dma.done.wait [#allocation12], 24576  }
  0x1f   :  { %3280 = vsyncadd [#allocation12], 4294942720  ;;  %vm157_vm0 = vcmask 1040384   ;;  %v143_v0 = vld [vmem:[#allocation2] sm:$0x1]  ;;  %v2857_v2 = vld [vmem:[%s3432_s0] sm:$0xff] }
  0x20   :  { %v159_v1 = vsel %vm157_vm0, %v143_v0, 0  ;;  %vm153_vm1 = vcmask 15360   ;;  %v2858_v3 = vld [vmem:[%s3435_s3] sm:$0xff]  ;;  %v3078_v5 = vld [vmem:[#allocation5] ss:$0 sm:$0xff]  ;;  %vm194_vm4 = vcmask 130048  }
  0x21   :  { %168 = vmatpush.bf16.msra.mxu0 %v159_v1  ;;  %205 = vmatpush.bf16.msra.mxu1 %v2858_v3  ;;  %v2081_v14 = vld [vmem:[#allocation8 + $0x30] sm:$0xf]  ;;  %v2866_v15 = vld [vmem:[#allocation8 + $0x34] sm:$0xf0]  ;;  %v2865_v16 = vld [vmem:[#allocation8 + $0x34] sm:$0xf] }
  0x22   :  { %v2082_v17 = vor.u32 %v2866_v15, %v2081_v14  ;;  %v2083_v18 = vld [vmem:[#allocation8 + $0x38] sm:$0xf0]  ;;  %v2073_v20 = vld [vmem:[#allocation8 + $0x20] sm:$0xf]  ;;  %v2864_v21 = vld [vmem:[#allocation8 + $0x24] sm:$0xf0] }
  0x23   :  { %v2086_v19 = vor.u32 %v2865_v16, %v2083_v18  ;;  %v2863_v22 = vld [vmem:[#allocation8 + $0x24] sm:$0xf]  ;;  %v2074_v23 = vor.u32 %v2864_v21, %v2073_v20  ;;  %v2075_v24 = vld [vmem:[#allocation8 + $0x28] sm:$0xf0]  ;;  %v2065_v26 = vld [vmem:[#allocation8 + $0x10] sm:$0xf] }
  0x24   :  { %2049 = vmatmul.msk.bf16.vlgmr.msra.gmra.mxu0 %vm153_vm1, %v2857_v2  ;;  %281 = vmatpush.bf16.msra.mxu2 %v2082_v17  ;;  %v2078_v25 = vor.u32 %v2863_v22, %v2075_v24  ;;  %v2862_v27 = vld [vmem:[#allocation8 + $0x14] sm:$0xf0]  ;;  %v2861_v28 = vld [vmem:[#allocation8 + $0x14] sm:$0xf]  ;;  %v2067_v30 = vld [vmem:[#allocation8 + $0x18] sm:$0xf0] }
  0x25   :  { %295 = vmatpush.bf16.msra.mxu3 %v2086_v19  ;;  %v2066_v29 = vor.u32 %v2862_v27, %v2065_v26  ;;  %v2070_v31 = vor.u32 %v2861_v28, %v2067_v30  ;;  %v2057_v32 = vld [vmem:[#allocation8] sm:$0xf]  ;;  %v2860_v33 = vld [vmem:[#allocation8 + $0x4] sm:$0xf0]  ;;  %v2859_v34 = vld [vmem:[#allocation8 + $0x4] sm:$0xf] }
  0x26   :  { %v2058_v35 = vor.u32 %v2860_v33, %v2057_v32  ;;  %v2059_v36 = vld [vmem:[#allocation8 + $0x8] sm:$0xf0]  ;;  %v2315_v38 = vld [vmem:[#allocation11 + $0x1c0] sm:$0xf]  ;;  %v2923_v43 = vld [vmem:[#allocation11 + $0x1c4] sm:$0xf] }
  0x27   :  { %v2062_v37 = vor.u32 %v2859_v34, %v2059_v36  ;;  %v2927_v39 = vld [vmem:[#allocation11 + $0x1dc] sm:$0xf0]  ;;  %v2317_v44 = vld [vmem:[#allocation11 + $0x1e0] sm:$0xf0]  ;;  %v3079_v30 = vld [vmem:[#allocation7] ss:$0 sm:$0xff] }
  0x28   :  { %282 = vmatpush.bf16.msra.mxu2 %v2074_v23  ;;  %v2571_v40 = vld [vmem:[#allocation11 + $0x3c0] sm:$0xf]  ;;  %v2316_v41 = vor.u32 %v2927_v39, %v2315_v38  ;;  %v2320_v46 = vor.u32 %v2923_v43, %v2317_v44  ;;  %v2987_v47 = vld [vmem:[#allocation11 + $0x3c4] sm:$0xf]  ;;  %vm273_vm7 = vcmask 523264   ;;  %s2029_s19 = sshll.u32 %s3443_s11, 4  ;;  %s2030_s19 = int_to_ptr.hbm [resolvable:$true] %s2029_s19 }
  0x29   :  { %296 = vmatpush.bf16.msra.mxu3 %v2078_v25  ;;  %v2991_v42 = vld [vmem:[#allocation11 + $0x3dc] sm:$0xf0]  ;;  %v2573_v48 = vld [vmem:[#allocation11 + $0x3e0] sm:$0xf0] }
  0x2a   :  { %v2572_v45 = vor.u32 %v2991_v42, %v2571_v40  ;;  %v2283_v49 = vld [vmem:[#allocation11 + $0x180] sm:$0xf]  ;;  %1105 = vmatpush.bf16.msrb.mxu0 %v2316_v41  ;;  %v2576_v50 = vor.u32 %v2987_v47, %v2573_v48  ;;  %v2915_v56 = vld [vmem:[#allocation11 + $0x184] sm:$0xf] }
  0x2b   :  { %v2919_v51 = vld [vmem:[#allocation11 + $0x19c] sm:$0xf0]  ;;  %v2285_v57 = vld [vmem:[#allocation11 + $0x1a0] sm:$0xf0] }
  0x2c   :  { %283 = vmatpush.bf16.msra.mxu2 %v2066_v29  ;;  %v2539_v52 = vld [vmem:[#allocation11 + $0x380] sm:$0xf]  ;;  %1119 = vmatpush.bf16.msrb.mxu1 %v2572_v45  ;;  %v2284_v54 = vor.u32 %v2919_v51, %v2283_v49  ;;  %v2979_v58 = vld [vmem:[#allocation11 + $0x384] sm:$0xf]  ;;  %v2288_v59 = vor.u32 %v2915_v56, %v2285_v57 }
  0x2d   :  { %297 = vmatpush.bf16.msra.mxu3 %v2070_v31  ;;  %v2983_v53 = vld [vmem:[#allocation11 + $0x39c] sm:$0xf0]  ;;  %v2541_v60 = vld [vmem:[#allocation11 + $0x3a0] sm:$0xf0] }
  0x2e   :  { %v2540_v55 = vor.u32 %v2983_v53, %v2539_v52  ;;  %v2251_v61 = vld [vmem:[#allocation11 + $0x140] sm:$0xf]  ;;  %v2544_v63 = vor.u32 %v2979_v58, %v2541_v60  ;;  %v2907_v2 = vld [vmem:[#allocation11 + $0x144] sm:$0xf]  ;;  %1106 = vmatpush.bf16.msrb.mxu0 %v2284_v54 }
  0x2f   :  { %v2911_v62 = vld [vmem:[#allocation11 + $0x15c] sm:$0xf0]  ;;  %v2899_v14 = vld [vmem:[#allocation11 + $0x104] sm:$0xf] }
  0x30   :  { %284 = vmatpush.bf16.msra.mxu2 %v2058_v35  ;;  %v2507_v0 = vld [vmem:[#allocation11 + $0x340] sm:$0xf]  ;;  %v2252_v3 = vor.u32 %v2911_v62, %v2251_v61  ;;  %1120 = vmatpush.bf16.msrb.mxu1 %v2540_v55  ;;  %v2221_v15 = vld [vmem:[#allocation11 + $0x120] sm:$0xf0] }
  0x31   :  { %298 = vmatpush.bf16.msra.mxu3 %v2062_v37  ;;  %v2975_v1 = vld [vmem:[#allocation11 + $0x35c] sm:$0xf0]  ;;  %v2963_v16 = vld [vmem:[#allocation11 + $0x304] sm:$0xf]  ;;  %v2224_v20 = vor.u32 %v2899_v14, %v2221_v15  ;;  %v2924_v14 = vld [vmem:[#allocation11 + $0x1cc] sm:$0xf] }
  0x32   :  { %v2477_v17 = vld [vmem:[#allocation11 + $0x320] sm:$0xf0]  ;;  %1107 = vmatpush.bf16.msrb.mxu0 %v2252_v3  ;;  %v2187_v21 = vld [vmem:[#allocation11 + $0xc0] sm:$0xf]  ;;  %v2325_v15 = vld [vmem:[#allocation11 + $0x1e8] sm:$0xf0] }
  0x33   :  { %v2895_v22 = vld [vmem:[#allocation11 + $0xdc] sm:$0xf0]  ;;  %v2480_v24 = vor.u32 %v2963_v16, %v2477_v17  ;;  %v2891_v26 = vld [vmem:[#allocation11 + $0xc4] sm:$0xf] }
  0x34   :  { %1133 = vmatpush.bf16.msrb.mxu2 %v2320_v46  ;;  %v2443_v23 = vld [vmem:[#allocation11 + $0x2c0] sm:$0xf]  ;;  %v2189_v27 = vld [vmem:[#allocation11 + $0xe0] sm:$0xf0]  ;;  %v2188_v31 = vor.u32 %v2895_v22, %v2187_v21  ;;  %v2581_v21 = vld [vmem:[#allocation11 + $0x3e8] sm:$0xf0] }
  0x35   :  { %1147 = vmatpush.bf16.msrb.mxu3 %v2576_v50  ;;  %v2959_v25 = vld [vmem:[#allocation11 + $0x2dc] sm:$0xf0]  ;;  %v2955_v28 = vld [vmem:[#allocation11 + $0x2c4] sm:$0xf]  ;;  %v2192_v34 = vor.u32 %v2891_v26, %v2189_v27  ;;  %v2328_v26 = vor.u32 %v2924_v14, %v2325_v15  ;;  %v2291_v27 = vld [vmem:[#allocation11 + $0x188] sm:$0xf] }
  0x36   :  { %v2445_v29 = vld [vmem:[#allocation11 + $0x2e0] sm:$0xf0]  ;;  %v2444_v33 = vor.u32 %v2959_v25, %v2443_v23  ;;  %v2155_v35 = vld [vmem:[#allocation11 + $0x80] sm:$0xf]  ;;  %v2419_v14 = vld [vmem:[#allocation11 + $0x288] sm:$0xf] }
  0x37   :  { %v2887_v36 = vld [vmem:[#allocation11 + $0x9c] sm:$0xf0]  ;;  %v2448_v38 = vor.u32 %v2955_v28, %v2445_v29  ;;  %v2883_v40 = vld [vmem:[#allocation11 + $0x84] sm:$0xf]  ;;  %v2920_v28 = vld [vmem:[#allocation11 + $0x1a4] sm:$0xf0] }
  0x38   :  { %1134 = vmatpush.bf16.msrb.mxu2 %v2288_v59  ;;  %v2411_v37 = vld [vmem:[#allocation11 + $0x280] sm:$0xf]  ;;  %v2157_v41 = vld [vmem:[#allocation11 + $0xa0] sm:$0xf0]  ;;  %v2156_v45 = vor.u32 %v2887_v36, %v2155_v35  ;;  %v2547_v29 = vld [vmem:[#allocation11 + $0x388] sm:$0xf]  ;;  %v2292_v36 = vor.u32 %v2920_v28, %v2291_v27 }
  0x39   :  { %1148 = vmatpush.bf16.msrb.mxu3 %v2544_v63  ;;  %v2951_v39 = vld [vmem:[#allocation11 + $0x29c] sm:$0xf0]  ;;  %v2947_v42 = vld [vmem:[#allocation11 + $0x284] sm:$0xf]  ;;  %v2160_v47 = vor.u32 %v2883_v40, %v2157_v41  ;;  %v2549_v35 = vld [vmem:[#allocation11 + $0x3a8] sm:$0xf0] }
  0x3a   :  { %v2413_v43 = vld [vmem:[#allocation11 + $0x2a0] sm:$0xf0]  ;;  %v2412_v46 = vor.u32 %v2951_v39, %v2411_v37  ;;  %v2123_v48 = vld [vmem:[#allocation11 + $0x40] sm:$0xf]  ;;  %v2259_v39 = vld [vmem:[#allocation11 + $0x148] sm:$0xf] }
  0x3b   :  { %v2879_v49 = vld [vmem:[#allocation11 + $0x5c] sm:$0xf0]  ;;  %v2416_v51 = vor.u32 %v2947_v42, %v2413_v43  ;;  %v2875_v53 = vld [vmem:[#allocation11 + $0x44] sm:$0xf]  ;;  %v2912_v40 = vld [vmem:[#allocation11 + $0x164] sm:$0xf0] }
  0x3c   :  { %v2379_v50 = vld [vmem:[#allocation11 + $0x240] sm:$0xf]  ;;  %v2125_v54 = vld [vmem:[#allocation11 + $0x60] sm:$0xf0]  ;;  %v2124_v58 = vor.u32 %v2879_v49, %v2123_v48  ;;  %v2515_v41 = vld [vmem:[#allocation11 + $0x348] sm:$0xf]  ;;  %v2260_v48 = vor.u32 %v2912_v40, %v2259_v39 }
  0x3d   :  { %v2943_v52 = vld [vmem:[#allocation11 + $0x25c] sm:$0xf0]  ;;  %v2939_v55 = vld [vmem:[#allocation11 + $0x244] sm:$0xf]  ;;  %v2128_v62 = vor.u32 %v2875_v53, %v2125_v54  ;;  %v2976_v43 = vld [vmem:[#allocation11 + $0x364] sm:$0xf0] }
  0x3e   :  { %v2381_v56 = vld [vmem:[#allocation11 + $0x260] sm:$0xf0]  ;;  %v2091_v59 = vld [vmem:[#allocation11] sm:$0xf]  ;;  %v2380_v61 = vor.u32 %v2943_v52, %v2379_v50  ;;  %v2516_v49 = vor.u32 %v2976_v43, %v2515_v41  ;;  %v2904_v52 = vld [vmem:[#allocation11 + $0x124] sm:$0xf0] }
  0x3f   :  { %v2871_v63 = vld [vmem:[#allocation11 + $0x1c] sm:$0xf0]  ;;  %v2384_v3 = vor.u32 %v2939_v55, %v2381_v56  ;;  %v2483_v53 = vld [vmem:[#allocation11 + $0x308] sm:$0xf]  ;;  %v2900_v56 = vld [vmem:[#allocation11 + $0x10c] sm:$0xf] }
  0x40   :  { %v2968_v55 = vld [vmem:[#allocation11 + $0x324] sm:$0xf0]  ;;  %v2868_v41 = vld [vmem:[#allocation11 + $0xc] sm:$0xf] }
  0x41   :  { %v2944_v28 = vld [vmem:[#allocation11 + $0x264] sm:$0xf0] }
  0x42   :  { %v2936_v40 = vld [vmem:[#allocation11 + $0x224] sm:$0xf0] }
  0xa1   :  { %v170_v4 = vpop.f32.mrf.mxu0 }
  0xa2   :  { %v171_v6 = vadd.f32 %v3078_v5, %v170_v4  ;;  %v2253_v4 = vld [vmem:[#allocation11 + $0x160] sm:$0xf0] }
  0xa4   :  { %v177_v8 = vmul.f32 0.01, %v171_v6  ;;  %vm175_vm2 = vcmp.gt.f32.partialorder %v171_v6, 0.0 }
  0xa6   :  { %v179_v11 = vsel %vm175_vm2, %v171_v6, %v177_v8  ;;  %v2509_v6 = vld [vmem:[#allocation11 + $0x360] sm:$0xf0]  ;;  %v2256_v8 = vor.u32 %v2907_v2, %v2253_v4 }
  0xa7   :  { %v2867_v4 = vld [vmem:[#allocation11 + $0x4] sm:$0xf] }
  0xa8   :  { %1135 = vmatpush.bf16.msrb.mxu2 %v2256_v8  ;;  %v2323_v8 = vld [vmem:[#allocation11 + $0x1c8] sm:$0xf] }
  0xa9   :  { %v172_v7 = vpop.f32.mrf.mxu0 }
  0xaa   :  { %v173_v9 = vadd.f32 %v3078_v5, %v172_v7  ;;  %v2971_v5 = vld [vmem:[#allocation11 + $0x344] sm:$0xf]  ;;  %v2508_v7 = vor.u32 %v2975_v1, %v2507_v0  ;;  %v2347_v0 = vld [vmem:[#allocation11 + $0x200] sm:$0xf] }
  0xab   :  { %v2935_v1 = vld [vmem:[#allocation11 + $0x21c] sm:$0xf0] }
  0xac   :  { %vm176_vm3 = vcmp.gt.f32.partialorder %v173_v9, 0.0  ;;  %v178_v10 = vmul.f32 0.01, %v173_v9  ;;  %1121 = vmatpush.bf16.msrb.mxu1 %v2508_v7  ;;  %1136 = vmatpush.bf16.msrb.mxu2 %v2224_v20  ;;  %v2349_v7 = vld [vmem:[#allocation11 + $0x220] sm:$0xf0] }
  0xad   :  { %v2988_v20 = vld [vmem:[#allocation11 + $0x3cc] sm:$0xf] }
  0xae   :  { %v180_v12 = vsel %vm176_vm3, %v173_v9, %v178_v10  ;;  %v2219_v9 = vld [vmem:[#allocation11 + $0x100] sm:$0xf] }
  0xaf   :  { %v181_v13 = vpack.c.bf16 %v180_v12, %v179_v11  ;;  %v2903_v10 = vld [vmem:[#allocation11 + $0x11c] sm:$0xf0]  ;;  %v2512_v12 = vor.u32 %v2971_v5, %v2509_v6  ;;  %v2093_v5 = vld [vmem:[#allocation11 + $0x20] sm:$0xf0] }
  0xb0   :  { %v2475_v11 = vld [vmem:[#allocation11 + $0x300] sm:$0xf]  ;;  %v2220_v18 = vor.u32 %v2903_v10, %v2219_v9  ;;  %1137 = vmatpush.bf16.msrb.mxu2 %v2192_v34  ;;  %v2931_v6 = vld [vmem:[#allocation11 + $0x204] sm:$0xf]  ;;  %v2928_v9 = vld [vmem:[#allocation11 + $0x1e4] sm:$0xf0] }
  0xb1   :  { %2054 = vmatmul.msk.bf16.vlgmr.msra.gmra.mxu1 %vm194_vm4, %v181_v13  ;;  %v2967_v13 = vld [vmem:[#allocation11 + $0x31c] sm:$0xf0]  ;;  %1149 = vmatpush.bf16.msrb.mxu3 %v2512_v12  ;;  %v2579_v12 = vld [vmem:[#allocation11 + $0x3c8] sm:$0xf]  ;;  %v2352_v23 = vor.u32 %v2931_v6, %v2349_v7  ;;  %v2980_v34 = vld [vmem:[#allocation11 + $0x38c] sm:$0xf] }
  0xb2   :  { %v2476_v19 = vor.u32 %v2967_v13, %v2475_v11  ;;  %1108 = vmatpush.bf16.msrb.mxu0 %v2220_v18  ;;  %v2092_v11 = vor.u32 %v2871_v63, %v2091_v59  ;;  %v2992_v13 = vld [vmem:[#allocation11 + $0x3e4] sm:$0xf0]  ;;  %v2348_v18 = vor.u32 %v2935_v1, %v2347_v0  ;;  %v2552_v42 = vor.u32 %v2980_v34, %v2549_v35  ;;  %v2485_v59 = vld [vmem:[#allocation11 + $0x328] sm:$0xf0] }
  0xb3   :  { %v2580_v25 = vor.u32 %v2992_v13, %v2579_v12  ;;  %v2195_v0 = vld [vmem:[#allocation11 + $0xc8] sm:$0xf]  ;;  %v2197_v6 = vld [vmem:[#allocation11 + $0xe8] sm:$0xf0] }
  0xb4   :  { %1122 = vmatpush.bf16.msrb.mxu1 %v2476_v19  ;;  %1138 = vmatpush.bf16.msrb.mxu2 %v2160_v47  ;;  %v2096_v19 = vor.u32 %v2867_v4, %v2093_v5  ;;  %v2517_v47 = vld [vmem:[#allocation11 + $0x368] sm:$0xf0]  ;;  %v2896_v1 = vld [vmem:[#allocation11 + $0xe4] sm:$0xf0] }
  0xb5   :  { %1150 = vmatpush.bf16.msrb.mxu3 %v2480_v24  ;;  %v2324_v24 = vor.u32 %v2928_v9, %v2323_v8  ;;  %v2960_v4 = vld [vmem:[#allocation11 + $0x2e4] sm:$0xf0]  ;;  %v2892_v5 = vld [vmem:[#allocation11 + $0xcc] sm:$0xf] }
  0xb6   :  { %1109 = vmatpush.bf16.msrb.mxu0 %v2188_v31  ;;  %v2984_v31 = vld [vmem:[#allocation11 + $0x3a4] sm:$0xf0]  ;;  %v2200_v8 = vor.u32 %v2892_v5, %v2197_v6  ;;  %v2956_v9 = vld [vmem:[#allocation11 + $0x2cc] sm:$0xf]  ;;  %v2989_v5 = vld [vmem:[#allocation11 + $0x3d4] sm:$0xf] }
  0xb7   :  { %v2548_v37 = vor.u32 %v2984_v31, %v2547_v29  ;;  %v2163_v12 = vld [vmem:[#allocation11 + $0x88] sm:$0xf]  ;;  %v2876_v29 = vld [vmem:[#allocation11 + $0x4c] sm:$0xf]  ;;  %v2589_v6 = vld [vmem:[#allocation11 + $0x3f0] sm:$0xf0] }
  0xb8   :  { %1123 = vmatpush.bf16.msrb.mxu1 %v2444_v33  ;;  %1139 = vmatpush.bf16.msrb.mxu2 %v2128_v62  ;;  %v2293_v33 = vld [vmem:[#allocation11 + $0x1a8] sm:$0xf0]  ;;  %v2888_v13 = vld [vmem:[#allocation11 + $0xa4] sm:$0xf0] }
  0xb9   :  { %1151 = vmatpush.bf16.msrb.mxu3 %v2448_v38  ;;  %v2164_v15 = vor.u32 %v2888_v13, %v2163_v12  ;;  %v2389_v34 = vld [vmem:[#allocation11 + $0x268] sm:$0xf0] }
  0xba   :  { %1110 = vmatpush.bf16.msrb.mxu0 %v2156_v45  ;;  %v2261_v45 = vld [vmem:[#allocation11 + $0x168] sm:$0xf0] }
  0xbc   :  { %1124 = vmatpush.bf16.msrb.mxu1 %v2412_v46  ;;  %1140 = vmatpush.bf16.msrb.mxu2 %v2096_v19  ;;  %v2972_v46 = vld [vmem:[#allocation11 + $0x34c] sm:$0xf] }
  0xbd   :  { %1152 = vmatpush.bf16.msrb.mxu3 %v2416_v51  ;;  %v2227_v51 = vld [vmem:[#allocation11 + $0x108] sm:$0xf]  ;;  %v2520_v54 = vor.u32 %v2972_v46, %v2517_v47  ;;  %v2357_v46 = vld [vmem:[#allocation11 + $0x228] sm:$0xf0] }
  0xbe   :  { %1111 = vmatpush.bf16.msrb.mxu0 %v2124_v58  ;;  %v2964_v58 = vld [vmem:[#allocation11 + $0x30c] sm:$0xf] }
  0xbf   :  { %v2488_v63 = vor.u32 %v2964_v58, %v2485_v59 }
  0xc0   :  { %1125 = vmatpush.bf16.msrb.mxu1 %v2380_v61  ;;  %v2484_v61 = vor.u32 %v2968_v55, %v2483_v53 }
  0xc1   :  { %1153 = vmatpush.bf16.msrb.mxu3 %v2384_v3  ;;  %v2196_v3 = vor.u32 %v2896_v1, %v2195_v0  ;;  %v2993_v0 = vld [vmem:[#allocation11 + $0x3ec] sm:$0xf0]  ;;  %v2925_v1 = vld [vmem:[#allocation11 + $0x1d4] sm:$0xf] }
  0xc2   :  { %1112 = vmatpush.bf16.msrb.mxu0 %v2092_v11 }
  0xc4   :  { %1126 = vmatpush.bf16.msrb.mxu1 %v2348_v18  ;;  %v2165_v18 = vld [vmem:[#allocation11 + $0xa8] sm:$0xf0] }
  0xc5   :  { %1154 = vmatpush.bf16.msrb.mxu3 %v2352_v23 }
  0xc6   :  { %1161 = vmatpush.bf16.msra.mxu0 %v2324_v24  ;;  %v2131_v24 = vld [vmem:[#allocation11 + $0x48] sm:$0xf] }
  0xc8   :  { %1175 = vmatpush.bf16.msra.mxu1 %v2580_v25  ;;  %v2880_v25 = vld [vmem:[#allocation11 + $0x64] sm:$0xf0] }
  0xc9   :  { %v2132_v27 = vor.u32 %v2880_v25, %v2131_v24  ;;  %v2557_v24 = vld [vmem:[#allocation11 + $0x3b0] sm:$0xf0] }
  0xca   :  { %1162 = vmatpush.bf16.msra.mxu0 %v2292_v36  ;;  %v2099_v36 = vld [vmem:[#allocation11 + $0x8] sm:$0xf] }
  0xcc   :  { %1176 = vmatpush.bf16.msra.mxu1 %v2548_v37  ;;  %v2872_v37 = vld [vmem:[#allocation11 + $0x24] sm:$0xf0] }
  0xcd   :  { %v2100_v39 = vor.u32 %v2872_v37, %v2099_v36  ;;  %v2525_v36 = vld [vmem:[#allocation11 + $0x370] sm:$0xf0] }
  0xce   :  { %1163 = vmatpush.bf16.msra.mxu0 %v2260_v48  ;;  %v227_v48 = vld [vmem:[#allocation10] sm:$0x3] }
  0xd0   :  { %1177 = vmatpush.bf16.msra.mxu1 %v2516_v49 }
  0xd4   :  { %1178 = vmatpush.bf16.msra.mxu1 %v2484_v61  ;;  %v2331_v61 = vld [vmem:[#allocation11 + $0x1d0] sm:$0xf] }
 0x12e   :  { %v207_v32 = vpop.f32.mrf.mxu1 }
 0x12f   :  { %v208_v44 = vadd.f32 %v3079_v30, %v207_v32  ;;  %v2916_v32 = vld [vmem:[#allocation11 + $0x18c] sm:$0xf] }
 0x130   :  { %v2296_v38 = vor.u32 %v2916_v32, %v2293_v33  ;;  %v2940_v33 = vld [vmem:[#allocation11 + $0x24c] sm:$0xf] }
 0x131   :  { %vm212_vm5 = vcmp.gt.f32.partialorder %v208_v44, 0.0  ;;  %v214_v57 = vmul.f32 0.01, %v208_v44  ;;  %v2392_v35 = vor.u32 %v2940_v33, %v2389_v34  ;;  %v2909_v33 = vld [vmem:[#allocation11 + $0x154] sm:$0xf] }
 0x132   :  { %v2269_v34 = vld [vmem:[#allocation11 + $0x170] sm:$0xf0] }
 0x133   :  { %v216_v16 = vsel %vm212_vm5, %v208_v44, %v214_v57  ;;  %v2908_v44 = vld [vmem:[#allocation11 + $0x14c] sm:$0xf] }
 0x134   :  { %v2264_v50 = vor.u32 %v2908_v44, %v2261_v45  ;;  %v2229_v57 = vld [vmem:[#allocation11 + $0x128] sm:$0xf0] }
 0x135   :  { %v2232_v62 = vor.u32 %v2900_v56, %v2229_v57  ;;  %v2932_v45 = vld [vmem:[#allocation11 + $0x20c] sm:$0xf] }
 0x136   :  { %v209_v60 = vpop.f32.mrf.mxu1  ;;  %v2360_v47 = vor.u32 %v2932_v45, %v2357_v46  ;;  %v2901_v45 = vld [vmem:[#allocation11 + $0x114] sm:$0xf] }
 0x137   :  { %v210_v2 = vadd.f32 %v3079_v30, %v209_v60  ;;  %v2584_v30 = vor.u32 %v2988_v20, %v2581_v21  ;;  %v2228_v60 = vor.u32 %v2904_v52, %v2227_v51  ;;  %v2948_v21 = vld [vmem:[#allocation11 + $0x28c] sm:$0xf]  ;;  %v229_v51 = vperm.slane %v227_v48, 0  ;;  %v2237_v46 = vld [vmem:[#allocation11 + $0x130] sm:$0xf0] }
 0x138   :  { %v230_v52 = vperm.slane %v227_v48, 1  ;;  %v2493_v48 = vld [vmem:[#allocation11 + $0x330] sm:$0xf0] }
 0x139   :  { %vm213_vm6 = vcmp.gt.f32.partialorder %v210_v2, 0.0  ;;  %v215_v10 = vmul.f32 0.01, %v210_v2  ;;  %1164 = vmatpush.bf16.msra.mxu0 %v2228_v60 }
 0x13b   :  { %v217_v17 = vsel %vm213_vm6, %v210_v2, %v215_v10  ;;  %v2451_v2 = vld [vmem:[#allocation11 + $0x2c8] sm:$0xf]  ;;  %v2453_v10 = vld [vmem:[#allocation11 + $0x2e8] sm:$0xf0] }
 0x13c   :  { %v218_v22 = vpack.c.bf16 %v217_v17, %v216_v16  ;;  %v2452_v7 = vor.u32 %v2960_v4, %v2451_v2  ;;  %v2456_v11 = vor.u32 %v2956_v9, %v2453_v10  ;;  %v2952_v16 = vld [vmem:[#allocation11 + $0x2a4] sm:$0xf0]  ;;  %v2884_v17 = vld [vmem:[#allocation11 + $0x8c] sm:$0xf]  ;;  %v2333_v4 = vld [vmem:[#allocation11 + $0x1f0] sm:$0xf0] }
 0x13d   :  { %1165 = vmatpush.bf16.msra.mxu0 %v2196_v3  ;;  %v2420_v19 = vor.u32 %v2952_v16, %v2419_v14  ;;  %v2168_v20 = vor.u32 %v2884_v17, %v2165_v18  ;;  %v2921_v16 = vld [vmem:[#allocation11 + $0x1ac] sm:$0xf0]  ;;  %v2336_v17 = vor.u32 %v2925_v1, %v2333_v4  ;;  %v2592_v18 = vor.u32 %v2989_v5, %v2589_v6  ;;  %v2885_v5 = vld [vmem:[#allocation11 + $0x94] sm:$0xf] }
 0x13e   :  { %2087 = vmatmul.msk.bf16.vlgmr.msra.gmra.mxu2 %vm273_vm7, %v218_v22  ;;  %2088 = vmatmul.msk.bf16.vlgmr.msra.gmra.mxu3 %vm273_vm7, %v218_v22  ;;  %v2421_v22 = vld [vmem:[#allocation11 + $0x2a8] sm:$0xf0]  ;;  %v2953_v4 = vld [vmem:[#allocation11 + $0x2ac] sm:$0xf0]  ;;  %v2173_v6 = vld [vmem:[#allocation11 + $0xb0] sm:$0xf0] }
 0x13f   :  { %1189 = vmatpush.bf16.msra.mxu2 %v2328_v26  ;;  %1203 = vmatpush.bf16.msra.mxu3 %v2584_v30  ;;  %v2424_v23 = vor.u32 %v2948_v21, %v2421_v22  ;;  %v2387_v26 = vld [vmem:[#allocation11 + $0x248] sm:$0xf]  ;;  %v2133_v30 = vld [vmem:[#allocation11 + $0x68] sm:$0xf0]  ;;  %v2917_v21 = vld [vmem:[#allocation11 + $0x194] sm:$0xf] }
 0x140   :  { %1179 = vmatpush.bf16.msra.mxu1 %v2452_v7  ;;  %v2388_v31 = vor.u32 %v2944_v28, %v2387_v26  ;;  %v2136_v32 = vor.u32 %v2876_v29, %v2133_v30  ;;  %v2301_v22 = vld [vmem:[#allocation11 + $0x1b0] sm:$0xf0]  ;;  %v2913_v28 = vld [vmem:[#allocation11 + $0x16c] sm:$0xf0] }
 0x141   :  { %1166 = vmatpush.bf16.msra.mxu0 %v2164_v15  ;;  %v2299_v15 = vld [vmem:[#allocation11 + $0x190] sm:$0xf]  ;;  %v2304_v29 = vor.u32 %v2917_v21, %v2301_v22  ;;  %v2941_v21 = vld [vmem:[#allocation11 + $0x254] sm:$0xf] }
 0x142   :  { %v2300_v25 = vor.u32 %v2921_v16, %v2299_v15  ;;  %v2176_v15 = vor.u32 %v2885_v5, %v2173_v6  ;;  %v2397_v22 = vld [vmem:[#allocation11 + $0x270] sm:$0xf0]  ;;  %v2974_v5 = vld [vmem:[#allocation11 + $0x35c] sm:$0xf] }
 0x143   :  { %1190 = vmatpush.bf16.msra.mxu2 %v2296_v38  ;;  %1204 = vmatpush.bf16.msra.mxu3 %v2552_v42  ;;  %v2355_v38 = vld [vmem:[#allocation11 + $0x208] sm:$0xf]  ;;  %v2101_v42 = vld [vmem:[#allocation11 + $0x28] sm:$0xf0]  ;;  %v2533_v6 = vld [vmem:[#allocation11 + $0x378] sm:$0xf0] }
 0x144   :  { %1180 = vmatpush.bf16.msra.mxu1 %v2420_v19  ;;  %v2356_v43 = vor.u32 %v2936_v40, %v2355_v38  ;;  %v2104_v44 = vor.u32 %v2868_v41, %v2101_v42  ;;  %v2555_v19 = vld [vmem:[#allocation11 + $0x390] sm:$0xf]  ;;  %v2272_v41 = vor.u32 %v2909_v33, %v2269_v34  ;;  %v2933_v33 = vld [vmem:[#allocation11 + $0x214] sm:$0xf] }
 0x145   :  { %1167 = vmatpush.bf16.msra.mxu0 %v2132_v27  ;;  %v2267_v27 = vld [vmem:[#allocation11 + $0x150] sm:$0xf]  ;;  %v2365_v34 = vld [vmem:[#allocation11 + $0x230] sm:$0xf0] }
 0x146   :  { %v2268_v37 = vor.u32 %v2913_v28, %v2267_v27  ;;  %v2905_v40 = vld [vmem:[#allocation11 + $0x12c] sm:$0xf0] }
 0x147   :  { %1191 = vmatpush.bf16.msra.mxu2 %v2264_v50  ;;  %1205 = vmatpush.bf16.msra.mxu3 %v2520_v54  ;;  %v2363_v27 = vld [vmem:[#allocation11 + $0x210] sm:$0xf] }
 0x148   :  { %1181 = vmatpush.bf16.msra.mxu1 %v2388_v31  ;;  %v2523_v31 = vld [vmem:[#allocation11 + $0x350] sm:$0xf] }
 0x149   :  { %1168 = vmatpush.bf16.msra.mxu0 %v2100_v39  ;;  %v2235_v39 = vld [vmem:[#allocation11 + $0x110] sm:$0xf] }
 0x14a   :  { %v2937_v28 = vld [vmem:[#allocation11 + $0x22c] sm:$0xf0] }
 0x14b   :  { %1192 = vmatpush.bf16.msra.mxu2 %v2232_v62  ;;  %1206 = vmatpush.bf16.msra.mxu3 %v2488_v63  ;;  %v2929_v62 = vld [vmem:[#allocation11 + $0x1ec] sm:$0xf0] }
 0x14c   :  { %1182 = vmatpush.bf16.msra.mxu1 %v2356_v43  ;;  %v2587_v63 = vld [vmem:[#allocation11 + $0x3d0] sm:$0xf]  ;;  %v2332_v13 = vor.u32 %v2929_v62, %v2331_v61 }
 0x14d   :  { %v2588_v14 = vor.u32 %v2993_v0, %v2587_v63  ;;  %v2491_v43 = vld [vmem:[#allocation11 + $0x310] sm:$0xf] }
 0x14e   :  { %v2171_v63 = vld [vmem:[#allocation11 + $0x90] sm:$0xf] }
 0x14f   :  { %1193 = vmatpush.bf16.msra.mxu2 %v2200_v8  ;;  %1207 = vmatpush.bf16.msra.mxu3 %v2456_v11  ;;  %v2889_v0 = vld [vmem:[#allocation11 + $0xac] sm:$0xf0] }
 0x153   :  { %1194 = vmatpush.bf16.msra.mxu2 %v2168_v20  ;;  %1208 = vmatpush.bf16.msra.mxu3 %v2424_v23  ;;  %v2985_v20 = vld [vmem:[#allocation11 + $0x3ac] sm:$0xf0]  ;;  %v2981_v23 = vld [vmem:[#allocation11 + $0x394] sm:$0xf] }
 0x154   :  { %v2556_v26 = vor.u32 %v2985_v20, %v2555_v19  ;;  %v2560_v30 = vor.u32 %v2981_v23, %v2557_v24  ;;  %v2877_v19 = vld [vmem:[#allocation11 + $0x54] sm:$0xf]  ;;  %v2107_v23 = vld [vmem:[#allocation11 + $0x10] sm:$0xf] }
 0x155   :  { %v2141_v20 = vld [vmem:[#allocation11 + $0x70] sm:$0xf0] }
 0x157   :  { %1195 = vmatpush.bf16.msra.mxu2 %v2136_v32  ;;  %1209 = vmatpush.bf16.msra.mxu3 %v2392_v35  ;;  %v2977_v32 = vld [vmem:[#allocation11 + $0x36c] sm:$0xf0]  ;;  %v2973_v35 = vld [vmem:[#allocation11 + $0x354] sm:$0xf] }
 0x158   :  { %v2524_v38 = vor.u32 %v2977_v32, %v2523_v31  ;;  %v2528_v42 = vor.u32 %v2973_v35, %v2525_v36  ;;  %v2869_v31 = vld [vmem:[#allocation11 + $0x14] sm:$0xf]  ;;  %v2339_v35 = vld [vmem:[#allocation11 + $0x1d8] sm:$0xf] }
 0x159   :  { %v2109_v32 = vld [vmem:[#allocation11 + $0x30] sm:$0xf0]  ;;  %v2930_v36 = vld [vmem:[#allocation11 + $0x1f4] sm:$0xf0] }
 0x15b   :  { %1196 = vmatpush.bf16.msra.mxu2 %v2104_v44  ;;  %1210 = vmatpush.bf16.msra.mxu3 %v2360_v47  ;;  %v2969_v44 = vld [vmem:[#allocation11 + $0x32c] sm:$0xf0]  ;;  %v2965_v47 = vld [vmem:[#allocation11 + $0x314] sm:$0xf] }
 0x1c1   :  { %v286_v49 = vpop.f32.mrf.mxu2  ;;  %v300_v50 = vpop.f32.mrf.mxu3 }
 0x1c2   :  { %v287_v53 = vadd.f32 %v286_v49, %v229_v51  ;;  %v301_v54 = vadd.f32 %v300_v50, %v230_v52  ;;  %v2236_v49 = vor.u32 %v2905_v40, %v2235_v39  ;;  %v2492_v50 = vor.u32 %v2969_v44, %v2491_v43  ;;  %v2926_v39 = vld [vmem:[#allocation11 + $0x1dc] sm:$0xf] }
 0x1c3   :  { %v2990_v43 = vld [vmem:[#allocation11 + $0x3dc] sm:$0xf] }
 0x1c4   :  { %v309_v57 = vmul.f32 0.01, %v287_v53  ;;  %v310_v58 = vmul.f32 0.01, %v301_v54  ;;  %vm305_vm8 = vcmp.gt.f32.partialorder %v287_v53, 0.0  ;;  %vm306_vm9 = vcmp.gt.f32.partialorder %v301_v54, 0.0 }
 0x1c5   :  { %v2597_v44 = vld [vmem:[#allocation11 + $0x3f8] sm:$0xf0] }
 0x1c6   :  { %v313_v7 = vsel %vm305_vm8, %v287_v53, %v309_v57  ;;  %v314_v8 = vsel %vm306_vm9, %v301_v54, %v310_v58  ;;  %v2240_v53 = vor.u32 %v2901_v45, %v2237_v46  ;;  %v2496_v54 = vor.u32 %v2965_v47, %v2493_v48  ;;  %v2893_v57 = vld [vmem:[#allocation11 + $0xd4] sm:$0xf] }
 0x1c7   :  { %v2205_v58 = vld [vmem:[#allocation11 + $0xf0] sm:$0xf0]  ;;  %v2112_v45 = vor.u32 %v2869_v31, %v2109_v32  ;;  %v2368_v46 = vor.u32 %v2933_v33, %v2365_v34  ;;  %v2340_v47 = vor.u32 %v2930_v36, %v2339_v35  ;;  %v2958_v31 = vld [vmem:[#allocation11 + $0x2dc] sm:$0xf]  ;;  %v2179_v35 = vld [vmem:[#allocation11 + $0x98] sm:$0xf] }
 0x1c8   :  { %v2208_v1 = vor.u32 %v2893_v57, %v2205_v58  ;;  %v2982_v57 = vld [vmem:[#allocation11 + $0x39c] sm:$0xf]  ;;  %v2890_v36 = vld [vmem:[#allocation11 + $0xb4] sm:$0xf0] }
 0x1c9   :  { %v288_v55 = vpop.f32.mrf.mxu2  ;;  %v302_v56 = vpop.f32.mrf.mxu3  ;;  %v2565_v58 = vld [vmem:[#allocation11 + $0x3b8] sm:$0xf0] }
 0x1ca   :  { %v289_v59 = vadd.f32 %v288_v55, %v229_v51  ;;  %v303_v60 = vadd.f32 %v302_v56, %v230_v52  ;;  %v2203_v51 = vld [vmem:[#allocation11 + $0xd0] sm:$0xf]  ;;  %v2469_v32 = vld [vmem:[#allocation11 + $0x2f8] sm:$0xf0] }
 0x1cb   :  { %v2897_v52 = vld [vmem:[#allocation11 + $0xec] sm:$0xf0] }
 0x1cc   :  { %vm307_vm10 = vcmp.gt.f32.partialorder %v289_v59, 0.0  ;;  %v311_v2 = vmul.f32 0.01, %v289_v59  ;;  %vm308_vm11 = vcmp.gt.f32.partialorder %v303_v60, 0.0  ;;  %v312_v3 = vmul.f32 0.01, %v303_v60 }
 0x1cd   :  { %v2459_v55 = vld [vmem:[#allocation11 + $0x2d0] sm:$0xf]  ;;  %v2204_v61 = vor.u32 %v2897_v52, %v2203_v51  ;;  %v2600_v52 = vor.u32 %v2990_v43, %v2597_v44  ;;  %v2950_v43 = vld [vmem:[#allocation11 + $0x29c] sm:$0xf] }
 0x1ce   :  { %v315_v9 = vsel %vm307_vm10, %v289_v59, %v311_v2  ;;  %v316_v10 = vsel %vm308_vm11, %v303_v60, %v312_v3  ;;  %v2961_v56 = vld [vmem:[#allocation11 + $0x2ec] sm:$0xf0]  ;;  %v2957_v59 = vld [vmem:[#allocation11 + $0x2d4] sm:$0xf]  ;;  %v2437_v44 = vld [vmem:[#allocation11 + $0x2b8] sm:$0xf0] }
 0x1cf   :  { %v3390_v11 = vpack.c.bf16 %v315_v9, %v313_v7  ;;  %v3392_v12 = vpack.c.bf16 %v316_v10, %v314_v8  ;;  %v2461_v60 = vld [vmem:[#allocation11 + $0x2f0] sm:$0xf0]  ;;  %v2460_v62 = vor.u32 %v2961_v56, %v2459_v55  ;;  %v2427_v3 = vld [vmem:[#allocation11 + $0x290] sm:$0xf]  ;;  %v2172_v9 = vor.u32 %v2889_v0, %v2171_v63  ;;  %v2918_v55 = vld [vmem:[#allocation11 + $0x19c] sm:$0xf] }
 0x1d0   :  { %v2464_v2 = vor.u32 %v2957_v59, %v2461_v60  ;;  %v2949_v7 = vld [vmem:[#allocation11 + $0x294] sm:$0xf]  ;;  %v2428_v10 = vor.u32 %v2953_v4, %v2427_v3  ;;  %v2309_v56 = vld [vmem:[#allocation11 + $0x1b8] sm:$0xf0]  ;;  %v2568_v0 = vor.u32 %v2982_v57, %v2565_v58 }
 0x1d1   :  { %1113 = vmatmul.bf16.vlgmr.msrb.gmra.mxu0 %v3390_v11  ;;  %1127 = vmatmul.bf16.vlgmr.msrb.gmra.mxu1 %v3392_v12  ;;  %v2429_v8 = vld [vmem:[#allocation11 + $0x2b0] sm:$0xf0]  ;;  %v2312_v63 = vor.u32 %v2918_v55, %v2309_v56  ;;  %v2910_v3 = vld [vmem:[#allocation11 + $0x15c] sm:$0xf] }
 0x1d2   :  { %1141 = vmatmul.bf16.vlgmr.msrb.gmra.mxu2 %v3390_v11  ;;  %1155 = vmatmul.bf16.vlgmr.msrb.gmra.mxu3 %v3392_v12  ;;  %v2432_v16 = vor.u32 %v2949_v7, %v2429_v8  ;;  %v2277_v4 = vld [vmem:[#allocation11 + $0x178] sm:$0xf0] }
 0x1d3   :  { %1217 = vmatpush.bf16.msrb.mxu0 %v2332_v13  ;;  %1231 = vmatpush.bf16.msrb.mxu1 %v2588_v14  ;;  %v2139_v13 = vld [vmem:[#allocation11 + $0x50] sm:$0xf]  ;;  %v2942_v55 = vld [vmem:[#allocation11 + $0x25c] sm:$0xf] }
 0x1d4   :  { %1245 = vmatpush.bf16.msrb.mxu2 %v2336_v17  ;;  %1259 = vmatpush.bf16.msrb.mxu3 %v2592_v18  ;;  %v2881_v14 = vld [vmem:[#allocation11 + $0x6c] sm:$0xf0]  ;;  %v2405_v56 = vld [vmem:[#allocation11 + $0x278] sm:$0xf0] }
 0x1d5   :  { %v2395_v17 = vld [vmem:[#allocation11 + $0x250] sm:$0xf]  ;;  %v2140_v24 = vor.u32 %v2881_v14, %v2139_v13  ;;  %v2280_v13 = vor.u32 %v2910_v3, %v2277_v4  ;;  %v2536_v14 = vor.u32 %v2974_v5, %v2533_v6  ;;  %v2934_v3 = vld [vmem:[#allocation11 + $0x21c] sm:$0xf] }
 0x1d6   :  { %v2945_v18 = vld [vmem:[#allocation11 + $0x26c] sm:$0xf0]  ;;  %v2373_v4 = vld [vmem:[#allocation11 + $0x238] sm:$0xf0] }
 0x1d7   :  { %1218 = vmatpush.bf16.msrb.mxu0 %v2300_v25  ;;  %1232 = vmatpush.bf16.msrb.mxu1 %v2556_v26  ;;  %v2396_v25 = vor.u32 %v2945_v18, %v2395_v17  ;;  %v2873_v26 = vld [vmem:[#allocation11 + $0x2c] sm:$0xf0]  ;;  %v2902_v17 = vld [vmem:[#allocation11 + $0x11c] sm:$0xf] }
 0x1d8   :  { %1246 = vmatpush.bf16.msrb.mxu2 %v2304_v29  ;;  %1260 = vmatpush.bf16.msrb.mxu3 %v2560_v30  ;;  %v2144_v29 = vor.u32 %v2877_v19, %v2141_v20  ;;  %v2400_v30 = vor.u32 %v2941_v21, %v2397_v22  ;;  %v2108_v40 = vor.u32 %v2873_v26, %v2107_v23  ;;  %v2245_v18 = vld [vmem:[#allocation11 + $0x138] sm:$0xf0]  ;;  %v2211_v23 = vld [vmem:[#allocation11 + $0xd8] sm:$0xf] }
 0x1d9   :  { %v2966_v19 = vld [vmem:[#allocation11 + $0x31c] sm:$0xf] }
 0x1da   :  { %v2501_v20 = vld [vmem:[#allocation11 + $0x338] sm:$0xf0] }
 0x1db   :  { %1219 = vmatpush.bf16.msrb.mxu0 %v2268_v37  ;;  %1233 = vmatpush.bf16.msrb.mxu1 %v2524_v38  ;;  %v2595_v37 = vld [vmem:[#allocation11 + $0x3d8] sm:$0xf]  ;;  %v2504_v26 = vor.u32 %v2966_v19, %v2501_v20  ;;  %v3007_v20 = vld [vmem:[#allocation13 + $0x60] sm:$0xff] }
 0x1dc   :  { %1247 = vmatpush.bf16.msrb.mxu2 %v2272_v41  ;;  %1261 = vmatpush.bf16.msrb.mxu3 %v2528_v42  ;;  %v2994_v38 = vld [vmem:[#allocation11 + $0x3f4] sm:$0xf0]  ;;  %v2364_v41 = vor.u32 %v2937_v28, %v2363_v27  ;;  %v2341_v42 = vld [vmem:[#allocation11 + $0x1f8] sm:$0xf0] }
 0x1dd   :  { %v2596_v48 = vor.u32 %v2994_v38, %v2595_v37  ;;  %v2344_v51 = vor.u32 %v2926_v39, %v2341_v42  ;;  %v2467_v27 = vld [vmem:[#allocation11 + $0x2d8] sm:$0xf]  ;;  %v2472_v38 = vor.u32 %v2958_v31, %v2469_v32  ;;  %v2181_v42 = vld [vmem:[#allocation11 + $0xb8] sm:$0xf0] }
 0x1de   :  { %v2962_v28 = vld [vmem:[#allocation11 + $0x2f4] sm:$0xf0] }
 0x1df   :  { %1220 = vmatpush.bf16.msrb.mxu0 %v2236_v49  ;;  %1234 = vmatpush.bf16.msrb.mxu1 %v2492_v50  ;;  %v2307_v49 = vld [vmem:[#allocation11 + $0x198] sm:$0xf]  ;;  %v2468_v34 = vor.u32 %v2962_v28, %v2467_v27  ;;  %v2995_v27 = vld [vmem:[#allocation13] sm:$0xff] }
 0x1e0   :  { %1248 = vmatpush.bf16.msrb.mxu2 %v2240_v53  ;;  %1262 = vmatpush.bf16.msrb.mxu3 %v2496_v54  ;;  %v2922_v50 = vld [vmem:[#allocation11 + $0x1b4] sm:$0xf0]  ;;  %v3015_v28 = vld [vmem:[#allocation13 + $0xa0] sm:$0xff] }
 0x1e1   :  { %1169 = vmatmul.bf16.vlgmr.msra.gmra.mxu0 %v3390_v11  ;;  %1183 = vmatmul.bf16.vlgmr.msra.gmra.mxu1 %v3392_v12  ;;  %v2563_v53 = vld [vmem:[#allocation11 + $0x398] sm:$0xf]  ;;  %v2308_v59 = vor.u32 %v2922_v50, %v2307_v49  ;;  %v2440_v50 = vor.u32 %v2950_v43, %v2437_v44  ;;  %v3021_v43 = vld [vmem:[#allocation13 + $0xd0] sm:$0xff] }
 0x1e2   :  { %1197 = vmatmul.bf16.vlgmr.msra.gmra.mxu2 %v3390_v11  ;;  %1211 = vmatmul.bf16.vlgmr.msra.gmra.mxu3 %v3392_v12  ;;  %v2986_v54 = vld [vmem:[#allocation11 + $0x3b4] sm:$0xf0]  ;;  %v3041_v44 = vld [vmem:[#allocation13 + $0x170] sm:$0xff] }
 0x1e3   :  { %1221 = vmatpush.bf16.msrb.mxu0 %v2204_v61  ;;  %1235 = vmatpush.bf16.msrb.mxu1 %v2460_v62  ;;  %v2564_v60 = vor.u32 %v2986_v54, %v2563_v53  ;;  %v2275_v61 = vld [vmem:[#allocation11 + $0x158] sm:$0xf]  ;;  %v2878_v53 = vld [vmem:[#allocation11 + $0x5c] sm:$0xf] }
 0x1e4   :  { %1249 = vmatpush.bf16.msrb.mxu2 %v2208_v1  ;;  %1263 = vmatpush.bf16.msrb.mxu3 %v2464_v2  ;;  %v2914_v62 = vld [vmem:[#allocation11 + $0x174] sm:$0xf0]  ;;  %v2149_v54 = vld [vmem:[#allocation11 + $0x78] sm:$0xf0] }
 0x1e5   :  { %v2531_v1 = vld [vmem:[#allocation11 + $0x358] sm:$0xf]  ;;  %v2276_v7 = vor.u32 %v2914_v62, %v2275_v61  ;;  %v2152_v61 = vor.u32 %v2878_v53, %v2149_v54  ;;  %v2408_v62 = vor.u32 %v2942_v55, %v2405_v56 }
 0x1e6   :  { %v2978_v2 = vld [vmem:[#allocation11 + $0x374] sm:$0xf0] }
 0x1e7   :  { %1222 = vmatpush.bf16.msrb.mxu0 %v2172_v9  ;;  %1236 = vmatpush.bf16.msrb.mxu1 %v2428_v10  ;;  %v2532_v8 = vor.u32 %v2978_v2, %v2531_v1  ;;  %v2243_v9 = vld [vmem:[#allocation11 + $0x118] sm:$0xf]  ;;  %v2870_v1 = vld [vmem:[#allocation11 + $0x1c] sm:$0xf] }
 0x1e8   :  { %1250 = vmatpush.bf16.msrb.mxu2 %v2176_v15  ;;  %1264 = vmatpush.bf16.msrb.mxu3 %v2432_v16  ;;  %v2906_v10 = vld [vmem:[#allocation11 + $0x134] sm:$0xf0]  ;;  %v2117_v2 = vld [vmem:[#allocation11 + $0x38] sm:$0xf0] }
 0x1e9   :  { %v2499_v15 = vld [vmem:[#allocation11 + $0x318] sm:$0xf]  ;;  %v2244_v21 = vor.u32 %v2906_v10, %v2243_v9 }
 0x1ea   :  { %v2970_v16 = vld [vmem:[#allocation11 + $0x334] sm:$0xf0] }
 0x1eb   :  { %1223 = vmatpush.bf16.msrb.mxu0 %v2140_v24  ;;  %1237 = vmatpush.bf16.msrb.mxu1 %v2396_v25  ;;  %v2500_v22 = vor.u32 %v2970_v16, %v2499_v15  ;;  %v2898_v24 = vld [vmem:[#allocation11 + $0xf4] sm:$0xf0]  ;;  %v2248_v25 = vor.u32 %v2902_v17, %v2245_v18  ;;  %v3000_v15 = vld [vmem:[#allocation13 + $0x28] sm:$0xff]  ;;  %v2999_v16 = vld [vmem:[#allocation13 + $0x20] sm:$0xff] }
 0x1ec   :  { %1251 = vmatpush.bf16.msrb.mxu2 %v2144_v29  ;;  %1265 = vmatpush.bf16.msrb.mxu3 %v2400_v30  ;;  %v2894_v29 = vld [vmem:[#allocation11 + $0xdc] sm:$0xf]  ;;  %v2212_v33 = vor.u32 %v2898_v24, %v2211_v23  ;;  %v2435_v39 = vld [vmem:[#allocation11 + $0x298] sm:$0xf]  ;;  %v3008_v17 = vld [vmem:[#allocation13 + $0x68] sm:$0xff] }
 0x1ed   :  { %v2213_v30 = vld [vmem:[#allocation11 + $0xf8] sm:$0xf0]  ;;  %v2996_v23 = vld [vmem:[#allocation13 + $0x8] sm:$0xff] }
 0x1ee   :  { %v2216_v37 = vor.u32 %v2894_v29, %v2213_v30  ;;  %v3002_v9 = vld [vmem:[#allocation13 + $0x38] sm:$0xff]  ;;  %v3016_v24 = vld [vmem:[#allocation13 + $0xa8] sm:$0xff] }
 0x1ef   :  { %1224 = vmatpush.bf16.msrb.mxu0 %v2108_v40  ;;  %1238 = vmatpush.bf16.msrb.mxu1 %v2364_v41  ;;  %v2954_v40 = vld [vmem:[#allocation11 + $0x2b4] sm:$0xf0]  ;;  %v2886_v41 = vld [vmem:[#allocation11 + $0x9c] sm:$0xf]  ;;  %v3004_v29 = vld [vmem:[#allocation13 + $0x48] sm:$0xff] }
 0x1f0   :  { %1252 = vmatpush.bf16.msrb.mxu2 %v2112_v45  ;;  %1266 = vmatpush.bf16.msrb.mxu3 %v2368_v46  ;;  %v2180_v45 = vor.u32 %v2890_v36, %v2179_v35  ;;  %v2436_v46 = vor.u32 %v2954_v40, %v2435_v39  ;;  %v2184_v49 = vor.u32 %v2886_v41, %v2181_v42  ;;  %v3010_v10 = vld [vmem:[#allocation13 + $0x78] sm:$0xff]  ;;  %v3024_v30 = vld [vmem:[#allocation13 + $0xe8] sm:$0xff]  ;;  %v3013_v35 = vld [vmem:[#allocation13 + $0x90] sm:$0xff] }
 0x1f1   :  { %v2998_v18 = vld [vmem:[#allocation13 + $0x18] sm:$0xff]  ;;  %v3033_v36 = vld [vmem:[#allocation13 + $0x130] sm:$0xff]  ;;  %v3413_v39 = vld [vmem:[%s3440_s8] sm:$0xff] }
 0x1f2   :  { %1225 = vmatmul.bf16.vlgmr.msrb.gmra.mxu0 %v3390_v11  ;;  %1239 = vmatmul.bf16.vlgmr.msrb.gmra.mxu1 %v3392_v12  ;;  %v3018_v19 = vld [vmem:[#allocation13 + $0xb8] sm:$0xff]  ;;  %v3012_v40 = vld [vmem:[#allocation13 + $0x88] sm:$0xff]  ;;  %v449_v42 = vperm.slane %v3413_v39, 0  ;;  %v450_v53 = vperm.slane %v3413_v39, 1 }
 0x1f3   :  { %1273 = vmatpush.bf16.msra.mxu0 %v2340_v47  ;;  %1287 = vmatpush.bf16.msra.mxu1 %v2596_v48  ;;  %v2147_v47 = vld [vmem:[#allocation11 + $0x58] sm:$0xf]  ;;  %v3032_v41 = vld [vmem:[#allocation13 + $0x128] sm:$0xff] }
 0x1f4   :  { %1301 = vmatpush.bf16.msra.mxu2 %v2344_v51  ;;  %1315 = vmatpush.bf16.msra.mxu3 %v2600_v52  ;;  %v2882_v48 = vld [vmem:[#allocation11 + $0x74] sm:$0xf0] }
 0x1f5   :  { %1253 = vmatmul.bf16.vlgmr.msrb.gmra.mxu2 %v3390_v11  ;;  %1267 = vmatmul.bf16.vlgmr.msrb.gmra.mxu3 %v3392_v12  ;;  %v2403_v51 = vld [vmem:[#allocation11 + $0x258] sm:$0xf]  ;;  %v2148_v57 = vor.u32 %v2882_v48, %v2147_v47  ;;  %v3011_v47 = vld [vmem:[#allocation13 + $0x80] sm:$0xff] }
 0x1f6   :  { %v2946_v52 = vld [vmem:[#allocation11 + $0x274] sm:$0xf0]  ;;  %v3031_v48 = vld [vmem:[#allocation13 + $0x120] sm:$0xff] }
 0x1f7   :  { %1274 = vmatpush.bf16.msra.mxu0 %v2308_v59  ;;  %1288 = vmatpush.bf16.msra.mxu1 %v2564_v60  ;;  %v2404_v58 = vor.u32 %v2946_v52, %v2403_v51  ;;  %v2115_v59 = vld [vmem:[#allocation11 + $0x18] sm:$0xf]  ;;  %v3040_v51 = vld [vmem:[#allocation13 + $0x168] sm:$0xff] }
 0x1f8   :  { %1302 = vmatpush.bf16.msra.mxu2 %v2312_v63  ;;  %1316 = vmatpush.bf16.msra.mxu3 %v2568_v0  ;;  %v2874_v60 = vld [vmem:[#allocation11 + $0x34] sm:$0xf0] }
 0x1f9   :  { %v2371_v63 = vld [vmem:[#allocation11 + $0x218] sm:$0xf]  ;;  %v2116_v5 = vor.u32 %v2874_v60, %v2115_v59 }
 0x1fa   :  { %v2938_v0 = vld [vmem:[#allocation11 + $0x234] sm:$0xf0] }
 0x1fb   :  { %1275 = vmatpush.bf16.msra.mxu0 %v2276_v7  ;;  %1289 = vmatpush.bf16.msra.mxu1 %v2532_v8  ;;  %v2372_v6 = vor.u32 %v2938_v0, %v2371_v63  ;;  %v2120_v7 = vor.u32 %v2870_v1, %v2117_v2  ;;  %v2376_v8 = vor.u32 %v2934_v3, %v2373_v4  ;;  %v3014_v31 = vld [vmem:[#allocation13 + $0x98] sm:$0xff]  ;;  %v3028_v4 = vld [vmem:[#allocation13 + $0x108] sm:$0xff] }
 0x1fc   :  { %1303 = vmatpush.bf16.msra.mxu2 %v2280_v13  ;;  %1317 = vmatpush.bf16.msra.mxu3 %v2536_v14  ;;  %v3001_v13 = vld [vmem:[#allocation13 + $0x30] sm:$0xff]  ;;  %v3034_v32 = vld [vmem:[#allocation13 + $0x138] sm:$0xff] }
 0x1fd   :  { %v3009_v14 = vld [vmem:[#allocation13 + $0x70] sm:$0xff]  ;;  %v3030_v52 = vld [vmem:[#allocation13 + $0x118] sm:$0xff] }
 0x1fe   :  { %v3038_v2 = vld [vmem:[#allocation13 + $0x158] sm:$0xff] }
 0x1ff   :  { %1276 = vmatpush.bf16.msra.mxu0 %v2244_v21  ;;  %1290 = vmatpush.bf16.msra.mxu1 %v2500_v22  ;;  %v2997_v21 = vld [vmem:[#allocation13 + $0x10] sm:$0xff] }
 0x200   :  { %1304 = vmatpush.bf16.msra.mxu2 %v2248_v25  ;;  %1318 = vmatpush.bf16.msra.mxu3 %v2504_v26  ;;  %v3017_v22 = vld [vmem:[#allocation13 + $0xb0] sm:$0xff] }
 0x201   :  { %v3005_v25 = vld [vmem:[#allocation13 + $0x50] sm:$0xff] }
 0x202   :  { %v3025_v26 = vld [vmem:[#allocation13 + $0xf0] sm:$0xff] }
 0x203   :  { %1277 = vmatpush.bf16.msra.mxu0 %v2212_v33  ;;  %1291 = vmatpush.bf16.msra.mxu1 %v2468_v34  ;;  %v3003_v33 = vld [vmem:[#allocation13 + $0x40] sm:$0xff] }
 0x204   :  { %1305 = vmatpush.bf16.msra.mxu2 %v2216_v37  ;;  %1319 = vmatpush.bf16.msra.mxu3 %v2472_v38  ;;  %v3023_v34 = vld [vmem:[#allocation13 + $0xe0] sm:$0xff]  ;;  %v3022_v37 = vld [vmem:[#allocation13 + $0xd8] sm:$0xff] }
 0x205   :  { %v3042_v38 = vld [vmem:[#allocation13 + $0x178] sm:$0xff] }
 0x207   :  { %1278 = vmatpush.bf16.msra.mxu0 %v2180_v45  ;;  %1292 = vmatpush.bf16.msra.mxu1 %v2436_v46 }
 0x208   :  { %1306 = vmatpush.bf16.msra.mxu2 %v2184_v49  ;;  %1320 = vmatpush.bf16.msra.mxu3 %v2440_v50  ;;  %v3020_v50 = vld [vmem:[#allocation13 + $0xc8] sm:$0xff] }
 0x20b   :  { %1279 = vmatpush.bf16.msra.mxu0 %v2148_v57  ;;  %1293 = vmatpush.bf16.msra.mxu1 %v2404_v58  ;;  %v3019_v57 = vld [vmem:[#allocation13 + $0xc0] sm:$0xff] }
 0x20c   :  { %1307 = vmatpush.bf16.msra.mxu2 %v2152_v61  ;;  %1321 = vmatpush.bf16.msra.mxu3 %v2408_v62  ;;  %v3039_v58 = vld [vmem:[#allocation13 + $0x160] sm:$0xff]  ;;  %v3029_v62 = vld [vmem:[#allocation13 + $0x110] sm:$0xff] }
 0x20f   :  { %1280 = vmatpush.bf16.msra.mxu0 %v2116_v5  ;;  %1294 = vmatpush.bf16.msra.mxu1 %v2372_v6 }
 0x210   :  { %1308 = vmatpush.bf16.msra.mxu2 %v2120_v7  ;;  %1322 = vmatpush.bf16.msra.mxu3 %v2376_v8 }
 0x212   :  { %1281 = vmatmul.bf16.vlgmr.msra.gmra.mxu0 %v3390_v11  ;;  %1295 = vmatmul.bf16.vlgmr.msra.gmra.mxu1 %v3392_v12 }
 0x213   :  { %1901 = vmatpush.bf16.msrb.mxu0 %v3002_v9  ;;  %1915 = vmatpush.bf16.msrb.mxu1 %v3010_v10  ;;  %v451_v10 = vperm.slane %v3413_v39, 2 }
 0x214   :  { %1309 = vmatmul.bf16.vlgmr.msra.gmra.mxu2 %v3390_v11  ;;  %1323 = vmatmul.bf16.vlgmr.msra.gmra.mxu3 %v3392_v12  ;;  %v3006_v11 = vld [vmem:[#allocation13 + $0x58] sm:$0xff] }
 0x215   :  { %1929 = vmatpush.bf16.msrb.mxu2 %v3018_v19  ;;  %v3026_v12 = vld [vmem:[#allocation13 + $0xf8] sm:$0xff] }
 0x216   :  { %1943 = vmatpush.bf16.msrb.mxu3 %v3026_v12  ;;  %v3050_v19 = vld [vmem:[#allocation13 + $0x1b8] sm:$0xff] }
 0x217   :  { %1902 = vmatpush.bf16.msrb.mxu0 %v3001_v13  ;;  %1916 = vmatpush.bf16.msrb.mxu1 %v3009_v14  ;;  %v3037_v13 = vld [vmem:[#allocation13 + $0x150] sm:$0xff] }
 0x219   :  { %1930 = vmatpush.bf16.msrb.mxu2 %v3017_v22 }
 0x21a   :  { %1944 = vmatpush.bf16.msrb.mxu3 %v3025_v26  ;;  %v452_v26 = vperm.slane %v3413_v39, 3 }
 0x21b   :  { %1903 = vmatpush.bf16.msrb.mxu0 %v3000_v15  ;;  %1917 = vmatpush.bf16.msrb.mxu1 %v3008_v17 }
 0x21d   :  { %1931 = vmatpush.bf16.msrb.mxu2 %v3016_v24 }
 0x21e   :  { %1945 = vmatpush.bf16.msrb.mxu3 %v3024_v30 }
 0x21f   :  { %1904 = vmatpush.bf16.msrb.mxu0 %v2999_v16  ;;  %1918 = vmatpush.bf16.msrb.mxu1 %v3007_v20 }
 0x221   :  { %1932 = vmatpush.bf16.msrb.mxu2 %v3015_v28 }
 0x222   :  { %1946 = vmatpush.bf16.msrb.mxu3 %v3023_v34 }
 0x223   :  { %1905 = vmatpush.bf16.msrb.mxu0 %v2998_v18  ;;  %1919 = vmatpush.bf16.msrb.mxu1 %v3006_v11  ;;  %v3027_v18 = vld [vmem:[#allocation13 + $0x100] sm:$0xff]  ;;  %v3036_v11 = vld [vmem:[#allocation13 + $0x148] sm:$0xff] }
 0x225   :  { %1933 = vmatpush.bf16.msrb.mxu2 %v3014_v31  ;;  %v3035_v31 = vld [vmem:[#allocation13 + $0x140] sm:$0xff] }
 0x226   :  { %1947 = vmatpush.bf16.msrb.mxu3 %v3022_v37 }
 0x227   :  { %1906 = vmatpush.bf16.msrb.mxu0 %v2997_v21  ;;  %1920 = vmatpush.bf16.msrb.mxu1 %v3005_v25 }
 0x229   :  { %1934 = vmatpush.bf16.msrb.mxu2 %v3013_v35 }
 0x22a   :  { %1948 = vmatpush.bf16.msrb.mxu3 %v3021_v43 }
 0x22b   :  { %1907 = vmatpush.bf16.msrb.mxu0 %v2996_v23  ;;  %1921 = vmatpush.bf16.msrb.mxu1 %v3004_v29  ;;  %v3049_v23 = vld [vmem:[#allocation13 + $0x1b0] sm:$0xff] }
 0x22d   :  { %1935 = vmatpush.bf16.msrb.mxu2 %v3012_v40 }
 0x22e   :  { %1949 = vmatpush.bf16.msrb.mxu3 %v3020_v50 }
 0x22f   :  { %1908 = vmatpush.bf16.msrb.mxu0 %v2995_v27  ;;  %1922 = vmatpush.bf16.msrb.mxu1 %v3003_v33 }
 0x231   :  { %1936 = vmatpush.bf16.msrb.mxu2 %v3011_v47 }
 0x232   :  { %1950 = vmatpush.bf16.msrb.mxu3 %v3019_v57 }
 0x233   :  { %1957 = vmatpush.bf16.msra.mxu0 %v3034_v32  ;;  %1971 = vmatpush.bf16.msra.mxu1 %v3042_v38  ;;  %v3058_v32 = vld [vmem:[#allocation13 + $0x1f8] sm:$0xff] }
 0x235   :  { %1985 = vmatpush.bf16.msra.mxu2 %v3050_v19 }
 0x236   :  { %1999 = vmatpush.bf16.msra.mxu3 %v3058_v32 }
 0x237   :  { %1958 = vmatpush.bf16.msra.mxu0 %v3033_v36  ;;  %1972 = vmatpush.bf16.msra.mxu1 %v3041_v44  ;;  %v3048_v36 = vld [vmem:[#allocation13 + $0x1a8] sm:$0xff] }
 0x239   :  { %1986 = vmatpush.bf16.msra.mxu2 %v3049_v23 }
 0x23b   :  { %1959 = vmatpush.bf16.msra.mxu0 %v3032_v41  ;;  %1973 = vmatpush.bf16.msra.mxu1 %v3040_v51  ;;  %v3057_v41 = vld [vmem:[#allocation13 + $0x1f0] sm:$0xff] }
 0x23c   :  { %2000 = vmatpush.bf16.msra.mxu3 %v3057_v41 }
 0x23d   :  { %1987 = vmatpush.bf16.msra.mxu2 %v3048_v36 }
 0x23f   :  { %1960 = vmatpush.bf16.msra.mxu0 %v3031_v48  ;;  %1974 = vmatpush.bf16.msra.mxu1 %v3039_v58  ;;  %v3055_v58 = vld [vmem:[#allocation13 + $0x1e0] sm:$0xff] }
 0x243   :  { %1961 = vmatpush.bf16.msra.mxu0 %v3030_v52  ;;  %1975 = vmatpush.bf16.msra.mxu1 %v3038_v2  ;;  %v453_v52 = vperm.slane %v3413_v39, 4  ;;  %v454_v2 = vperm.slane %v3413_v39, 5 }
 0x247   :  { %1962 = vmatpush.bf16.msra.mxu0 %v3029_v62  ;;  %1976 = vmatpush.bf16.msra.mxu1 %v3037_v13 }
 0x24b   :  { %1963 = vmatpush.bf16.msra.mxu0 %v3028_v4  ;;  %1977 = vmatpush.bf16.msra.mxu1 %v3036_v11 }
 0x24e   :  { %v1114_v45 = vpop.f32.mrf.mxu0  ;;  %v1128_v46 = vpop.f32.mrf.mxu1 }
 0x24f   :  { %v1115_v49 = vadd.f32 %v1114_v45, %v449_v42  ;;  %1964 = vmatpush.bf16.msra.mxu0 %v3027_v18  ;;  %1978 = vmatpush.bf16.msra.mxu1 %v3035_v31  ;;  %v3052_v18 = vld [vmem:[#allocation13 + $0x1c8] sm:$0xff]  ;;  %v455_v31 = vperm.slane %v3413_v39, 6 }
 0x251   :  { %v1129_v54 = vadd.f32 %v1128_v46, %v1115_v49  ;;  %v3056_v49 = vld [vmem:[#allocation13 + $0x1e8] sm:$0xff] }
 0x252   :  { %2001 = vmatpush.bf16.msra.mxu3 %v3056_v49 }
 0x253   :  { %v1345_v0 = vmul.f32 0.01, %v1129_v54  ;;  %vm1329_vm12 = vcmp.gt.f32.partialorder %v1129_v54, 0.0 }
 0x255   :  { %v1142_v55 = vpop.f32.mrf.mxu2  ;;  %v1156_v56 = vpop.f32.mrf.mxu3  ;;  %v1361_v6 = vsel %vm1329_vm12, %v1129_v54, %v1345_v0 }
 0x256   :  { %v1116_v59 = vpop.f32.mrf.mxu0  ;;  %v1130_v60 = vpop.f32.mrf.mxu1  ;;  %v1143_v63 = vadd.f32 %v1142_v55, %v450_v53  ;;  %2002 = vmatpush.bf16.msra.mxu3 %v3055_v58 }
 0x257   :  { %v1117_v61 = vadd.f32 %v1116_v59, %v449_v42  ;;  %v3047_v42 = vld [vmem:[#allocation13 + $0x1a0] sm:$0xff] }
 0x258   :  { %v1157_v5 = vadd.f32 %v1156_v56, %v1143_v63  ;;  %1988 = vmatpush.bf16.msra.mxu2 %v3047_v42 }
 0x259   :  { %v1131_v1 = vadd.f32 %v1130_v60, %v1117_v61  ;;  %v3045_v61 = vld [vmem:[#allocation13 + $0x190] sm:$0xff] }
 0x25a   :  { %v1346_v20 = vmul.f32 0.01, %v1157_v5  ;;  %vm1330_vm14 = vcmp.gt.f32.partialorder %v1157_v5, 0.0 }
 0x25b   :  { %vm1337_vm13 = vcmp.gt.f32.partialorder %v1131_v1, 0.0  ;;  %v1353_v3 = vmul.f32 0.01, %v1131_v1 }
 0x25c   :  { %v1362_v24 = vsel %vm1330_vm14, %v1157_v5, %v1346_v20 }
 0x25d   :  { %v1369_v7 = vsel %vm1337_vm13, %v1131_v1, %v1353_v3  ;;  %v1144_v8 = vpop.f32.mrf.mxu2  ;;  %v1158_v9 = vpop.f32.mrf.mxu3  ;;  %v3054_v1 = vld [vmem:[#allocation13 + $0x1d8] sm:$0xff] }
 0x25e   :  { %v1377_v14 = vpack.c.bf16 %v1369_v7, %v1361_v6  ;;  %v1145_v15 = vadd.f32 %v1144_v8, %v450_v53  ;;  %v1170_v16 = vpop.f32.mrf.mxu0  ;;  %v1184_v17 = vpop.f32.mrf.mxu1  ;;  %v3046_v53 = vld [vmem:[#allocation13 + $0x198] sm:$0xff]  ;;  %v3044_v6 = vld [vmem:[#allocation13 + $0x188] sm:$0xff]  ;;  %2003 = vmatpush.bf16.msra.mxu3 %v3054_v1 }
 0x25f   :  { %v1171_v22 = vadd.f32 %v1170_v16, %v451_v10  ;;  %1989 = vmatpush.bf16.msra.mxu2 %v3046_v53  ;;  %v3043_v16 = vld [vmem:[#allocation13 + $0x180] sm:$0xff] }
 0x260   :  { %v1159_v21 = vadd.f32 %v1158_v9, %v1145_v15  ;;  %1909 = vmatmul.bf16.vlgmr.msrb.gmra.mxu0 %v1377_v14  ;;  %v3053_v9 = vld [vmem:[#allocation13 + $0x1d0] sm:$0xff] }
 0x261   :  { %v1185_v28 = vadd.f32 %v1184_v17, %v1171_v22 }
 0x262   :  { %vm1338_vm15 = vcmp.gt.f32.partialorder %v1159_v21, 0.0  ;;  %v1354_v12 = vmul.f32 0.01, %v1159_v21  ;;  %2004 = vmatpush.bf16.msra.mxu3 %v3053_v9 }
 0x263   :  { %v1347_v38 = vmul.f32 0.01, %v1185_v28  ;;  %vm1331_vm0 = vcmp.gt.f32.partialorder %v1185_v28, 0.0  ;;  %1990 = vmatpush.bf16.msra.mxu2 %v3045_v61 }
 0x264   :  { %v1370_v25 = vsel %vm1338_vm15, %v1159_v21, %v1354_v12 }
 0x265   :  { %v1378_v27 = vpack.c.bf16 %v1370_v25, %v1362_v24  ;;  %v1198_v29 = vpop.f32.mrf.mxu2  ;;  %v1212_v30 = vpop.f32.mrf.mxu3  ;;  %v1363_v45 = vsel %vm1331_vm0, %v1185_v28, %v1347_v38  ;;  %v3051_v24 = vld [vmem:[#allocation13 + $0x1c0] sm:$0xff] }
 0x266   :  { %v1172_v33 = vpop.f32.mrf.mxu0  ;;  %v1186_v34 = vpop.f32.mrf.mxu1  ;;  %v1199_v37 = vadd.f32 %v1198_v29, %v452_v26  ;;  %2005 = vmatpush.bf16.msra.mxu3 %v3052_v18 }
 0x267   :  { %v1173_v35 = vadd.f32 %v1172_v33, %v451_v10  ;;  %1923 = vmatmul.bf16.vlgmr.msrb.gmra.mxu1 %v1378_v27  ;;  %1991 = vmatpush.bf16.msra.mxu2 %v3044_v6 }
 0x268   :  { %v1213_v44 = vadd.f32 %v1212_v30, %v1199_v37 }
 0x269   :  { %v1187_v40 = vadd.f32 %v1186_v34, %v1173_v35  ;;  %v456_v35 = vperm.slane %v3413_v39, 7 }
 0x26a   :  { %v1348_v54 = vmul.f32 0.01, %v1213_v44  ;;  %vm1332_vm2 = vcmp.gt.f32.partialorder %v1213_v44, 0.0  ;;  %2006 = vmatpush.bf16.msra.mxu3 %v3051_v24 }
 0x26b   :  { %vm1339_vm1 = vcmp.gt.f32.partialorder %v1187_v40, 0.0  ;;  %v1355_v43 = vmul.f32 0.01, %v1187_v40  ;;  %1992 = vmatpush.bf16.msra.mxu2 %v3043_v16 }
 0x26c   :  { %v1364_v62 = vsel %vm1332_vm2, %v1213_v44, %v1348_v54 }
 0x26d   :  { %v1371_v46 = vsel %vm1339_vm1, %v1187_v40, %v1355_v43  ;;  %v1200_v47 = vpop.f32.mrf.mxu2  ;;  %v1214_v48 = vpop.f32.mrf.mxu3 }
 0x26e   :  { %v1379_v50 = vpack.c.bf16 %v1371_v46, %v1363_v45  ;;  %v1201_v51 = vadd.f32 %v1200_v47, %v452_v26 }
 0x26f   :  { %v1226_v56 = vpop.f32.mrf.mxu0  ;;  %v1240_v57 = vpop.f32.mrf.mxu1 }
 0x270   :  { %v1215_v55 = vadd.f32 %v1214_v48, %v1201_v51  ;;  %1937 = vmatmul.bf16.vlgmr.msrb.gmra.mxu2 %v1379_v50  ;;  %v1227_v60 = vadd.f32 %v1226_v56, %v453_v52 }
 0x272   :  { %vm1340_vm3 = vcmp.gt.f32.partialorder %v1215_v55, 0.0  ;;  %v1356_v59 = vmul.f32 0.01, %v1215_v55  ;;  %v1241_v3 = vadd.f32 %v1240_v57, %v1227_v60 }
 0x274   :  { %v1372_v63 = vsel %vm1340_vm3, %v1215_v55, %v1356_v59  ;;  %v1349_v14 = vmul.f32 0.01, %v1241_v3  ;;  %vm1333_vm4 = vcmp.gt.f32.partialorder %v1241_v3, 0.0 }
 0x275   :  { %v1380_v0 = vpack.c.bf16 %v1372_v63, %v1364_v62 }
 0x276   :  { %v1365_v20 = vsel %vm1333_vm4, %v1241_v3, %v1349_v14 }
 0x277   :  { %1951 = vmatmul.bf16.vlgmr.msrb.gmra.mxu3 %v1380_v0  ;;  %v1228_v7 = vpop.f32.mrf.mxu0  ;;  %v1242_v13 = vpop.f32.mrf.mxu1 }
 0x278   :  { %v1254_v4 = vpop.f32.mrf.mxu2  ;;  %v1268_v5 = vpop.f32.mrf.mxu3  ;;  %v1229_v8 = vadd.f32 %v1228_v7, %v453_v52 }
 0x279   :  { %v1255_v10 = vadd.f32 %v1254_v4, %v454_v2 }
 0x27a   :  { %v1243_v15 = vadd.f32 %v1242_v13, %v1229_v8 }
 0x27b   :  { %v1269_v19 = vadd.f32 %v1268_v5, %v1255_v10 }
 0x27c   :  { %vm1341_vm5 = vcmp.gt.f32.partialorder %v1243_v15, 0.0  ;;  %v1357_v17 = vmul.f32 0.01, %v1243_v15 }
 0x27d   :  { %v1350_v25 = vmul.f32 0.01, %v1269_v19  ;;  %vm1334_vm6 = vcmp.gt.f32.partialorder %v1269_v19, 0.0 }
 0x27e   :  { %v1373_v21 = vsel %vm1341_vm5, %v1243_v15, %v1357_v17 }
 0x27f   :  { %v1381_v11 = vpack.c.bf16 %v1373_v21, %v1365_v20  ;;  %v1366_v28 = vsel %vm1334_vm6, %v1269_v19, %v1350_v25 }
 0x280   :  { %v1256_v22 = vpop.f32.mrf.mxu2  ;;  %v1270_v23 = vpop.f32.mrf.mxu3 }
 0x281   :  { %v1257_v12 = vadd.f32 %v1256_v22, %v454_v2  ;;  %1965 = vmatmul.bf16.vlgmr.msra.gmra.mxu0 %v1381_v11  ;;  %v3080_v2 = vld [vmem:[%s3442_s10] ss:$0 sm:$0xff]  ;;  %s3296_s10 = smov [#allocation14]  }
 0x282   :  { %s2027_s16 = sshll.u32 %s3296_s10, 4  ;;  %s2028_s16 = int_to_ptr.vmem [resolvable:$true] %s2027_s16 }
 0x283   :  { %v1271_v26 = vadd.f32 %v1270_v23, %v1257_v12 }
 0x285   :  { %vm1342_vm7 = vcmp.gt.f32.partialorder %v1271_v26, 0.0  ;;  %v1358_v27 = vmul.f32 0.01, %v1271_v26 }
 0x287   :  { %v1374_v29 = vsel %vm1342_vm7, %v1271_v26, %v1358_v27 }
 0x288   :  { %v1382_v30 = vpack.c.bf16 %v1374_v29, %v1366_v28 }
 0x28a   :  { %1979 = vmatmul.bf16.vlgmr.msra.gmra.mxu1 %v1382_v30 }
 0x28f   :  { %v1282_v32 = vpop.f32.mrf.mxu0  ;;  %v1296_v33 = vpop.f32.mrf.mxu1 }
 0x290   :  { %v1283_v34 = vadd.f32 %v1282_v32, %v455_v31 }
 0x292   :  { %v1297_v36 = vadd.f32 %v1296_v33, %v1283_v34 }
 0x294   :  { %v1351_v44 = vmul.f32 0.01, %v1297_v36  ;;  %vm1335_vm8 = vcmp.gt.f32.partialorder %v1297_v36, 0.0 }
 0x296   :  { %v1367_v48 = vsel %vm1335_vm8, %v1297_v36, %v1351_v44 }
 0x297   :  { %v1310_v37 = vpop.f32.mrf.mxu2  ;;  %v1324_v38 = vpop.f32.mrf.mxu3 }
 0x298   :  { %v1284_v40 = vpop.f32.mrf.mxu0  ;;  %v1311_v42 = vadd.f32 %v1310_v37, %v456_v35  ;;  %v1298_v43 = vpop.f32.mrf.mxu1 }
 0x299   :  { %v1285_v41 = vadd.f32 %v1284_v40, %v455_v31 }
 0x29a   :  { %v1325_v47 = vadd.f32 %v1324_v38, %v1311_v42 }
 0x29b   :  { %v1299_v45 = vadd.f32 %v1298_v43, %v1285_v41 }
 0x29c   :  { %v1352_v39 = vmul.f32 0.01, %v1325_v47  ;;  %vm1336_vm10 = vcmp.gt.f32.partialorder %v1325_v47, 0.0 }
 0x29d   :  { %vm1343_vm9 = vcmp.gt.f32.partialorder %v1299_v45, 0.0  ;;  %v1359_v46 = vmul.f32 0.01, %v1299_v45 }
 0x29e   :  { %v1368_v56 = vsel %vm1336_vm10, %v1325_v47, %v1352_v39 }
 0x29f   :  { %v1375_v49 = vsel %vm1343_vm9, %v1299_v45, %v1359_v46  ;;  %v1312_v50 = vpop.f32.mrf.mxu2  ;;  %v1326_v53 = vpop.f32.mrf.mxu3 }
 0x2a0   :  { %v1383_v51 = vpack.c.bf16 %v1375_v49, %v1367_v48  ;;  %v1313_v52 = vadd.f32 %v1312_v50, %v456_v35 }
 0x2a2   :  { %v1327_v54 = vadd.f32 %v1326_v53, %v1313_v52  ;;  %1993 = vmatmul.bf16.vlgmr.msra.gmra.mxu2 %v1383_v51 }
 0x2a4   :  { %vm1344_vm11 = vcmp.gt.f32.partialorder %v1327_v54, 0.0  ;;  %v1360_v55 = vmul.f32 0.01, %v1327_v54 }
 0x2a6   :  { %v1376_v57 = vsel %vm1344_vm11, %v1327_v54, %v1360_v55 }
 0x2a7   :  { %v1384_v58 = vpack.c.bf16 %v1376_v57, %v1368_v56 }
 0x2a9   :  { %2007 = vmatmul.bf16.vlgmr.msra.gmra.mxu3 %v1384_v58 }
 0x2dd   :  { %v1910_v59 = vpop.f32.mrf.mxu0 }
 0x2de   :  { %v1911_v4 = vadd.f32 %v3080_v2, %v1910_v59 }
 0x2e4   :  { %v1924_v60 = vpop.f32.mrf.mxu1 }
 0x2e5   :  { %v1912_v62 = vpop.f32.mrf.mxu0  ;;  %v1925_v7 = vadd.f32 %v1924_v60, %v1911_v4 }
 0x2e6   :  { %v1913_v9 = vadd.f32 %v3080_v2, %v1912_v62 }
 0x2ec   :  { %v1926_v0 = vpop.f32.mrf.mxu1 }
 0x2ed   :  { %v1927_v13 = vadd.f32 %v1926_v0, %v1913_v9 }
 0x2f3   :  { %v1938_v61 = vpop.f32.mrf.mxu2 }
 0x2f4   :  { %v1939_v10 = vadd.f32 %v1938_v61, %v1925_v7 }
 0x2fa   :  { %v1952_v63 = vpop.f32.mrf.mxu3 }
 0x2fb   :  { %v1940_v1 = vpop.f32.mrf.mxu2  ;;  %v1953_v14 = vadd.f32 %v1952_v63, %v1939_v10 }
 0x2fc   :  { %v1941_v15 = vadd.f32 %v1940_v1, %v1927_v13 }
 0x2fe   :  { %v1966_v3 = vpop.f32.mrf.mxu0 }
 0x2ff   :  { %v1967_v16 = vadd.f32 %v1966_v3, %v1953_v14 }
 0x302   :  { %v1954_v5 = vpop.f32.mrf.mxu3 }
 0x303   :  { %v1955_v19 = vadd.f32 %v1954_v5, %v1941_v15 }
 0x306   :  { %v1968_v17 = vpop.f32.mrf.mxu0 }
 0x307   :  { %v1980_v6 = vpop.f32.mrf.mxu1  ;;  %v1969_v22 = vadd.f32 %v1968_v17, %v1955_v19 }
 0x308   :  { %v1981_v20 = vadd.f32 %v1980_v6, %v1967_v16 }
 0x30f   :  { %v1982_v21 = vpop.f32.mrf.mxu1 }
 0x310   :  { %v1983_v23 = vadd.f32 %v1982_v21, %v1969_v22 }
 0x325   :  { %v1994_v8 = vpop.f32.mrf.mxu2 }
 0x326   :  { %v1995_v11 = vadd.f32 %v1994_v8, %v1981_v20 }
 0x32c   :  { %v2008_v18 = vpop.f32.mrf.mxu3 }
 0x32d   :  { %v1996_v12 = vpop.f32.mrf.mxu2  ;;  %v2009_v24 = vadd.f32 %v2008_v18, %v1995_v11 }
 0x32e   :  { %v1997_v25 = vadd.f32 %v1996_v12, %v1983_v23 }
 0x32f   :  { %v2015_v27 = vmul.f32 0.01, %v2009_v24  ;;  %vm2013_vm12 = vcmp.gt.f32.partialorder %v2009_v24, 0.0 }
 0x331   :  { %v2017_v30 = vsel %vm2013_vm12, %v2009_v24, %v2015_v27 }
 0x334   :  { %v2010_v26 = vpop.f32.mrf.mxu3 }
 0x335   :  { %v2011_v28 = vadd.f32 %v2010_v26, %v1997_v25 }
 0x337   :  { %vm2014_vm13 = vcmp.gt.f32.partialorder %v2011_v28, 0.0  ;;  %v2016_v29 = vmul.f32 0.01, %v2011_v28 }
 0x339   :  { %v2018_v31 = vsel %vm2014_vm13, %v2011_v28, %v2016_v29 }
 0x33a   :  { %v3062_v32 = vpack.c.bf16 %v2018_v31, %v2017_v30 }
 0x33c   :  { %3063 = vst [vmem:[#allocation14] sm:$0xff] %v3062_v32  }
 0x33d   :  { %2035 = dma.vmem_to_hbm [thread:$0]  %s2028_s16, 128, %s2030_s19, [#allocation4], %s3294_s12, %s3294_s12, %s3295_s13  }
 0x33e   :  { %3281 = dma.done.wait [#allocation4], 128  }
 0x33f   :  { %3282 = vsyncadd [#allocation4], 4294967168 }
 0x340   :  { %2040 = vsyncpa [#allocation3], 1 }
 0x341   :  { %2041 = vsyncpa [#allocation6], 1 }
 0x342   :  { %2042 = vsyncpa [#allocation9], 1 }
 0x343   :  { %2043 = vsyncpa [#allocation12], 1 }
 0x344   :  { %2044 = vsyncpa [#allocation4], 1 }

// kernel: tpu_custom_call.1
= control target key start
LH: loop header
LB: loop body
LE: loop exit
PB: predicated region body
PF: predicated region fallthrough
CT: control target
= control target key end

     0   :  { %16 = vsyncpa [#allocation3], 0  ;;  %s3432_s0 = inlined_call_operand.vmem [shape: bf16[16,2], index: 0, kind: input, shape index: {}]   ;;  %s3433_s1 = inlined_call_operand.hbm [shape: bf16[2,16], index: 1, kind: input, shape index: {}]   ;;  %s3434_s2 = inlined_call_operand.hbm [shape: f32[1,16], index: 2, kind: input, shape index: {}]   ;;  %s3435_s3 = inlined_call_operand.vmem [shape: bf16[16,64], index: 3, kind: input, shape index: {}]   ;;  %s3436_s4 = inlined_call_operand.hbm [shape: f32[1,64], index: 4, kind: input, shape index: {}]   ;;  %s3437_s5 = inlined_call_operand.hbm [shape: bf16[64,256], index: 5, kind: input, shape index: {}]   ;;  %s3438_s6 = inlined_call_operand.hbm [shape: f32[1,256], index: 6, kind: input, shape index: {}]   ;;  %s3439_s7 = inlined_call_operand.hbm [shape: bf16[256,1024], index: 7, kind: input, shape index: {}]   ;;  %s3440_s8 = inlined_call_operand.vmem [shape: f32[1,1024], index: 8, kind: input, shape index: {}]   ;;  %s3441_s9 = inlined_call_operand.hbm [shape: bf16[1024,128], index: 9, kind: input, shape index: {}]   ;;  %s3442_s10 = inlined_call_operand.vmem [shape: f32[1,128], index: 10, kind: input, shape index: {}]   ;;  %s3443_s11 = inlined_call_operand.hbm [shape: bf16[16,128], index: 11, kind: output, shape index: {}]  }
   0x1   :  { %17 = vsyncpa [#allocation6], 0 }
   0x2   :  { %18 = vsyncpa [#allocation9], 0 }
   0x3   :  { %19 = vsyncpa [#allocation12], 0  ;;  %s39_s19 = sshll.u32 %s3434_s2, 4  ;;  %s40_s19 = int_to_ptr.hbm [resolvable:$true] %s39_s19 }
   0x4   :  { %20 = vsyncpa [#allocation4], 0  ;;  %s3283_s20 = smov [#allocation5]   ;;  %s62_s24 = sshll.u32 %s3437_s5, 4  ;;  %s63_s24 = int_to_ptr.hbm [resolvable:$true] %s62_s24 }
   0x5   :  { %s41_s21 = sshll.u32 %s3283_s20, 4  ;;  %s3284_s25 = smov [#allocation8]   ;;  %s42_s21 = int_to_ptr.vmem [resolvable:$true] %s41_s21 }
   0x6   :  { %44 = dma.hbm_to_vmem [thread:$0]  %s40_s19, 16, %s42_s21, [#allocation6]  }
   0x7   :  { %s64_s26 = sshll.u32 %s3284_s25, 4  ;;  %s3285_s27 = smov 128   ;;  %s65_s26 = int_to_ptr.vmem [resolvable:$true] %s64_s26 }
   0x8   :  { %s3286_s28 = smov 8   ;;  %s86_s2 = sshll.u32 %s3439_s7, 4  ;;  %s87_s2 = int_to_ptr.hbm [resolvable:$true] %s86_s2 }
   0x9   :  { %70 = dma.hbm_to_vmem [thread:$0]  %s63_s24, 1024, %s65_s26, [#allocation9], %s3285_s27, %s3285_s27, %s3286_s28  }
   0xa   :  { %s3287_s12 = smov [#allocation11]   ;;  %s28_s5 = sshll.u32 %s3433_s1, 4  ;;  %s29_s5 = int_to_ptr.hbm [resolvable:$true] %s28_s5 }
   0xb   :  { %s88_s13 = sshll.u32 %s3287_s12, 4  ;;  %s3288_s16 = smov 512   ;;  %s89_s13 = int_to_ptr.vmem [resolvable:$true] %s88_s13 }
   0xc   :  { %s3289_s17 = smov 32   ;;  %s3290_s18 = smov [#allocation2]  }
   0xd   :  { %94 = dma.hbm_to_vmem [thread:$0]  %s87_s2, 16384, %s89_s13, [#allocation12], %s3288_s16, %s3288_s16, %s3289_s17  }
   0xe   :  { %s30_s19 = sshll.u32 %s3290_s18, 4  ;;  %s52_s22 = sshll.u32 %s3436_s4, 4  ;;  %s31_s19 = int_to_ptr.vmem [resolvable:$true] %s30_s19  ;;  %s53_s22 = int_to_ptr.hbm [resolvable:$true] %s52_s22 }
   0xf   :  { %33 = dma.hbm_to_vmem [thread:$0]  %s29_s5, 16, %s31_s19, [#allocation3]  }
  0x10   :  { %s76_s24 = sshll.u32 %s3438_s6, 4  ;;  %s3291_s25 = smov [#allocation7]   ;;  %s77_s24 = int_to_ptr.hbm [resolvable:$true] %s76_s24 }
  0x11   :  { %s54_s26 = sshll.u32 %s3291_s25, 4  ;;  %s3292_s1 = smov [#allocation10]   ;;  %s55_s26 = int_to_ptr.vmem [resolvable:$true] %s54_s26 }
  0x12   :  { %57 = dma.hbm_to_vmem [thread:$0]  %s53_s22, 16, %s55_s26, [#allocation6]  }
  0x13   :  { %s78_s27 = sshll.u32 %s3292_s1, 4  ;;  %s101_s30 = sshll.u32 %s3441_s9, 4  ;;  %s79_s27 = int_to_ptr.vmem [resolvable:$true] %s78_s27  ;;  %s102_s30 = int_to_ptr.hbm [resolvable:$true] %s101_s30 }
  0x14   :  { %81 = dma.hbm_to_vmem [thread:$0]  %s77_s24, 32, %s79_s27, [#allocation9]  }
  0x15   :  { %s3293_s4 = smov [#allocation13]   ;;  %s3294_s12 = smov 64  }
  0x16   :  { %s103_s2 = sshll.u32 %s3293_s4, 4  ;;  %s3295_s13 = smov 4   ;;  %s104_s2 = int_to_ptr.vmem [resolvable:$true] %s103_s2 }
  0x17   :  { %109 = dma.hbm_to_vmem [thread:$0]  %s102_s30, 8192, %s104_s2, [#allocation12], %s3294_s12, %s3294_s12, %s3295_s13  }
  0x18   :  { %3273 = dma.done.wait [#allocation3], 16  }
  0x19   :  { %3274 = vsyncadd [#allocation3], 4294967280 }
  0x1a   :  { %3275 = dma.done.wait [#allocation6], 32  }
  0x1b   :  { %3276 = vsyncadd [#allocation6], 4294967264 }
  0x1c   :  { %3277 = dma.done.wait [#allocation9], 1056  }
  0x1d   :  { %3278 = vsyncadd [#allocation9], 4294966240 }
  0x1e   :  { %3279 = dma.done.wait [#allocation12], 24576  }
  0x1f   :  { %3280 = vsyncadd [#allocation12], 4294942720  ;;  %vm157_vm0 = vcmask 1040384   ;;  %v143_v0 = vld [vmem:[#allocation2] sm:$0x1]  ;;  %v2857_v2 = vld [vmem:[%s3432_s0] sm:$0xff] }
  0x20   :  { %v159_v1 = vsel %vm157_vm0, %v143_v0, 0  ;;  %vm153_vm1 = vcmask 15360   ;;  %v2858_v3 = vld [vmem:[%s3435_s3] sm:$0xff]  ;;  %v3078_v5 = vld [vmem:[#allocation5] ss:$0 sm:$0xff]  ;;  %vm194_vm4 = vcmask 130048  }
  0x21   :  { %168 = vmatpush.bf16.msra.mxu0 %v159_v1  ;;  %205 = vmatpush.bf16.msra.mxu1 %v2858_v3  ;;  %v2081_v14 = vld [vmem:[#allocation8 + $0x30] sm:$0xf]  ;;  %v2866_v15 = vld [vmem:[#allocation8 + $0x34] sm:$0xf0]  ;;  %v2865_v16 = vld [vmem:[#allocation8 + $0x34] sm:$0xf] }
  0x22   :  { %v2082_v17 = vor.u32 %v2866_v15, %v2081_v14  ;;  %v2083_v18 = vld [vmem:[#allocation8 + $0x38] sm:$0xf0]  ;;  %v2073_v20 = vld [vmem:[#allocation8 + $0x20] sm:$0xf]  ;;  %v2864_v21 = vld [vmem:[#allocation8 + $0x24] sm:$0xf0] }
  0x23   :  { %v2086_v19 = vor.u32 %v2865_v16, %v2083_v18  ;;  %v2863_v22 = vld [vmem:[#allocation8 + $0x24] sm:$0xf]  ;;  %v2074_v23 = vor.u32 %v2864_v21, %v2073_v20  ;;  %v2075_v24 = vld [vmem:[#allocation8 + $0x28] sm:$0xf0]  ;;  %v2065_v26 = vld [vmem:[#allocation8 + $0x10] sm:$0xf] }
  0x24   :  { %2049 = vmatmul.msk.bf16.vlgmr.msra.gmra.mxu0 %vm153_vm1, %v2857_v2  ;;  %281 = vmatpush.bf16.msra.mxu2 %v2082_v17  ;;  %v2078_v25 = vor.u32 %v2863_v22, %v2075_v24  ;;  %v2862_v27 = vld [vmem:[#allocation8 + $0x14] sm:$0xf0]  ;;  %v2861_v28 = vld [vmem:[#allocation8 + $0x14] sm:$0xf]  ;;  %v2067_v30 = vld [vmem:[#allocation8 + $0x18] sm:$0xf0] }
  0x25   :  { %295 = vmatpush.bf16.msra.mxu3 %v2086_v19  ;;  %v2066_v29 = vor.u32 %v2862_v27, %v2065_v26  ;;  %v2070_v31 = vor.u32 %v2861_v28, %v2067_v30  ;;  %v2057_v32 = vld [vmem:[#allocation8] sm:$0xf]  ;;  %v2860_v33 = vld [vmem:[#allocation8 + $0x4] sm:$0xf0]  ;;  %v2859_v34 = vld [vmem:[#allocation8 + $0x4] sm:$0xf] }
  0x26   :  { %v2058_v35 = vor.u32 %v2860_v33, %v2057_v32  ;;  %v2059_v36 = vld [vmem:[#allocation8 + $0x8] sm:$0xf0]  ;;  %v2315_v38 = vld [vmem:[#allocation11 + $0x1c0] sm:$0xf]  ;;  %v2923_v43 = vld [vmem:[#allocation11 + $0x1c4] sm:$0xf] }
  0x27   :  { %v2062_v37 = vor.u32 %v2859_v34, %v2059_v36  ;;  %v2927_v39 = vld [vmem:[#allocation11 + $0x1dc] sm:$0xf0]  ;;  %v2317_v44 = vld [vmem:[#allocation11 + $0x1e0] sm:$0xf0]  ;;  %v3079_v30 = vld [vmem:[#allocation7] ss:$0 sm:$0xff] }
  0x28   :  { %282 = vmatpush.bf16.msra.mxu2 %v2074_v23  ;;  %v2571_v40 = vld [vmem:[#allocation11 + $0x3c0] sm:$0xf]  ;;  %v2316_v41 = vor.u32 %v2927_v39, %v2315_v38  ;;  %v2320_v46 = vor.u32 %v2923_v43, %v2317_v44  ;;  %v2987_v47 = vld [vmem:[#allocation11 + $0x3c4] sm:$0xf]  ;;  %vm273_vm7 = vcmask 523264   ;;  %s2029_s19 = sshll.u32 %s3443_s11, 4  ;;  %s2030_s19 = int_to_ptr.hbm [resolvable:$true] %s2029_s19 }
  0x29   :  { %296 = vmatpush.bf16.msra.mxu3 %v2078_v25  ;;  %v2991_v42 = vld [vmem:[#allocation11 + $0x3dc] sm:$0xf0]  ;;  %v2573_v48 = vld [vmem:[#allocation11 + $0x3e0] sm:$0xf0] }
  0x2a   :  { %v2572_v45 = vor.u32 %v2991_v42, %v2571_v40  ;;  %v2283_v49 = vld [vmem:[#allocation11 + $0x180] sm:$0xf]  ;;  %1105 = vmatpush.bf16.msrb.mxu0 %v2316_v41  ;;  %v2576_v50 = vor.u32 %v2987_v47, %v2573_v48  ;;  %v2915_v56 = vld [vmem:[#allocation11 + $0x184] sm:$0xf] }
  0x2b   :  { %v2919_v51 = vld [vmem:[#allocation11 + $0x19c] sm:$0xf0]  ;;  %v2285_v57 = vld [vmem:[#allocation11 + $0x1a0] sm:$0xf0] }
  0x2c   :  { %283 = vmatpush.bf16.msra.mxu2 %v2066_v29  ;;  %v2539_v52 = vld [vmem:[#allocation11 + $0x380] sm:$0xf]  ;;  %1119 = vmatpush.bf16.msrb.mxu1 %v2572_v45  ;;  %v2284_v54 = vor.u32 %v2919_v51, %v2283_v49  ;;  %v2979_v58 = vld [vmem:[#allocation11 + $0x384] sm:$0xf]  ;;  %v2288_v59 = vor.u32 %v2915_v56, %v2285_v57 }
  0x2d   :  { %297 = vmatpush.bf16.msra.mxu3 %v2070_v31  ;;  %v2983_v53 = vld [vmem:[#allocation11 + $0x39c] sm:$0xf0]  ;;  %v2541_v60 = vld [vmem:[#allocation11 + $0x3a0] sm:$0xf0] }
  0x2e   :  { %v2540_v55 = vor.u32 %v2983_v53, %v2539_v52  ;;  %v2251_v61 = vld [vmem:[#allocation11 + $0x140] sm:$0xf]  ;;  %v2544_v63 = vor.u32 %v2979_v58, %v2541_v60  ;;  %v2907_v2 = vld [vmem:[#allocation11 + $0x144] sm:$0xf]  ;;  %1106 = vmatpush.bf16.msrb.mxu0 %v2284_v54 }
  0x2f   :  { %v2911_v62 = vld [vmem:[#allocation11 + $0x15c] sm:$0xf0]  ;;  %v2899_v14 = vld [vmem:[#allocation11 + $0x104] sm:$0xf] }
  0x30   :  { %284 = vmatpush.bf16.msra.mxu2 %v2058_v35  ;;  %v2507_v0 = vld [vmem:[#allocation11 + $0x340] sm:$0xf]  ;;  %v2252_v3 = vor.u32 %v2911_v62, %v2251_v61  ;;  %1120 = vmatpush.bf16.msrb.mxu1 %v2540_v55  ;;  %v2221_v15 = vld [vmem:[#allocation11 + $0x120] sm:$0xf0] }
  0x31   :  { %298 = vmatpush.bf16.msra.mxu3 %v2062_v37  ;;  %v2975_v1 = vld [vmem:[#allocation11 + $0x35c] sm:$0xf0]  ;;  %v2963_v16 = vld [vmem:[#allocation11 + $0x304] sm:$0xf]  ;;  %v2224_v20 = vor.u32 %v2899_v14, %v2221_v15  ;;  %v2924_v14 = vld [vmem:[#allocation11 + $0x1cc] sm:$0xf] }
  0x32   :  { %v2477_v17 = vld [vmem:[#allocation11 + $0x320] sm:$0xf0]  ;;  %1107 = vmatpush.bf16.msrb.mxu0 %v2252_v3  ;;  %v2187_v21 = vld [vmem:[#allocation11 + $0xc0] sm:$0xf]  ;;  %v2325_v15 = vld [vmem:[#allocation11 + $0x1e8] sm:$0xf0] }
  0x33   :  { %v2895_v22 = vld [vmem:[#allocation11 + $0xdc] sm:$0xf0]  ;;  %v2480_v24 = vor.u32 %v2963_v16, %v2477_v17  ;;  %v2891_v26 = vld [vmem:[#allocation11 + $0xc4] sm:$0xf] }
  0x34   :  { %1133 = vmatpush.bf16.msrb.mxu2 %v2320_v46  ;;  %v2443_v23 = vld [vmem:[#allocation11 + $0x2c0] sm:$0xf]  ;;  %v2189_v27 = vld [vmem:[#allocation11 + $0xe0] sm:$0xf0]  ;;  %v2188_v31 = vor.u32 %v2895_v22, %v2187_v21  ;;  %v2581_v21 = vld [vmem:[#allocation11 + $0x3e8] sm:$0xf0] }
  0x35   :  { %1147 = vmatpush.bf16.msrb.mxu3 %v2576_v50  ;;  %v2959_v25 = vld [vmem:[#allocation11 + $0x2dc] sm:$0xf0]  ;;  %v2955_v28 = vld [vmem:[#allocation11 + $0x2c4] sm:$0xf]  ;;  %v2192_v34 = vor.u32 %v2891_v26, %v2189_v27  ;;  %v2328_v26 = vor.u32 %v2924_v14, %v2325_v15  ;;  %v2291_v27 = vld [vmem:[#allocation11 + $0x188] sm:$0xf] }
  0x36   :  { %v2445_v29 = vld [vmem:[#allocation11 + $0x2e0] sm:$0xf0]  ;;  %v2444_v33 = vor.u32 %v2959_v25, %v2443_v23  ;;  %v2155_v35 = vld [vmem:[#allocation11 + $0x80] sm:$0xf]  ;;  %v2419_v14 = vld [vmem:[#allocation11 + $0x288] sm:$0xf] }
  0x37   :  { %v2887_v36 = vld [vmem:[#allocation11 + $0x9c] sm:$0xf0]  ;;  %v2448_v38 = vor.u32 %v2955_v28, %v2445_v29  ;;  %v2883_v40 = vld [vmem:[#allocation11 + $0x84] sm:$0xf]  ;;  %v2920_v28 = vld [vmem:[#allocation11 + $0x1a4] sm:$0xf0] }
  0x38   :  { %1134 = vmatpush.bf16.msrb.mxu2 %v2288_v59  ;;  %v2411_v37 = vld [vmem:[#allocation11 + $0x280] sm:$0xf]  ;;  %v2157_v41 = vld [vmem:[#allocation11 + $0xa0] sm:$0xf0]  ;;  %v2156_v45 = vor.u32 %v2887_v36, %v2155_v35  ;;  %v2547_v29 = vld [vmem:[#allocation11 + $0x388] sm:$0xf]  ;;  %v2292_v36 = vor.u32 %v2920_v28, %v2291_v27 }
  0x39   :  { %1148 = vmatpush.bf16.msrb.mxu3 %v2544_v63  ;;  %v2951_v39 = vld [vmem:[#allocation11 + $0x29c] sm:$0xf0]  ;;  %v2947_v42 = vld [vmem:[#allocation11 + $0x284] sm:$0xf]  ;;  %v2160_v47 = vor.u32 %v2883_v40, %v2157_v41  ;;  %v2549_v35 = vld [vmem:[#allocation11 + $0x3a8] sm:$0xf0] }
  0x3a   :  { %v2413_v43 = vld [vmem:[#allocation11 + $0x2a0] sm:$0xf0]  ;;  %v2412_v46 = vor.u32 %v2951_v39, %v2411_v37  ;;  %v2123_v48 = vld [vmem:[#allocation11 + $0x40] sm:$0xf]  ;;  %v2259_v39 = vld [vmem:[#allocation11 + $0x148] sm:$0xf] }
  0x3b   :  { %v2879_v49 = vld [vmem:[#allocation11 + $0x5c] sm:$0xf0]  ;;  %v2416_v51 = vor.u32 %v2947_v42, %v2413_v43  ;;  %v2875_v53 = vld [vmem:[#allocation11 + $0x44] sm:$0xf]  ;;  %v2912_v40 = vld [vmem:[#allocation11 + $0x164] sm:$0xf0] }
  0x3c   :  { %v2379_v50 = vld [vmem:[#allocation11 + $0x240] sm:$0xf]  ;;  %v2125_v54 = vld [vmem:[#allocation11 + $0x60] sm:$0xf0]  ;;  %v2124_v58 = vor.u32 %v2879_v49, %v2123_v48  ;;  %v2515_v41 = vld [vmem:[#allocation11 + $0x348] sm:$0xf]  ;;  %v2260_v48 = vor.u32 %v2912_v40, %v2259_v39 }
  0x3d   :  { %v2943_v52 = vld [vmem:[#allocation11 + $0x25c] sm:$0xf0]  ;;  %v2939_v55 = vld [vmem:[#allocation11 + $0x244] sm:$0xf]  ;;  %v2128_v62 = vor.u32 %v2875_v53, %v2125_v54  ;;  %v2976_v43 = vld [vmem:[#allocation11 + $0x364] sm:$0xf0] }
  0x3e   :  { %v2381_v56 = vld [vmem:[#allocation11 + $0x260] sm:$0xf0]  ;;  %v2091_v59 = vld [vmem:[#allocation11] sm:$0xf]  ;;  %v2380_v61 = vor.u32 %v2943_v52, %v2379_v50  ;;  %v2516_v49 = vor.u32 %v2976_v43, %v2515_v41  ;;  %v2904_v52 = vld [vmem:[#allocation11 + $0x124] sm:$0xf0] }
  0x3f   :  { %v2871_v63 = vld [vmem:[#allocation11 + $0x1c] sm:$0xf0]  ;;  %v2384_v3 = vor.u32 %v2939_v55, %v2381_v56  ;;  %v2483_v53 = vld [vmem:[#allocation11 + $0x308] sm:$0xf]  ;;  %v2900_v56 = vld [vmem:[#allocation11 + $0x10c] sm:$0xf] }
  0x40   :  { %v2968_v55 = vld [vmem:[#allocation11 + $0x324] sm:$0xf0]  ;;  %v2868_v41 = vld [vmem:[#allocation11 + $0xc] sm:$0xf] }
  0x41   :  { %v2944_v28 = vld [vmem:[#allocation11 + $0x264] sm:$0xf0] }
  0x42   :  { %v2936_v40 = vld [vmem:[#allocation11 + $0x224] sm:$0xf0] }
  0xa1   :  { %v170_v4 = vpop.f32.mrf.mxu0 }
  0xa2   :  { %v171_v6 = vadd.f32 %v3078_v5, %v170_v4  ;;  %v2253_v4 = vld [vmem:[#allocation11 + $0x160] sm:$0xf0] }
  0xa4   :  { %v177_v8 = vmul.f32 0.01, %v171_v6  ;;  %vm175_vm2 = vcmp.gt.f32.partialorder %v171_v6, 0.0 }
  0xa6   :  { %v179_v11 = vsel %vm175_vm2, %v171_v6, %v177_v8  ;;  %v2509_v6 = vld [vmem:[#allocation11 + $0x360] sm:$0xf0]  ;;  %v2256_v8 = vor.u32 %v2907_v2, %v2253_v4 }
  0xa7   :  { %v2867_v4 = vld [vmem:[#allocation11 + $0x4] sm:$0xf] }
  0xa8   :  { %1135 = vmatpush.bf16.msrb.mxu2 %v2256_v8  ;;  %v2323_v8 = vld [vmem:[#allocation11 + $0x1c8] sm:$0xf] }
  0xa9   :  { %v172_v7 = vpop.f32.mrf.mxu0 }
  0xaa   :  { %v173_v9 = vadd.f32 %v3078_v5, %v172_v7  ;;  %v2971_v5 = vld [vmem:[#allocation11 + $0x344] sm:$0xf]  ;;  %v2508_v7 = vor.u32 %v2975_v1, %v2507_v0  ;;  %v2347_v0 = vld [vmem:[#allocation11 + $0x200] sm:$0xf] }
  0xab   :  { %v2935_v1 = vld [vmem:[#allocation11 + $0x21c] sm:$0xf0] }
  0xac   :  { %vm176_vm3 = vcmp.gt.f32.partialorder %v173_v9, 0.0  ;;  %v178_v10 = vmul.f32 0.01, %v173_v9  ;;  %1121 = vmatpush.bf16.msrb.mxu1 %v2508_v7  ;;  %1136 = vmatpush.bf16.msrb.mxu2 %v2224_v20  ;;  %v2349_v7 = vld [vmem:[#allocation11 + $0x220] sm:$0xf0] }
  0xad   :  { %v2988_v20 = vld [vmem:[#allocation11 + $0x3cc] sm:$0xf] }
  0xae   :  { %v180_v12 = vsel %vm176_vm3, %v173_v9, %v178_v10  ;;  %v2219_v9 = vld [vmem:[#allocation11 + $0x100] sm:$0xf] }
  0xaf   :  { %v181_v13 = vpack.c.bf16 %v180_v12, %v179_v11  ;;  %v2903_v10 = vld [vmem:[#allocation11 + $0x11c] sm:$0xf0]  ;;  %v2512_v12 = vor.u32 %v2971_v5, %v2509_v6  ;;  %v2093_v5 = vld [vmem:[#allocation11 + $0x20] sm:$0xf0] }
  0xb0   :  { %v2475_v11 = vld [vmem:[#allocation11 + $0x300] sm:$0xf]  ;;  %v2220_v18 = vor.u32 %v2903_v10, %v2219_v9  ;;  %1137 = vmatpush.bf16.msrb.mxu2 %v2192_v34  ;;  %v2931_v6 = vld [vmem:[#allocation11 + $0x204] sm:$0xf]  ;;  %v2928_v9 = vld [vmem:[#allocation11 + $0x1e4] sm:$0xf0] }
  0xb1   :  { %2054 = vmatmul.msk.bf16.vlgmr.msra.gmra.mxu1 %vm194_vm4, %v181_v13  ;;  %v2967_v13 = vld [vmem:[#allocation11 + $0x31c] sm:$0xf0]  ;;  %1149 = vmatpush.bf16.msrb.mxu3 %v2512_v12  ;;  %v2579_v12 = vld [vmem:[#allocation11 + $0x3c8] sm:$0xf]  ;;  %v2352_v23 = vor.u32 %v2931_v6, %v2349_v7  ;;  %v2980_v34 = vld [vmem:[#allocation11 + $0x38c] sm:$0xf] }
  0xb2   :  { %v2476_v19 = vor.u32 %v2967_v13, %v2475_v11  ;;  %1108 = vmatpush.bf16.msrb.mxu0 %v2220_v18  ;;  %v2092_v11 = vor.u32 %v2871_v63, %v2091_v59  ;;  %v2992_v13 = vld [vmem:[#allocation11 + $0x3e4] sm:$0xf0]  ;;  %v2348_v18 = vor.u32 %v2935_v1, %v2347_v0  ;;  %v2552_v42 = vor.u32 %v2980_v34, %v2549_v35  ;;  %v2485_v59 = vld [vmem:[#allocation11 + $0x328] sm:$0xf0] }
  0xb3   :  { %v2580_v25 = vor.u32 %v2992_v13, %v2579_v12  ;;  %v2195_v0 = vld [vmem:[#allocation11 + $0xc8] sm:$0xf]  ;;  %v2197_v6 = vld [vmem:[#allocation11 + $0xe8] sm:$0xf0] }
  0xb4   :  { %1122 = vmatpush.bf16.msrb.mxu1 %v2476_v19  ;;  %1138 = vmatpush.bf16.msrb.mxu2 %v2160_v47  ;;  %v2096_v19 = vor.u32 %v2867_v4, %v2093_v5  ;;  %v2517_v47 = vld [vmem:[#allocation11 + $0x368] sm:$0xf0]  ;;  %v2896_v1 = vld [vmem:[#allocation11 + $0xe4] sm:$0xf0] }
  0xb5   :  { %1150 = vmatpush.bf16.msrb.mxu3 %v2480_v24  ;;  %v2324_v24 = vor.u32 %v2928_v9, %v2323_v8  ;;  %v2960_v4 = vld [vmem:[#allocation11 + $0x2e4] sm:$0xf0]  ;;  %v2892_v5 = vld [vmem:[#allocation11 + $0xcc] sm:$0xf] }
  0xb6   :  { %1109 = vmatpush.bf16.msrb.mxu0 %v2188_v31  ;;  %v2984_v31 = vld [vmem:[#allocation11 + $0x3a4] sm:$0xf0]  ;;  %v2200_v8 = vor.u32 %v2892_v5, %v2197_v6  ;;  %v2956_v9 = vld [vmem:[#allocation11 + $0x2cc] sm:$0xf]  ;;  %v2989_v5 = vld [vmem:[#allocation11 + $0x3d4] sm:$0xf] }
  0xb7   :  { %v2548_v37 = vor.u32 %v2984_v31, %v2547_v29  ;;  %v2163_v12 = vld [vmem:[#allocation11 + $0x88] sm:$0xf]  ;;  %v2876_v29 = vld [vmem:[#allocation11 + $0x4c] sm:$0xf]  ;;  %v2589_v6 = vld [vmem:[#allocation11 + $0x3f0] sm:$0xf0] }
  0xb8   :  { %1123 = vmatpush.bf16.msrb.mxu1 %v2444_v33  ;;  %1139 = vmatpush.bf16.msrb.mxu2 %v2128_v62  ;;  %v2293_v33 = vld [vmem:[#allocation11 + $0x1a8] sm:$0xf0]  ;;  %v2888_v13 = vld [vmem:[#allocation11 + $0xa4] sm:$0xf0] }
  0xb9   :  { %1151 = vmatpush.bf16.msrb.mxu3 %v2448_v38  ;;  %v2164_v15 = vor.u32 %v2888_v13, %v2163_v12  ;;  %v2389_v34 = vld [vmem:[#allocation11 + $0x268] sm:$0xf0] }
  0xba   :  { %1110 = vmatpush.bf16.msrb.mxu0 %v2156_v45  ;;  %v2261_v45 = vld [vmem:[#allocation11 + $0x168] sm:$0xf0] }
  0xbc   :  { %1124 = vmatpush.bf16.msrb.mxu1 %v2412_v46  ;;  %1140 = vmatpush.bf16.msrb.mxu2 %v2096_v19  ;;  %v2972_v46 = vld [vmem:[#allocation11 + $0x34c] sm:$0xf] }
  0xbd   :  { %1152 = vmatpush.bf16.msrb.mxu3 %v2416_v51  ;;  %v2227_v51 = vld [vmem:[#allocation11 + $0x108] sm:$0xf]  ;;  %v2520_v54 = vor.u32 %v2972_v46, %v2517_v47  ;;  %v2357_v46 = vld [vmem:[#allocation11 + $0x228] sm:$0xf0] }
  0xbe   :  { %1111 = vmatpush.bf16.msrb.mxu0 %v2124_v58  ;;  %v2964_v58 = vld [vmem:[#allocation11 + $0x30c] sm:$0xf] }
  0xbf   :  { %v2488_v63 = vor.u32 %v2964_v58, %v2485_v59 }
  0xc0   :  { %1125 = vmatpush.bf16.msrb.mxu1 %v2380_v61  ;;  %v2484_v61 = vor.u32 %v2968_v55, %v2483_v53 }
  0xc1   :  { %1153 = vmatpush.bf16.msrb.mxu3 %v2384_v3  ;;  %v2196_v3 = vor.u32 %v2896_v1, %v2195_v0  ;;  %v2993_v0 = vld [vmem:[#allocation11 + $0x3ec] sm:$0xf0]  ;;  %v2925_v1 = vld [vmem:[#allocation11 + $0x1d4] sm:$0xf] }
  0xc2   :  { %1112 = vmatpush.bf16.msrb.mxu0 %v2092_v11 }
  0xc4   :  { %1126 = vmatpush.bf16.msrb.mxu1 %v2348_v18  ;;  %v2165_v18 = vld [vmem:[#allocation11 + $0xa8] sm:$0xf0] }
  0xc5   :  { %1154 = vmatpush.bf16.msrb.mxu3 %v2352_v23 }
  0xc6   :  { %1161 = vmatpush.bf16.msra.mxu0 %v2324_v24  ;;  %v2131_v24 = vld [vmem:[#allocation11 + $0x48] sm:$0xf] }
  0xc8   :  { %1175 = vmatpush.bf16.msra.mxu1 %v2580_v25  ;;  %v2880_v25 = vld [vmem:[#allocation11 + $0x64] sm:$0xf0] }
  0xc9   :  { %v2132_v27 = vor.u32 %v2880_v25, %v2131_v24  ;;  %v2557_v24 = vld [vmem:[#allocation11 + $0x3b0] sm:$0xf0] }
  0xca   :  { %1162 = vmatpush.bf16.msra.mxu0 %v2292_v36  ;;  %v2099_v36 = vld [vmem:[#allocation11 + $0x8] sm:$0xf] }
  0xcc   :  { %1176 = vmatpush.bf16.msra.mxu1 %v2548_v37  ;;  %v2872_v37 = vld [vmem:[#allocation11 + $0x24] sm:$0xf0] }
  0xcd   :  { %v2100_v39 = vor.u32 %v2872_v37, %v2099_v36  ;;  %v2525_v36 = vld [vmem:[#allocation11 + $0x370] sm:$0xf0] }
  0xce   :  { %1163 = vmatpush.bf16.msra.mxu0 %v2260_v48  ;;  %v227_v48 = vld [vmem:[#allocation10] sm:$0x3] }
  0xd0   :  { %1177 = vmatpush.bf16.msra.mxu1 %v2516_v49 }
  0xd4   :  { %1178 = vmatpush.bf16.msra.mxu1 %v2484_v61  ;;  %v2331_v61 = vld [vmem:[#allocation11 + $0x1d0] sm:$0xf] }
 0x12e   :  { %v207_v32 = vpop.f32.mrf.mxu1 }
 0x12f   :  { %v208_v44 = vadd.f32 %v3079_v30, %v207_v32  ;;  %v2916_v32 = vld [vmem:[#allocation11 + $0x18c] sm:$0xf] }
 0x130   :  { %v2296_v38 = vor.u32 %v2916_v32, %v2293_v33  ;;  %v2940_v33 = vld [vmem:[#allocation11 + $0x24c] sm:$0xf] }
 0x131   :  { %vm212_vm5 = vcmp.gt.f32.partialorder %v208_v44, 0.0  ;;  %v214_v57 = vmul.f32 0.01, %v208_v44  ;;  %v2392_v35 = vor.u32 %v2940_v33, %v2389_v34  ;;  %v2909_v33 = vld [vmem:[#allocation11 + $0x154] sm:$0xf] }
 0x132   :  { %v2269_v34 = vld [vmem:[#allocation11 + $0x170] sm:$0xf0] }
 0x133   :  { %v216_v16 = vsel %vm212_vm5, %v208_v44, %v214_v57  ;;  %v2908_v44 = vld [vmem:[#allocation11 + $0x14c] sm:$0xf] }
 0x134   :  { %v2264_v50 = vor.u32 %v2908_v44, %v2261_v45  ;;  %v2229_v57 = vld [vmem:[#allocation11 + $0x128] sm:$0xf0] }
 0x135   :  { %v2232_v62 = vor.u32 %v2900_v56, %v2229_v57  ;;  %v2932_v45 = vld [vmem:[#allocation11 + $0x20c] sm:$0xf] }
 0x136   :  { %v209_v60 = vpop.f32.mrf.mxu1  ;;  %v2360_v47 = vor.u32 %v2932_v45, %v2357_v46  ;;  %v2901_v45 = vld [vmem:[#allocation11 + $0x114] sm:$0xf] }
 0x137   :  { %v210_v2 = vadd.f32 %v3079_v30, %v209_v60  ;;  %v2584_v30 = vor.u32 %v2988_v20, %v2581_v21  ;;  %v2228_v60 = vor.u32 %v2904_v52, %v2227_v51  ;;  %v2948_v21 = vld [vmem:[#allocation11 + $0x28c] sm:$0xf]  ;;  %v229_v51 = vperm.slane %v227_v48, 0  ;;  %v2237_v46 = vld [vmem:[#allocation11 + $0x130] sm:$0xf0] }
 0x138   :  { %v230_v52 = vperm.slane %v227_v48, 1  ;;  %v2493_v48 = vld [vmem:[#allocation11 + $0x330] sm:$0xf0] }
 0x139   :  { %vm213_vm6 = vcmp.gt.f32.partialorder %v210_v2, 0.0  ;;  %v215_v10 = vmul.f32 0.01, %v210_v2  ;;  %1164 = vmatpush.bf16.msra.mxu0 %v2228_v60 }
 0x13b   :  { %v217_v17 = vsel %vm213_vm6, %v210_v2, %v215_v10  ;;  %v2451_v2 = vld [vmem:[#allocation11 + $0x2c8] sm:$0xf]  ;;  %v2453_v10 = vld [vmem:[#allocation11 + $0x2e8] sm:$0xf0] }
 0x13c   :  { %v218_v22 = vpack.c.bf16 %v217_v17, %v216_v16  ;;  %v2452_v7 = vor.u32 %v2960_v4, %v2451_v2  ;;  %v2456_v11 = vor.u32 %v2956_v9, %v2453_v10  ;;  %v2952_v16 = vld [vmem:[#allocation11 + $0x2a4] sm:$0xf0]  ;;  %v2884_v17 = vld [vmem:[#allocation11 + $0x8c] sm:$0xf]  ;;  %v2333_v4 = vld [vmem:[#allocation11 + $0x1f0] sm:$0xf0] }
 0x13d   :  { %1165 = vmatpush.bf16.msra.mxu0 %v2196_v3  ;;  %v2420_v19 = vor.u32 %v2952_v16, %v2419_v14  ;;  %v2168_v20 = vor.u32 %v2884_v17, %v2165_v18  ;;  %v2921_v16 = vld [vmem:[#allocation11 + $0x1ac] sm:$0xf0]  ;;  %v2336_v17 = vor.u32 %v2925_v1, %v2333_v4  ;;  %v2592_v18 = vor.u32 %v2989_v5, %v2589_v6  ;;  %v2885_v5 = vld [vmem:[#allocation11 + $0x94] sm:$0xf] }
 0x13e   :  { %2087 = vmatmul.msk.bf16.vlgmr.msra.gmra.mxu2 %vm273_vm7, %v218_v22  ;;  %2088 = vmatmul.msk.bf16.vlgmr.msra.gmra.mxu3 %vm273_vm7, %v218_v22  ;;  %v2421_v22 = vld [vmem:[#allocation11 + $0x2a8] sm:$0xf0]  ;;  %v2953_v4 = vld [vmem:[#allocation11 + $0x2ac] sm:$0xf0]  ;;  %v2173_v6 = vld [vmem:[#allocation11 + $0xb0] sm:$0xf0] }
 0x13f   :  { %1189 = vmatpush.bf16.msra.mxu2 %v2328_v26  ;;  %1203 = vmatpush.bf16.msra.mxu3 %v2584_v30  ;;  %v2424_v23 = vor.u32 %v2948_v21, %v2421_v22  ;;  %v2387_v26 = vld [vmem:[#allocation11 + $0x248] sm:$0xf]  ;;  %v2133_v30 = vld [vmem:[#allocation11 + $0x68] sm:$0xf0]  ;;  %v2917_v21 = vld [vmem:[#allocation11 + $0x194] sm:$0xf] }
 0x140   :  { %1179 = vmatpush.bf16.msra.mxu1 %v2452_v7  ;;  %v2388_v31 = vor.u32 %v2944_v28, %v2387_v26  ;;  %v2136_v32 = vor.u32 %v2876_v29, %v2133_v30  ;;  %v2301_v22 = vld [vmem:[#allocation11 + $0x1b0] sm:$0xf0]  ;;  %v2913_v28 = vld [vmem:[#allocation11 + $0x16c] sm:$0xf0] }
 0x141   :  { %1166 = vmatpush.bf16.msra.mxu0 %v2164_v15  ;;  %v2299_v15 = vld [vmem:[#allocation11 + $0x190] sm:$0xf]  ;;  %v2304_v29 = vor.u32 %v2917_v21, %v2301_v22  ;;  %v2941_v21 = vld [vmem:[#allocation11 + $0x254] sm:$0xf] }
 0x142   :  { %v2300_v25 = vor.u32 %v2921_v16, %v2299_v15  ;;  %v2176_v15 = vor.u32 %v2885_v5, %v2173_v6  ;;  %v2397_v22 = vld [vmem:[#allocation11 + $0x270] sm:$0xf0]  ;;  %v2974_v5 = vld [vmem:[#allocation11 + $0x35c] sm:$0xf] }
 0x143   :  { %1190 = vmatpush.bf16.msra.mxu2 %v2296_v38  ;;  %1204 = vmatpush.bf16.msra.mxu3 %v2552_v42  ;;  %v2355_v38 = vld [vmem:[#allocation11 + $0x208] sm:$0xf]  ;;  %v2101_v42 = vld [vmem:[#allocation11 + $0x28] sm:$0xf0]  ;;  %v2533_v6 = vld [vmem:[#allocation11 + $0x378] sm:$0xf0] }
 0x144   :  { %1180 = vmatpush.bf16.msra.mxu1 %v2420_v19  ;;  %v2356_v43 = vor.u32 %v2936_v40, %v2355_v38  ;;  %v2104_v44 = vor.u32 %v2868_v41, %v2101_v42  ;;  %v2555_v19 = vld [vmem:[#allocation11 + $0x390] sm:$0xf]  ;;  %v2272_v41 = vor.u32 %v2909_v33, %v2269_v34  ;;  %v2933_v33 = vld [vmem:[#allocation11 + $0x214] sm:$0xf] }
 0x145   :  { %1167 = vmatpush.bf16.msra.mxu0 %v2132_v27  ;;  %v2267_v27 = vld [vmem:[#allocation11 + $0x150] sm:$0xf]  ;;  %v2365_v34 = vld [vmem:[#allocation11 + $0x230] sm:$0xf0] }
 0x146   :  { %v2268_v37 = vor.u32 %v2913_v28, %v2267_v27  ;;  %v2905_v40 = vld [vmem:[#allocation11 + $0x12c] sm:$0xf0] }
 0x147   :  { %1191 = vmatpush.bf16.msra.mxu2 %v2264_v50  ;;  %1205 = vmatpush.bf16.msra.mxu3 %v2520_v54  ;;  %v2363_v27 = vld [vmem:[#allocation11 + $0x210] sm:$0xf] }
 0x148   :  { %1181 = vmatpush.bf16.msra.mxu1 %v2388_v31  ;;  %v2523_v31 = vld [vmem:[#allocation11 + $0x350] sm:$0xf] }
 0x149   :  { %1168 = vmatpush.bf16.msra.mxu0 %v2100_v39  ;;  %v2235_v39 = vld [vmem:[#allocation11 + $0x110] sm:$0xf] }
 0x14a   :  { %v2937_v28 = vld [vmem:[#allocation11 + $0x22c] sm:$0xf0] }
 0x14b   :  { %1192 = vmatpush.bf16.msra.mxu2 %v2232_v62  ;;  %1206 = vmatpush.bf16.msra.mxu3 %v2488_v63  ;;  %v2929_v62 = vld [vmem:[#allocation11 + $0x1ec] sm:$0xf0] }
 0x14c   :  { %1182 = vmatpush.bf16.msra.mxu1 %v2356_v43  ;;  %v2587_v63 = vld [vmem:[#allocation11 + $0x3d0] sm:$0xf]  ;;  %v2332_v13 = vor.u32 %v2929_v62, %v2331_v61 }
 0x14d   :  { %v2588_v14 = vor.u32 %v2993_v0, %v2587_v63  ;;  %v2491_v43 = vld [vmem:[#allocation11 + $0x310] sm:$0xf] }
 0x14e   :  { %v2171_v63 = vld [vmem:[#allocation11 + $0x90] sm:$0xf] }
 0x14f   :  { %1193 = vmatpush.bf16.msra.mxu2 %v2200_v8  ;;  %1207 = vmatpush.bf16.msra.mxu3 %v2456_v11  ;;  %v2889_v0 = vld [vmem:[#allocation11 + $0xac] sm:$0xf0] }
 0x153   :  { %1194 = vmatpush.bf16.msra.mxu2 %v2168_v20  ;;  %1208 = vmatpush.bf16.msra.mxu3 %v2424_v23  ;;  %v2985_v20 = vld [vmem:[#allocation11 + $0x3ac] sm:$0xf0]  ;;  %v2981_v23 = vld [vmem:[#allocation11 + $0x394] sm:$0xf] }
 0x154   :  { %v2556_v26 = vor.u32 %v2985_v20, %v2555_v19  ;;  %v2560_v30 = vor.u32 %v2981_v23, %v2557_v24  ;;  %v2877_v19 = vld [vmem:[#allocation11 + $0x54] sm:$0xf]  ;;  %v2107_v23 = vld [vmem:[#allocation11 + $0x10] sm:$0xf] }
 0x155   :  { %v2141_v20 = vld [vmem:[#allocation11 + $0x70] sm:$0xf0] }
 0x157   :  { %1195 = vmatpush.bf16.msra.mxu2 %v2136_v32  ;;  %1209 = vmatpush.bf16.msra.mxu3 %v2392_v35  ;;  %v2977_v32 = vld [vmem:[#allocation11 + $0x36c] sm:$0xf0]  ;;  %v2973_v35 = vld [vmem:[#allocation11 + $0x354] sm:$0xf] }
 0x158   :  { %v2524_v38 = vor.u32 %v2977_v32, %v2523_v31  ;;  %v2528_v42 = vor.u32 %v2973_v35, %v2525_v36  ;;  %v2869_v31 = vld [vmem:[#allocation11 + $0x14] sm:$0xf]  ;;  %v2339_v35 = vld [vmem:[#allocation11 + $0x1d8] sm:$0xf] }
 0x159   :  { %v2109_v32 = vld [vmem:[#allocation11 + $0x30] sm:$0xf0]  ;;  %v2930_v36 = vld [vmem:[#allocation11 + $0x1f4] sm:$0xf0] }
 0x15b   :  { %1196 = vmatpush.bf16.msra.mxu2 %v2104_v44  ;;  %1210 = vmatpush.bf16.msra.mxu3 %v2360_v47  ;;  %v2969_v44 = vld [vmem:[#allocation11 + $0x32c] sm:$0xf0]  ;;  %v2965_v47 = vld [vmem:[#allocation11 + $0x314] sm:$0xf] }
 0x1c1   :  { %v286_v49 = vpop.f32.mrf.mxu2  ;;  %v300_v50 = vpop.f32.mrf.mxu3 }
 0x1c2   :  { %v287_v53 = vadd.f32 %v286_v49, %v229_v51  ;;  %v301_v54 = vadd.f32 %v300_v50, %v230_v52  ;;  %v2236_v49 = vor.u32 %v2905_v40, %v2235_v39  ;;  %v2492_v50 = vor.u32 %v2969_v44, %v2491_v43  ;;  %v2926_v39 = vld [vmem:[#allocation11 + $0x1dc] sm:$0xf] }
 0x1c3   :  { %v2990_v43 = vld [vmem:[#allocation11 + $0x3dc] sm:$0xf] }
 0x1c4   :  { %v309_v57 = vmul.f32 0.01, %v287_v53  ;;  %v310_v58 = vmul.f32 0.01, %v301_v54  ;;  %vm305_vm8 = vcmp.gt.f32.partialorder %v287_v53, 0.0  ;;  %vm306_vm9 = vcmp.gt.f32.partialorder %v301_v54, 0.0 }
 0x1c5   :  { %v2597_v44 = vld [vmem:[#allocation11 + $0x3f8] sm:$0xf0] }
 0x1c6   :  { %v313_v7 = vsel %vm305_vm8, %v287_v53, %v309_v57  ;;  %v314_v8 = vsel %vm306_vm9, %v301_v54, %v310_v58  ;;  %v2240_v53 = vor.u32 %v2901_v45, %v2237_v46  ;;  %v2496_v54 = vor.u32 %v2965_v47, %v2493_v48  ;;  %v2893_v57 = vld [vmem:[#allocation11 + $0xd4] sm:$0xf] }
 0x1c7   :  { %v2205_v58 = vld [vmem:[#allocation11 + $0xf0] sm:$0xf0]  ;;  %v2112_v45 = vor.u32 %v2869_v31, %v2109_v32  ;;  %v2368_v46 = vor.u32 %v2933_v33, %v2365_v34  ;;  %v2340_v47 = vor.u32 %v2930_v36, %v2339_v35  ;;  %v2958_v31 = vld [vmem:[#allocation11 + $0x2dc] sm:$0xf]  ;;  %v2179_v35 = vld [vmem:[#allocation11 + $0x98] sm:$0xf] }
 0x1c8   :  { %v2208_v1 = vor.u32 %v2893_v57, %v2205_v58  ;;  %v2982_v57 = vld [vmem:[#allocation11 + $0x39c] sm:$0xf]  ;;  %v2890_v36 = vld [vmem:[#allocation11 + $0xb4] sm:$0xf0] }
 0x1c9   :  { %v288_v55 = vpop.f32.mrf.mxu2  ;;  %v302_v56 = vpop.f32.mrf.mxu3  ;;  %v2565_v58 = vld [vmem:[#allocation11 + $0x3b8] sm:$0xf0] }
 0x1ca   :  { %v289_v59 = vadd.f32 %v288_v55, %v229_v51  ;;  %v303_v60 = vadd.f32 %v302_v56, %v230_v52  ;;  %v2203_v51 = vld [vmem:[#allocation11 + $0xd0] sm:$0xf]  ;;  %v2469_v32 = vld [vmem:[#allocation11 + $0x2f8] sm:$0xf0] }
 0x1cb   :  { %v2897_v52 = vld [vmem:[#allocation11 + $0xec] sm:$0xf0] }
 0x1cc   :  { %vm307_vm10 = vcmp.gt.f32.partialorder %v289_v59, 0.0  ;;  %v311_v2 = vmul.f32 0.01, %v289_v59  ;;  %vm308_vm11 = vcmp.gt.f32.partialorder %v303_v60, 0.0  ;;  %v312_v3 = vmul.f32 0.01, %v303_v60 }
 0x1cd   :  { %v2459_v55 = vld [vmem:[#allocation11 + $0x2d0] sm:$0xf]  ;;  %v2204_v61 = vor.u32 %v2897_v52, %v2203_v51  ;;  %v2600_v52 = vor.u32 %v2990_v43, %v2597_v44  ;;  %v2950_v43 = vld [vmem:[#allocation11 + $0x29c] sm:$0xf] }
 0x1ce   :  { %v315_v9 = vsel %vm307_vm10, %v289_v59, %v311_v2  ;;  %v316_v10 = vsel %vm308_vm11, %v303_v60, %v312_v3  ;;  %v2961_v56 = vld [vmem:[#allocation11 + $0x2ec] sm:$0xf0]  ;;  %v2957_v59 = vld [vmem:[#allocation11 + $0x2d4] sm:$0xf]  ;;  %v2437_v44 = vld [vmem:[#allocation11 + $0x2b8] sm:$0xf0] }
 0x1cf   :  { %v3390_v11 = vpack.c.bf16 %v315_v9, %v313_v7  ;;  %v3392_v12 = vpack.c.bf16 %v316_v10, %v314_v8  ;;  %v2461_v60 = vld [vmem:[#allocation11 + $0x2f0] sm:$0xf0]  ;;  %v2460_v62 = vor.u32 %v2961_v56, %v2459_v55  ;;  %v2427_v3 = vld [vmem:[#allocation11 + $0x290] sm:$0xf]  ;;  %v2172_v9 = vor.u32 %v2889_v0, %v2171_v63  ;;  %v2918_v55 = vld [vmem:[#allocation11 + $0x19c] sm:$0xf] }
 0x1d0   :  { %v2464_v2 = vor.u32 %v2957_v59, %v2461_v60  ;;  %v2949_v7 = vld [vmem:[#allocation11 + $0x294] sm:$0xf]  ;;  %v2428_v10 = vor.u32 %v2953_v4, %v2427_v3  ;;  %v2309_v56 = vld [vmem:[#allocation11 + $0x1b8] sm:$0xf0]  ;;  %v2568_v0 = vor.u32 %v2982_v57, %v2565_v58 }
 0x1d1   :  { %1113 = vmatmul.bf16.vlgmr.msrb.gmra.mxu0 %v3390_v11  ;;  %1127 = vmatmul.bf16.vlgmr.msrb.gmra.mxu1 %v3392_v12  ;;  %v2429_v8 = vld [vmem:[#allocation11 + $0x2b0] sm:$0xf0]  ;;  %v2312_v63 = vor.u32 %v2918_v55, %v2309_v56  ;;  %v2910_v3 = vld [vmem:[#allocation11 + $0x15c] sm:$0xf] }
 0x1d2   :  { %1141 = vmatmul.bf16.vlgmr.msrb.gmra.mxu2 %v3390_v11  ;;  %1155 = vmatmul.bf16.vlgmr.msrb.gmra.mxu3 %v3392_v12  ;;  %v2432_v16 = vor.u32 %v2949_v7, %v2429_v8  ;;  %v2277_v4 = vld [vmem:[#allocation11 + $0x178] sm:$0xf0] }
 0x1d3   :  { %1217 = vmatpush.bf16.msrb.mxu0 %v2332_v13  ;;  %1231 = vmatpush.bf16.msrb.mxu1 %v2588_v14  ;;  %v2139_v13 = vld [vmem:[#allocation11 + $0x50] sm:$0xf]  ;;  %v2942_v55 = vld [vmem:[#allocation11 + $0x25c] sm:$0xf] }
 0x1d4   :  { %1245 = vmatpush.bf16.msrb.mxu2 %v2336_v17  ;;  %1259 = vmatpush.bf16.msrb.mxu3 %v2592_v18  ;;  %v2881_v14 = vld [vmem:[#allocation11 + $0x6c] sm:$0xf0]  ;;  %v2405_v56 = vld [vmem:[#allocation11 + $0x278] sm:$0xf0] }
 0x1d5   :  { %v2395_v17 = vld [vmem:[#allocation11 + $0x250] sm:$0xf]  ;;  %v2140_v24 = vor.u32 %v2881_v14, %v2139_v13  ;;  %v2280_v13 = vor.u32 %v2910_v3, %v2277_v4  ;;  %v2536_v14 = vor.u32 %v2974_v5, %v2533_v6  ;;  %v2934_v3 = vld [vmem:[#allocation11 + $0x21c] sm:$0xf] }
 0x1d6   :  { %v2945_v18 = vld [vmem:[#allocation11 + $0x26c] sm:$0xf0]  ;;  %v2373_v4 = vld [vmem:[#allocation11 + $0x238] sm:$0xf0] }
 0x1d7   :  { %1218 = vmatpush.bf16.msrb.mxu0 %v2300_v25  ;;  %1232 = vmatpush.bf16.msrb.mxu1 %v2556_v26  ;;  %v2396_v25 = vor.u32 %v2945_v18, %v2395_v17  ;;  %v2873_v26 = vld [vmem:[#allocation11 + $0x2c] sm:$0xf0]  ;;  %v2902_v17 = vld [vmem:[#allocation11 + $0x11c] sm:$0xf] }
 0x1d8   :  { %1246 = vmatpush.bf16.msrb.mxu2 %v2304_v29  ;;  %1260 = vmatpush.bf16.msrb.mxu3 %v2560_v30  ;;  %v2144_v29 = vor.u32 %v2877_v19, %v2141_v20  ;;  %v2400_v30 = vor.u32 %v2941_v21, %v2397_v22  ;;  %v2108_v40 = vor.u32 %v2873_v26, %v2107_v23  ;;  %v2245_v18 = vld [vmem:[#allocation11 + $0x138] sm:$0xf0]  ;;  %v2211_v23 = vld [vmem:[#allocation11 + $0xd8] sm:$0xf] }
 0x1d9   :  { %v2966_v19 = vld [vmem:[#allocation11 + $0x31c] sm:$0xf] }
 0x1da   :  { %v2501_v20 = vld [vmem:[#allocation11 + $0x338] sm:$0xf0] }
 0x1db   :  { %1219 = vmatpush.bf16.msrb.mxu0 %v2268_v37  ;;  %1233 = vmatpush.bf16.msrb.mxu1 %v2524_v38  ;;  %v2595_v37 = vld [vmem:[#allocation11 + $0x3d8] sm:$0xf]  ;;  %v2504_v26 = vor.u32 %v2966_v19, %v2501_v20  ;;  %v3007_v20 = vld [vmem:[#allocation13 + $0x60] sm:$0xff] }
 0x1dc   :  { %1247 = vmatpush.bf16.msrb.mxu2 %v2272_v41  ;;  %1261 = vmatpush.bf16.msrb.mxu3 %v2528_v42  ;;  %v2994_v38 = vld [vmem:[#allocation11 + $0x3f4] sm:$0xf0]  ;;  %v2364_v41 = vor.u32 %v2937_v28, %v2363_v27  ;;  %v2341_v42 = vld [vmem:[#allocation11 + $0x1f8] sm:$0xf0] }
 0x1dd   :  { %v2596_v48 = vor.u32 %v2994_v38, %v2595_v37  ;;  %v2344_v51 = vor.u32 %v2926_v39, %v2341_v42  ;;  %v2467_v27 = vld [vmem:[#allocation11 + $0x2d8] sm:$0xf]  ;;  %v2472_v38 = vor.u32 %v2958_v31, %v2469_v32  ;;  %v2181_v42 = vld [vmem:[#allocation11 + $0xb8] sm:$0xf0] }
 0x1de   :  { %v2962_v28 = vld [vmem:[#allocation11 + $0x2f4] sm:$0xf0] }
 0x1df   :  { %1220 = vmatpush.bf16.msrb.mxu0 %v2236_v49  ;;  %1234 = vmatpush.bf16.msrb.mxu1 %v2492_v50  ;;  %v2307_v49 = vld [vmem:[#allocation11 + $0x198] sm:$0xf]  ;;  %v2468_v34 = vor.u32 %v2962_v28, %v2467_v27  ;;  %v2995_v27 = vld [vmem:[#allocation13] sm:$0xff] }
 0x1e0   :  { %1248 = vmatpush.bf16.msrb.mxu2 %v2240_v53  ;;  %1262 = vmatpush.bf16.msrb.mxu3 %v2496_v54  ;;  %v2922_v50 = vld [vmem:[#allocation11 + $0x1b4] sm:$0xf0]  ;;  %v3015_v28 = vld [vmem:[#allocation13 + $0xa0] sm:$0xff] }
 0x1e1   :  { %1169 = vmatmul.bf16.vlgmr.msra.gmra.mxu0 %v3390_v11  ;;  %1183 = vmatmul.bf16.vlgmr.msra.gmra.mxu1 %v3392_v12  ;;  %v2563_v53 = vld [vmem:[#allocation11 + $0x398] sm:$0xf]  ;;  %v2308_v59 = vor.u32 %v2922_v50, %v2307_v49  ;;  %v2440_v50 = vor.u32 %v2950_v43, %v2437_v44  ;;  %v3021_v43 = vld [vmem:[#allocation13 + $0xd0] sm:$0xff] }
 0x1e2   :  { %1197 = vmatmul.bf16.vlgmr.msra.gmra.mxu2 %v3390_v11  ;;  %1211 = vmatmul.bf16.vlgmr.msra.gmra.mxu3 %v3392_v12  ;;  %v2986_v54 = vld [vmem:[#allocation11 + $0x3b4] sm:$0xf0]  ;;  %v3041_v44 = vld [vmem:[#allocation13 + $0x170] sm:$0xff] }
 0x1e3   :  { %1221 = vmatpush.bf16.msrb.mxu0 %v2204_v61  ;;  %1235 = vmatpush.bf16.msrb.mxu1 %v2460_v62  ;;  %v2564_v60 = vor.u32 %v2986_v54, %v2563_v53  ;;  %v2275_v61 = vld [vmem:[#allocation11 + $0x158] sm:$0xf]  ;;  %v2878_v53 = vld [vmem:[#allocation11 + $0x5c] sm:$0xf] }
 0x1e4   :  { %1249 = vmatpush.bf16.msrb.mxu2 %v2208_v1  ;;  %1263 = vmatpush.bf16.msrb.mxu3 %v2464_v2  ;;  %v2914_v62 = vld [vmem:[#allocation11 + $0x174] sm:$0xf0]  ;;  %v2149_v54 = vld [vmem:[#allocation11 + $0x78] sm:$0xf0] }
 0x1e5   :  { %v2531_v1 = vld [vmem:[#allocation11 + $0x358] sm:$0xf]  ;;  %v2276_v7 = vor.u32 %v2914_v62, %v2275_v61  ;;  %v2152_v61 = vor.u32 %v2878_v53, %v2149_v54  ;;  %v2408_v62 = vor.u32 %v2942_v55, %v2405_v56 }
 0x1e6   :  { %v2978_v2 = vld [vmem:[#allocation11 + $0x374] sm:$0xf0] }
 0x1e7   :  { %1222 = vmatpush.bf16.msrb.mxu0 %v2172_v9  ;;  %1236 = vmatpush.bf16.msrb.mxu1 %v2428_v10  ;;  %v2532_v8 = vor.u32 %v2978_v2, %v2531_v1  ;;  %v2243_v9 = vld [vmem:[#allocation11 + $0x118] sm:$0xf]  ;;  %v2870_v1 = vld [vmem:[#allocation11 + $0x1c] sm:$0xf] }
 0x1e8   :  { %1250 = vmatpush.bf16.msrb.mxu2 %v2176_v15  ;;  %1264 = vmatpush.bf16.msrb.mxu3 %v2432_v16  ;;  %v2906_v10 = vld [vmem:[#allocation11 + $0x134] sm:$0xf0]  ;;  %v2117_v2 = vld [vmem:[#allocation11 + $0x38] sm:$0xf0] }
 0x1e9   :  { %v2499_v15 = vld [vmem:[#allocation11 + $0x318] sm:$0xf]  ;;  %v2244_v21 = vor.u32 %v2906_v10, %v2243_v9 }
 0x1ea   :  { %v2970_v16 = vld [vmem:[#allocation11 + $0x334] sm:$0xf0] }
 0x1eb   :  { %1223 = vmatpush.bf16.msrb.mxu0 %v2140_v24  ;;  %1237 = vmatpush.bf16.msrb.mxu1 %v2396_v25  ;;  %v2500_v22 = vor.u32 %v2970_v16, %v2499_v15  ;;  %v2898_v24 = vld [vmem:[#allocation11 + $0xf4] sm:$0xf0]  ;;  %v2248_v25 = vor.u32 %v2902_v17, %v2245_v18  ;;  %v3000_v15 = vld [vmem:[#allocation13 + $0x28] sm:$0xff]  ;;  %v2999_v16 = vld [vmem:[#allocation13 + $0x20] sm:$0xff] }
 0x1ec   :  { %1251 = vmatpush.bf16.msrb.mxu2 %v2144_v29  ;;  %1265 = vmatpush.bf16.msrb.mxu3 %v2400_v30  ;;  %v2894_v29 = vld [vmem:[#allocation11 + $0xdc] sm:$0xf]  ;;  %v2212_v33 = vor.u32 %v2898_v24, %v2211_v23  ;;  %v2435_v39 = vld [vmem:[#allocation11 + $0x298] sm:$0xf]  ;;  %v3008_v17 = vld [vmem:[#allocation13 + $0x68] sm:$0xff] }
 0x1ed   :  { %v2213_v30 = vld [vmem:[#allocation11 + $0xf8] sm:$0xf0]  ;;  %v2996_v23 = vld [vmem:[#allocation13 + $0x8] sm:$0xff] }
 0x1ee   :  { %v2216_v37 = vor.u32 %v2894_v29, %v2213_v30  ;;  %v3002_v9 = vld [vmem:[#allocation13 + $0x38] sm:$0xff]  ;;  %v3016_v24 = vld [vmem:[#allocation13 + $0xa8] sm:$0xff] }
 0x1ef   :  { %1224 = vmatpush.bf16.msrb.mxu0 %v2108_v40  ;;  %1238 = vmatpush.bf16.msrb.mxu1 %v2364_v41  ;;  %v2954_v40 = vld [vmem:[#allocation11 + $0x2b4] sm:$0xf0]  ;;  %v2886_v41 = vld [vmem:[#allocation11 + $0x9c] sm:$0xf]  ;;  %v3004_v29 = vld [vmem:[#allocation13 + $0x48] sm:$0xff] }
 0x1f0   :  { %1252 = vmatpush.bf16.msrb.mxu2 %v2112_v45  ;;  %1266 = vmatpush.bf16.msrb.mxu3 %v2368_v46  ;;  %v2180_v45 = vor.u32 %v2890_v36, %v2179_v35  ;;  %v2436_v46 = vor.u32 %v2954_v40, %v2435_v39  ;;  %v2184_v49 = vor.u32 %v2886_v41, %v2181_v42  ;;  %v3010_v10 = vld [vmem:[#allocation13 + $0x78] sm:$0xff]  ;;  %v3024_v30 = vld [vmem:[#allocation13 + $0xe8] sm:$0xff]  ;;  %v3013_v35 = vld [vmem:[#allocation13 + $0x90] sm:$0xff] }
 0x1f1   :  { %v2998_v18 = vld [vmem:[#allocation13 + $0x18] sm:$0xff]  ;;  %v3033_v36 = vld [vmem:[#allocation13 + $0x130] sm:$0xff]  ;;  %v3413_v39 = vld [vmem:[%s3440_s8] sm:$0xff] }
 0x1f2   :  { %1225 = vmatmul.bf16.vlgmr.msrb.gmra.mxu0 %v3390_v11  ;;  %1239 = vmatmul.bf16.vlgmr.msrb.gmra.mxu1 %v3392_v12  ;;  %v3018_v19 = vld [vmem:[#allocation13 + $0xb8] sm:$0xff]  ;;  %v3012_v40 = vld [vmem:[#allocation13 + $0x88] sm:$0xff]  ;;  %v449_v42 = vperm.slane %v3413_v39, 0  ;;  %v450_v53 = vperm.slane %v3413_v39, 1 }
 0x1f3   :  { %1273 = vmatpush.bf16.msra.mxu0 %v2340_v47  ;;  %1287 = vmatpush.bf16.msra.mxu1 %v2596_v48  ;;  %v2147_v47 = vld [vmem:[#allocation11 + $0x58] sm:$0xf]  ;;  %v3032_v41 = vld [vmem:[#allocation13 + $0x128] sm:$0xff] }
 0x1f4   :  { %1301 = vmatpush.bf16.msra.mxu2 %v2344_v51  ;;  %1315 = vmatpush.bf16.msra.mxu3 %v2600_v52  ;;  %v2882_v48 = vld [vmem:[#allocation11 + $0x74] sm:$0xf0] }
 0x1f5   :  { %1253 = vmatmul.bf16.vlgmr.msrb.gmra.mxu2 %v3390_v11  ;;  %1267 = vmatmul.bf16.vlgmr.msrb.gmra.mxu3 %v3392_v12  ;;  %v2403_v51 = vld [vmem:[#allocation11 + $0x258] sm:$0xf]  ;;  %v2148_v57 = vor.u32 %v2882_v48, %v2147_v47  ;;  %v3011_v47 = vld [vmem:[#allocation13 + $0x80] sm:$0xff] }
 0x1f6   :  { %v2946_v52 = vld [vmem:[#allocation11 + $0x274] sm:$0xf0]  ;;  %v3031_v48 = vld [vmem:[#allocation13 + $0x120] sm:$0xff] }
 0x1f7   :  { %1274 = vmatpush.bf16.msra.mxu0 %v2308_v59  ;;  %1288 = vmatpush.bf16.msra.mxu1 %v2564_v60  ;;  %v2404_v58 = vor.u32 %v2946_v52, %v2403_v51  ;;  %v2115_v59 = vld [vmem:[#allocation11 + $0x18] sm:$0xf]  ;;  %v3040_v51 = vld [vmem:[#allocation13 + $0x168] sm:$0xff] }
 0x1f8   :  { %1302 = vmatpush.bf16.msra.mxu2 %v2312_v63  ;;  %1316 = vmatpush.bf16.msra.mxu3 %v2568_v0  ;;  %v2874_v60 = vld [vmem:[#allocation11 + $0x34] sm:$0xf0] }
 0x1f9   :  { %v2371_v63 = vld [vmem:[#allocation11 + $0x218] sm:$0xf]  ;;  %v2116_v5 = vor.u32 %v2874_v60, %v2115_v59 }
 0x1fa   :  { %v2938_v0 = vld [vmem:[#allocation11 + $0x234] sm:$0xf0] }
 0x1fb   :  { %1275 = vmatpush.bf16.msra.mxu0 %v2276_v7  ;;  %1289 = vmatpush.bf16.msra.mxu1 %v2532_v8  ;;  %v2372_v6 = vor.u32 %v2938_v0, %v2371_v63  ;;  %v2120_v7 = vor.u32 %v2870_v1, %v2117_v2  ;;  %v2376_v8 = vor.u32 %v2934_v3, %v2373_v4  ;;  %v3014_v31 = vld [vmem:[#allocation13 + $0x98] sm:$0xff]  ;;  %v3028_v4 = vld [vmem:[#allocation13 + $0x108] sm:$0xff] }
 0x1fc   :  { %1303 = vmatpush.bf16.msra.mxu2 %v2280_v13  ;;  %1317 = vmatpush.bf16.msra.mxu3 %v2536_v14  ;;  %v3001_v13 = vld [vmem:[#allocation13 + $0x30] sm:$0xff]  ;;  %v3034_v32 = vld [vmem:[#allocation13 + $0x138] sm:$0xff] }
 0x1fd   :  { %v3009_v14 = vld [vmem:[#allocation13 + $0x70] sm:$0xff]  ;;  %v3030_v52 = vld [vmem:[#allocation13 + $0x118] sm:$0xff] }
 0x1fe   :  { %v3038_v2 = vld [vmem:[#allocation13 + $0x158] sm:$0xff] }
 0x1ff   :  { %1276 = vmatpush.bf16.msra.mxu0 %v2244_v21  ;;  %1290 = vmatpush.bf16.msra.mxu1 %v2500_v22  ;;  %v2997_v21 = vld [vmem:[#allocation13 + $0x10] sm:$0xff] }
 0x200   :  { %1304 = vmatpush.bf16.msra.mxu2 %v2248_v25  ;;  %1318 = vmatpush.bf16.msra.mxu3 %v2504_v26  ;;  %v3017_v22 = vld [vmem:[#allocation13 + $0xb0] sm:$0xff] }
 0x201   :  { %v3005_v25 = vld [vmem:[#allocation13 + $0x50] sm:$0xff] }
 0x202   :  { %v3025_v26 = vld [vmem:[#allocation13 + $0xf0] sm:$0xff] }
 0x203   :  { %1277 = vmatpush.bf16.msra.mxu0 %v2212_v33  ;;  %1291 = vmatpush.bf16.msra.mxu1 %v2468_v34  ;;  %v3003_v33 = vld [vmem:[#allocation13 + $0x40] sm:$0xff] }
 0x204   :  { %1305 = vmatpush.bf16.msra.mxu2 %v2216_v37  ;;  %1319 = vmatpush.bf16.msra.mxu3 %v2472_v38  ;;  %v3023_v34 = vld [vmem:[#allocation13 + $0xe0] sm:$0xff]  ;;  %v3022_v37 = vld [vmem:[#allocation13 + $0xd8] sm:$0xff] }
 0x205   :  { %v3042_v38 = vld [vmem:[#allocation13 + $0x178] sm:$0xff] }
 0x207   :  { %1278 = vmatpush.bf16.msra.mxu0 %v2180_v45  ;;  %1292 = vmatpush.bf16.msra.mxu1 %v2436_v46 }
 0x208   :  { %1306 = vmatpush.bf16.msra.mxu2 %v2184_v49  ;;  %1320 = vmatpush.bf16.msra.mxu3 %v2440_v50  ;;  %v3020_v50 = vld [vmem:[#allocation13 + $0xc8] sm:$0xff] }
 0x20b   :  { %1279 = vmatpush.bf16.msra.mxu0 %v2148_v57  ;;  %1293 = vmatpush.bf16.msra.mxu1 %v2404_v58  ;;  %v3019_v57 = vld [vmem:[#allocation13 + $0xc0] sm:$0xff] }
 0x20c   :  { %1307 = vmatpush.bf16.msra.mxu2 %v2152_v61  ;;  %1321 = vmatpush.bf16.msra.mxu3 %v2408_v62  ;;  %v3039_v58 = vld [vmem:[#allocation13 + $0x160] sm:$0xff]  ;;  %v3029_v62 = vld [vmem:[#allocation13 + $0x110] sm:$0xff] }
 0x20f   :  { %1280 = vmatpush.bf16.msra.mxu0 %v2116_v5  ;;  %1294 = vmatpush.bf16.msra.mxu1 %v2372_v6 }
 0x210   :  { %1308 = vmatpush.bf16.msra.mxu2 %v2120_v7  ;;  %1322 = vmatpush.bf16.msra.mxu3 %v2376_v8 }
 0x212   :  { %1281 = vmatmul.bf16.vlgmr.msra.gmra.mxu0 %v3390_v11  ;;  %1295 = vmatmul.bf16.vlgmr.msra.gmra.mxu1 %v3392_v12 }
 0x213   :  { %1901 = vmatpush.bf16.msrb.mxu0 %v3002_v9  ;;  %1915 = vmatpush.bf16.msrb.mxu1 %v3010_v10  ;;  %v451_v10 = vperm.slane %v3413_v39, 2 }
 0x214   :  { %1309 = vmatmul.bf16.vlgmr.msra.gmra.mxu2 %v3390_v11  ;;  %1323 = vmatmul.bf16.vlgmr.msra.gmra.mxu3 %v3392_v12  ;;  %v3006_v11 = vld [vmem:[#allocation13 + $0x58] sm:$0xff] }
 0x215   :  { %1929 = vmatpush.bf16.msrb.mxu2 %v3018_v19  ;;  %v3026_v12 = vld [vmem:[#allocation13 + $0xf8] sm:$0xff] }
 0x216   :  { %1943 = vmatpush.bf16.msrb.mxu3 %v3026_v12  ;;  %v3050_v19 = vld [vmem:[#allocation13 + $0x1b8] sm:$0xff] }
 0x217   :  { %1902 = vmatpush.bf16.msrb.mxu0 %v3001_v13  ;;  %1916 = vmatpush.bf16.msrb.mxu1 %v3009_v14  ;;  %v3037_v13 = vld [vmem:[#allocation13 + $0x150] sm:$0xff] }
 0x219   :  { %1930 = vmatpush.bf16.msrb.mxu2 %v3017_v22 }
 0x21a   :  { %1944 = vmatpush.bf16.msrb.mxu3 %v3025_v26  ;;  %v452_v26 = vperm.slane %v3413_v39, 3 }
 0x21b   :  { %1903 = vmatpush.bf16.msrb.mxu0 %v3000_v15  ;;  %1917 = vmatpush.bf16.msrb.mxu1 %v3008_v17 }
 0x21d   :  { %1931 = vmatpush.bf16.msrb.mxu2 %v3016_v24 }
 0x21e   :  { %1945 = vmatpush.bf16.msrb.mxu3 %v3024_v30 }
 0x21f   :  { %1904 = vmatpush.bf16.msrb.mxu0 %v2999_v16  ;;  %1918 = vmatpush.bf16.msrb.mxu1 %v3007_v20 }
 0x221   :  { %1932 = vmatpush.bf16.msrb.mxu2 %v3015_v28 }
 0x222   :  { %1946 = vmatpush.bf16.msrb.mxu3 %v3023_v34 }
 0x223   :  { %1905 = vmatpush.bf16.msrb.mxu0 %v2998_v18  ;;  %1919 = vmatpush.bf16.msrb.mxu1 %v3006_v11  ;;  %v3027_v18 = vld [vmem:[#allocation13 + $0x100] sm:$0xff]  ;;  %v3036_v11 = vld [vmem:[#allocation13 + $0x148] sm:$0xff] }
 0x225   :  { %1933 = vmatpush.bf16.msrb.mxu2 %v3014_v31  ;;  %v3035_v31 = vld [vmem:[#allocation13 + $0x140] sm:$0xff] }
 0x226   :  { %1947 = vmatpush.bf16.msrb.mxu3 %v3022_v37 }
 0x227   :  { %1906 = vmatpush.bf16.msrb.mxu0 %v2997_v21  ;;  %1920 = vmatpush.bf16.msrb.mxu1 %v3005_v25 }
 0x229   :  { %1934 = vmatpush.bf16.msrb.mxu2 %v3013_v35 }
 0x22a   :  { %1948 = vmatpush.bf16.msrb.mxu3 %v3021_v43 }
 0x22b   :  { %1907 = vmatpush.bf16.msrb.mxu0 %v2996_v23  ;;  %1921 = vmatpush.bf16.msrb.mxu1 %v3004_v29  ;;  %v3049_v23 = vld [vmem:[#allocation13 + $0x1b0] sm:$0xff] }
 0x22d   :  { %1935 = vmatpush.bf16.msrb.mxu2 %v3012_v40 }
 0x22e   :  { %1949 = vmatpush.bf16.msrb.mxu3 %v3020_v50 }
 0x22f   :  { %1908 = vmatpush.bf16.msrb.mxu0 %v2995_v27  ;;  %1922 = vmatpush.bf16.msrb.mxu1 %v3003_v33 }
 0x231   :  { %1936 = vmatpush.bf16.msrb.mxu2 %v3011_v47 }
 0x232   :  { %1950 = vmatpush.bf16.msrb.mxu3 %v3019_v57 }
 0x233   :  { %1957 = vmatpush.bf16.msra.mxu0 %v3034_v32  ;;  %1971 = vmatpush.bf16.msra.mxu1 %v3042_v38  ;;  %v3058_v32 = vld [vmem:[#allocation13 + $0x1f8] sm:$0xff] }
 0x235   :  { %1985 = vmatpush.bf16.msra.mxu2 %v3050_v19 }
 0x236   :  { %1999 = vmatpush.bf16.msra.mxu3 %v3058_v32 }
 0x237   :  { %1958 = vmatpush.bf16.msra.mxu0 %v3033_v36  ;;  %1972 = vmatpush.bf16.msra.mxu1 %v3041_v44  ;;  %v3048_v36 = vld [vmem:[#allocation13 + $0x1a8] sm:$0xff] }
 0x239   :  { %1986 = vmatpush.bf16.msra.mxu2 %v3049_v23 }
 0x23b   :  { %1959 = vmatpush.bf16.msra.mxu0 %v3032_v41  ;;  %1973 = vmatpush.bf16.msra.mxu1 %v3040_v51  ;;  %v3057_v41 = vld [vmem:[#allocation13 + $0x1f0] sm:$0xff] }
 0x23c   :  { %2000 = vmatpush.bf16.msra.mxu3 %v3057_v41 }
 0x23d   :  { %1987 = vmatpush.bf16.msra.mxu2 %v3048_v36 }
 0x23f   :  { %1960 = vmatpush.bf16.msra.mxu0 %v3031_v48  ;;  %1974 = vmatpush.bf16.msra.mxu1 %v3039_v58  ;;  %v3055_v58 = vld [vmem:[#allocation13 + $0x1e0] sm:$0xff] }
 0x243   :  { %1961 = vmatpush.bf16.msra.mxu0 %v3030_v52  ;;  %1975 = vmatpush.bf16.msra.mxu1 %v3038_v2  ;;  %v453_v52 = vperm.slane %v3413_v39, 4  ;;  %v454_v2 = vperm.slane %v3413_v39, 5 }
 0x247   :  { %1962 = vmatpush.bf16.msra.mxu0 %v3029_v62  ;;  %1976 = vmatpush.bf16.msra.mxu1 %v3037_v13 }
 0x24b   :  { %1963 = vmatpush.bf16.msra.mxu0 %v3028_v4  ;;  %1977 = vmatpush.bf16.msra.mxu1 %v3036_v11 }
 0x24e   :  { %v1114_v45 = vpop.f32.mrf.mxu0  ;;  %v1128_v46 = vpop.f32.mrf.mxu1 }
 0x24f   :  { %v1115_v49 = vadd.f32 %v1114_v45, %v449_v42  ;;  %1964 = vmatpush.bf16.msra.mxu0 %v3027_v18  ;;  %1978 = vmatpush.bf16.msra.mxu1 %v3035_v31  ;;  %v3052_v18 = vld [vmem:[#allocation13 + $0x1c8] sm:$0xff]  ;;  %v455_v31 = vperm.slane %v3413_v39, 6 }
 0x251   :  { %v1129_v54 = vadd.f32 %v1128_v46, %v1115_v49  ;;  %v3056_v49 = vld [vmem:[#allocation13 + $0x1e8] sm:$0xff] }
 0x252   :  { %2001 = vmatpush.bf16.msra.mxu3 %v3056_v49 }
 0x253   :  { %v1345_v0 = vmul.f32 0.01, %v1129_v54  ;;  %vm1329_vm12 = vcmp.gt.f32.partialorder %v1129_v54, 0.0 }
 0x255   :  { %v1142_v55 = vpop.f32.mrf.mxu2  ;;  %v1156_v56 = vpop.f32.mrf.mxu3  ;;  %v1361_v6 = vsel %vm1329_vm12, %v1129_v54, %v1345_v0 }
 0x256   :  { %v1116_v59 = vpop.f32.mrf.mxu0  ;;  %v1130_v60 = vpop.f32.mrf.mxu1  ;;  %v1143_v63 = vadd.f32 %v1142_v55, %v450_v53  ;;  %2002 = vmatpush.bf16.msra.mxu3 %v3055_v58 }
 0x257   :  { %v1117_v61 = vadd.f32 %v1116_v59, %v449_v42  ;;  %v3047_v42 = vld [vmem:[#allocation13 + $0x1a0] sm:$0xff] }
 0x258   :  { %v1157_v5 = vadd.f32 %v1156_v56, %v1143_v63  ;;  %1988 = vmatpush.bf16.msra.mxu2 %v3047_v42 }
 0x259   :  { %v1131_v1 = vadd.f32 %v1130_v60, %v1117_v61  ;;  %v3045_v61 = vld [vmem:[#allocation13 + $0x190] sm:$0xff] }
 0x25a   :  { %v1346_v20 = vmul.f32 0.01, %v1157_v5  ;;  %vm1330_vm14 = vcmp.gt.f32.partialorder %v1157_v5, 0.0 }
 0x25b   :  { %vm1337_vm13 = vcmp.gt.f32.partialorder %v1131_v1, 0.0  ;;  %v1353_v3 = vmul.f32 0.01, %v1131_v1 }
 0x25c   :  { %v1362_v24 = vsel %vm1330_vm14, %v1157_v5, %v1346_v20 }
 0x25d   :  { %v1369_v7 = vsel %vm1337_vm13, %v1131_v1, %v1353_v3  ;;  %v1144_v8 = vpop.f32.mrf.mxu2  ;;  %v1158_v9 = vpop.f32.mrf.mxu3  ;;  %v3054_v1 = vld [vmem:[#allocation13 + $0x1d8] sm:$0xff] }
 0x25e   :  { %v1377_v14 = vpack.c.bf16 %v1369_v7, %v1361_v6  ;;  %v1145_v15 = vadd.f32 %v1144_v8, %v450_v53  ;;  %v1170_v16 = vpop.f32.mrf.mxu0  ;;  %v1184_v17 = vpop.f32.mrf.mxu1  ;;  %v3046_v53 = vld [vmem:[#allocation13 + $0x198] sm:$0xff]  ;;  %v3044_v6 = vld [vmem:[#allocation13 + $0x188] sm:$0xff]  ;;  %2003 = vmatpush.bf16.msra.mxu3 %v3054_v1 }
 0x25f   :  { %v1171_v22 = vadd.f32 %v1170_v16, %v451_v10  ;;  %1989 = vmatpush.bf16.msra.mxu2 %v3046_v53  ;;  %v3043_v16 = vld [vmem:[#allocation13 + $0x180] sm:$0xff] }
 0x260   :  { %v1159_v21 = vadd.f32 %v1158_v9, %v1145_v15  ;;  %1909 = vmatmul.bf16.vlgmr.msrb.gmra.mxu0 %v1377_v14  ;;  %v3053_v9 = vld [vmem:[#allocation13 + $0x1d0] sm:$0xff] }
 0x261   :  { %v1185_v28 = vadd.f32 %v1184_v17, %v1171_v22 }
 0x262   :  { %vm1338_vm15 = vcmp.gt.f32.partialorder %v1159_v21, 0.0  ;;  %v1354_v12 = vmul.f32 0.01, %v1159_v21  ;;  %2004 = vmatpush.bf16.msra.mxu3 %v3053_v9 }
 0x263   :  { %v1347_v38 = vmul.f32 0.01, %v1185_v28  ;;  %vm1331_vm0 = vcmp.gt.f32.partialorder %v1185_v28, 0.0  ;;  %1990 = vmatpush.bf16.msra.mxu2 %v3045_v61 }
 0x264   :  { %v1370_v25 = vsel %vm1338_vm15, %v1159_v21, %v1354_v12 }
 0x265   :  { %v1378_v27 = vpack.c.bf16 %v1370_v25, %v1362_v24  ;;  %v1198_v29 = vpop.f32.mrf.mxu2  ;;  %v1212_v30 = vpop.f32.mrf.mxu3  ;;  %v1363_v45 = vsel %vm1331_vm0, %v1185_v28, %v1347_v38  ;;  %v3051_v24 = vld [vmem:[#allocation13 + $0x1c0] sm:$0xff] }
 0x266   :  { %v1172_v33 = vpop.f32.mrf.mxu0  ;;  %v1186_v34 = vpop.f32.mrf.mxu1  ;;  %v1199_v37 = vadd.f32 %v1198_v29, %v452_v26  ;;  %2005 = vmatpush.bf16.msra.mxu3 %v3052_v18 }
 0x267   :  { %v1173_v35 = vadd.f32 %v1172_v33, %v451_v10  ;;  %1923 = vmatmul.bf16.vlgmr.msrb.gmra.mxu1 %v1378_v27  ;;  %1991 = vmatpush.bf16.msra.mxu2 %v3044_v6 }
 0x268   :  { %v1213_v44 = vadd.f32 %v1212_v30, %v1199_v37 }
 0x269   :  { %v1187_v40 = vadd.f32 %v1186_v34, %v1173_v35  ;;  %v456_v35 = vperm.slane %v3413_v39, 7 }
 0x26a   :  { %v1348_v54 = vmul.f32 0.01, %v1213_v44  ;;  %vm1332_vm2 = vcmp.gt.f32.partialorder %v1213_v44, 0.0  ;;  %2006 = vmatpush.bf16.msra.mxu3 %v3051_v24 }
 0x26b   :  { %vm1339_vm1 = vcmp.gt.f32.partialorder %v1187_v40, 0.0  ;;  %v1355_v43 = vmul.f32 0.01, %v1187_v40  ;;  %1992 = vmatpush.bf16.msra.mxu2 %v3043_v16 }
 0x26c   :  { %v1364_v62 = vsel %vm1332_vm2, %v1213_v44, %v1348_v54 }
 0x26d   :  { %v1371_v46 = vsel %vm1339_vm1, %v1187_v40, %v1355_v43  ;;  %v1200_v47 = vpop.f32.mrf.mxu2  ;;  %v1214_v48 = vpop.f32.mrf.mxu3 }
 0x26e   :  { %v1379_v50 = vpack.c.bf16 %v1371_v46, %v1363_v45  ;;  %v1201_v51 = vadd.f32 %v1200_v47, %v452_v26 }
 0x26f   :  { %v1226_v56 = vpop.f32.mrf.mxu0  ;;  %v1240_v57 = vpop.f32.mrf.mxu1 }
 0x270   :  { %v1215_v55 = vadd.f32 %v1214_v48, %v1201_v51  ;;  %1937 = vmatmul.bf16.vlgmr.msrb.gmra.mxu2 %v1379_v50  ;;  %v1227_v60 = vadd.f32 %v1226_v56, %v453_v52 }
 0x272   :  { %vm1340_vm3 = vcmp.gt.f32.partialorder %v1215_v55, 0.0  ;;  %v1356_v59 = vmul.f32 0.01, %v1215_v55  ;;  %v1241_v3 = vadd.f32 %v1240_v57, %v1227_v60 }
 0x274   :  { %v1372_v63 = vsel %vm1340_vm3, %v1215_v55, %v1356_v59  ;;  %v1349_v14 = vmul.f32 0.01, %v1241_v3  ;;  %vm1333_vm4 = vcmp.gt.f32.partialorder %v1241_v3, 0.0 }
 0x275   :  { %v1380_v0 = vpack.c.bf16 %v1372_v63, %v1364_v62 }
 0x276   :  { %v1365_v20 = vsel %vm1333_vm4, %v1241_v3, %v1349_v14 }
 0x277   :  { %1951 = vmatmul.bf16.vlgmr.msrb.gmra.mxu3 %v1380_v0  ;;  %v1228_v7 = vpop.f32.mrf.mxu0  ;;  %v1242_v13 = vpop.f32.mrf.mxu1 }
 0x278   :  { %v1254_v4 = vpop.f32.mrf.mxu2  ;;  %v1268_v5 = vpop.f32.mrf.mxu3  ;;  %v1229_v8 = vadd.f32 %v1228_v7, %v453_v52 }
 0x279   :  { %v1255_v10 = vadd.f32 %v1254_v4, %v454_v2 }
 0x27a   :  { %v1243_v15 = vadd.f32 %v1242_v13, %v1229_v8 }
 0x27b   :  { %v1269_v19 = vadd.f32 %v1268_v5, %v1255_v10 }
 0x27c   :  { %vm1341_vm5 = vcmp.gt.f32.partialorder %v1243_v15, 0.0  ;;  %v1357_v17 = vmul.f32 0.01, %v1243_v15 }
 0x27d   :  { %v1350_v25 = vmul.f32 0.01, %v1269_v19  ;;  %vm1334_vm6 = vcmp.gt.f32.partialorder %v1269_v19, 0.0 }
 0x27e   :  { %v1373_v21 = vsel %vm1341_vm5, %v1243_v15, %v1357_v17 }
 0x27f   :  { %v1381_v11 = vpack.c.bf16 %v1373_v21, %v1365_v20  ;;  %v1366_v28 = vsel %vm1334_vm6, %v1269_v19, %v1350_v25 }
 0x280   :  { %v1256_v22 = vpop.f32.mrf.mxu2  ;;  %v1270_v23 = vpop.f32.mrf.mxu3 }
 0x281   :  { %v1257_v12 = vadd.f32 %v1256_v22, %v454_v2  ;;  %1965 = vmatmul.bf16.vlgmr.msra.gmra.mxu0 %v1381_v11  ;;  %v3080_v2 = vld [vmem:[%s3442_s10] ss:$0 sm:$0xff]  ;;  %s3296_s10 = smov [#allocation14]  }
 0x282   :  { %s2027_s16 = sshll.u32 %s3296_s10, 4  ;;  %s2028_s16 = int_to_ptr.vmem [resolvable:$true] %s2027_s16 }
 0x283   :  { %v1271_v26 = vadd.f32 %v1270_v23, %v1257_v12 }
 0x285   :  { %vm1342_vm7 = vcmp.gt.f32.partialorder %v1271_v26, 0.0  ;;  %v1358_v27 = vmul.f32 0.01, %v1271_v26 }
 0x287   :  { %v1374_v29 = vsel %vm1342_vm7, %v1271_v26, %v1358_v27 }
 0x288   :  { %v1382_v30 = vpack.c.bf16 %v1374_v29, %v1366_v28 }
 0x28a   :  { %1979 = vmatmul.bf16.vlgmr.msra.gmra.mxu1 %v1382_v30 }
 0x28f   :  { %v1282_v32 = vpop.f32.mrf.mxu0  ;;  %v1296_v33 = vpop.f32.mrf.mxu1 }
 0x290   :  { %v1283_v34 = vadd.f32 %v1282_v32, %v455_v31 }
 0x292   :  { %v1297_v36 = vadd.f32 %v1296_v33, %v1283_v34 }
 0x294   :  { %v1351_v44 = vmul.f32 0.01, %v1297_v36  ;;  %vm1335_vm8 = vcmp.gt.f32.partialorder %v1297_v36, 0.0 }
 0x296   :  { %v1367_v48 = vsel %vm1335_vm8, %v1297_v36, %v1351_v44 }
 0x297   :  { %v1310_v37 = vpop.f32.mrf.mxu2  ;;  %v1324_v38 = vpop.f32.mrf.mxu3 }
 0x298   :  { %v1284_v40 = vpop.f32.mrf.mxu0  ;;  %v1311_v42 = vadd.f32 %v1310_v37, %v456_v35  ;;  %v1298_v43 = vpop.f32.mrf.mxu1 }
 0x299   :  { %v1285_v41 = vadd.f32 %v1284_v40, %v455_v31 }
 0x29a   :  { %v1325_v47 = vadd.f32 %v1324_v38, %v1311_v42 }
 0x29b   :  { %v1299_v45 = vadd.f32 %v1298_v43, %v1285_v41 }
 0x29c   :  { %v1352_v39 = vmul.f32 0.01, %v1325_v47  ;;  %vm1336_vm10 = vcmp.gt.f32.partialorder %v1325_v47, 0.0 }
 0x29d   :  { %vm1343_vm9 = vcmp.gt.f32.partialorder %v1299_v45, 0.0  ;;  %v1359_v46 = vmul.f32 0.01, %v1299_v45 }
 0x29e   :  { %v1368_v56 = vsel %vm1336_vm10, %v1325_v47, %v1352_v39 }
 0x29f   :  { %v1375_v49 = vsel %vm1343_vm9, %v1299_v45, %v1359_v46  ;;  %v1312_v50 = vpop.f32.mrf.mxu2  ;;  %v1326_v53 = vpop.f32.mrf.mxu3 }
 0x2a0   :  { %v1383_v51 = vpack.c.bf16 %v1375_v49, %v1367_v48  ;;  %v1313_v52 = vadd.f32 %v1312_v50, %v456_v35 }
 0x2a2   :  { %v1327_v54 = vadd.f32 %v1326_v53, %v1313_v52  ;;  %1993 = vmatmul.bf16.vlgmr.msra.gmra.mxu2 %v1383_v51 }
 0x2a4   :  { %vm1344_vm11 = vcmp.gt.f32.partialorder %v1327_v54, 0.0  ;;  %v1360_v55 = vmul.f32 0.01, %v1327_v54 }
 0x2a6   :  { %v1376_v57 = vsel %vm1344_vm11, %v1327_v54, %v1360_v55 }
 0x2a7   :  { %v1384_v58 = vpack.c.bf16 %v1376_v57, %v1368_v56 }
 0x2a9   :  { %2007 = vmatmul.bf16.vlgmr.msra.gmra.mxu3 %v1384_v58 }
 0x2dd   :  { %v1910_v59 = vpop.f32.mrf.mxu0 }
 0x2de   :  { %v1911_v4 = vadd.f32 %v3080_v2, %v1910_v59 }
 0x2e4   :  { %v1924_v60 = vpop.f32.mrf.mxu1 }
 0x2e5   :  { %v1912_v62 = vpop.f32.mrf.mxu0  ;;  %v1925_v7 = vadd.f32 %v1924_v60, %v1911_v4 }
 0x2e6   :  { %v1913_v9 = vadd.f32 %v3080_v2, %v1912_v62 }
 0x2ec   :  { %v1926_v0 = vpop.f32.mrf.mxu1 }
 0x2ed   :  { %v1927_v13 = vadd.f32 %v1926_v0, %v1913_v9 }
 0x2f3   :  { %v1938_v61 = vpop.f32.mrf.mxu2 }
 0x2f4   :  { %v1939_v10 = vadd.f32 %v1938_v61, %v1925_v7 }
 0x2fa   :  { %v1952_v63 = vpop.f32.mrf.mxu3 }
 0x2fb   :  { %v1940_v1 = vpop.f32.mrf.mxu2  ;;  %v1953_v14 = vadd.f32 %v1952_v63, %v1939_v10 }
 0x2fc   :  { %v1941_v15 = vadd.f32 %v1940_v1, %v1927_v13 }
 0x2fe   :  { %v1966_v3 = vpop.f32.mrf.mxu0 }
 0x2ff   :  { %v1967_v16 = vadd.f32 %v1966_v3, %v1953_v14 }
 0x302   :  { %v1954_v5 = vpop.f32.mrf.mxu3 }
 0x303   :  { %v1955_v19 = vadd.f32 %v1954_v5, %v1941_v15 }
 0x306   :  { %v1968_v17 = vpop.f32.mrf.mxu0 }
 0x307   :  { %v1980_v6 = vpop.f32.mrf.mxu1  ;;  %v1969_v22 = vadd.f32 %v1968_v17, %v1955_v19 }
 0x308   :  { %v1981_v20 = vadd.f32 %v1980_v6, %v1967_v16 }
 0x30f   :  { %v1982_v21 = vpop.f32.mrf.mxu1 }
 0x310   :  { %v1983_v23 = vadd.f32 %v1982_v21, %v1969_v22 }
 0x325   :  { %v1994_v8 = vpop.f32.mrf.mxu2 }
 0x326   :  { %v1995_v11 = vadd.f32 %v1994_v8, %v1981_v20 }
 0x32c   :  { %v2008_v18 = vpop.f32.mrf.mxu3 }
 0x32d   :  { %v1996_v12 = vpop.f32.mrf.mxu2  ;;  %v2009_v24 = vadd.f32 %v2008_v18, %v1995_v11 }
 0x32e   :  { %v1997_v25 = vadd.f32 %v1996_v12, %v1983_v23 }
 0x32f   :  { %v2015_v27 = vmul.f32 0.01, %v2009_v24  ;;  %vm2013_vm12 = vcmp.gt.f32.partialorder %v2009_v24, 0.0 }
 0x331   :  { %v2017_v30 = vsel %vm2013_vm12, %v2009_v24, %v2015_v27 }
 0x334   :  { %v2010_v26 = vpop.f32.mrf.mxu3 }
 0x335   :  { %v2011_v28 = vadd.f32 %v2010_v26, %v1997_v25 }
 0x337   :  { %vm2014_vm13 = vcmp.gt.f32.partialorder %v2011_v28, 0.0  ;;  %v2016_v29 = vmul.f32 0.01, %v2011_v28 }
 0x339   :  { %v2018_v31 = vsel %vm2014_vm13, %v2011_v28, %v2016_v29 }
 0x33a   :  { %v3062_v32 = vpack.c.bf16 %v2018_v31, %v2017_v30 }
 0x33c   :  { %3063 = vst [vmem:[#allocation14] sm:$0xff] %v3062_v32  }
 0x33d   :  { %2035 = dma.vmem_to_hbm [thread:$0]  %s2028_s16, 128, %s2030_s19, [#allocation4], %s3294_s12, %s3294_s12, %s3295_s13  }
 0x33e   :  { %3281 = dma.done.wait [#allocation4], 128  }
 0x33f   :  { %3282 = vsyncadd [#allocation4], 4294967168 }
 0x340   :  { %2040 = vsyncpa [#allocation3], 1 }
 0x341   :  { %2041 = vsyncpa [#allocation6], 1 }
 0x342   :  { %2042 = vsyncpa [#allocation9], 1 }
 0x343   :  { %2043 = vsyncpa [#allocation12], 1 }
 0x344   :  { %2044 = vsyncpa [#allocation4], 1 }

</bundles_post_ra>
